<compile_context>
chip_gen: v5e
topology: v5e:2x2
jax: 0.10.0
libtpu: 0.0.40
codegen_flags: <defaults>
</compile_context>

<pallas_src>
import numpy as np

import jax
import jax.numpy as jnp
from jax import lax
from jax.experimental import pallas as pl
from jax.experimental.pallas import tpu as pltpu


# ----------------------------- fused decoder kernel ------------------------ #

def decoder_kernel(
    # scalars (SMEM)
    bsizes_ref,
    # per-batch constants / per-timestep precomputes (VMEM, whole arrays)
    feats_ref, favgpre_ref, imgatt_ref, embtd_ref, embgate_ref,
    # weights (bf16 matrices, f32 bias rows)
    td_stack_ref,                       # (2D, 4D)   LHS [h2 | h1]
    h1_stack_ref,                       # (D, D+A+4D) -> [gate | h1_att | lang_h1]
    atts_w_ref, atts_b_ref,             # (D, A), (1, A)  bias = as_b + ad_b
    attv_ref,                           # (1, A)
    ws_w_ref, ws_b_ref,                 # (D, F), (1, F)
    lang_stack_ref, lang_b_ref,         # (F+D, 4D), (1, 4D)   LHS [aw | h2]
    hl_stack_ref, hl_b_ref,             # (2D, 4D), (1, 4D)    LHS [h1n | ah1]
    ar_w_ref, ar_b_ref,                 # (D, D), (1, D)
    # outputs
    h2_out_ref,                         # (T, B, D) f32
    aw_out_ref,                         # (T, B, F) f32
    loss_ref,                           # (1, 1)   f32
):
    T, B, _ = embtd_ref.shape
    D = favgpre_ref.shape[1] // 4
    A = attv_ref.shape[1]
    bf16 = jnp.bfloat16

    # Load weights / constants once; they stay VMEM-resident for the whole loop.
    feats = feats_ref[...]
    favgpre = favgpre_ref[...]
    imgatt = imgatt_ref[...]
    td_stack = td_stack_ref[...]
    h1_stack = h1_stack_ref[...]
    atts_w = atts_w_ref[...]
    atts_b = atts_b_ref[...]
    att_v = attv_ref[...]
    ws_w = ws_w_ref[...]
    ws_b = ws_b_ref[...]
    lang_stack = lang_stack_ref[...]
    lang_b = lang_b_ref[...]
    hl_stack = hl_stack_ref[...]
    hl_b = hl_b_ref[...]
    ar_w = ar_w_ref[...]
    ar_b = ar_b_ref[...]

    row_ids = lax.broadcasted_iota(jnp.int32, (B, 1), 0)

    def mm(x, w):
        """MXU matmul: bf16 operands, f32 accumulation."""
        return jnp.dot(x.astype(bf16), w, preferred_element_type=jnp.float32)

    def lstm_from_gates(gates, c):
        """PyTorch LSTMCell gate order i, f, g, o; `gates` already has all biases."""
        i = jax.nn.sigmoid(gates[:, 0 * D:1 * D])
        f = jax.nn.sigmoid(gates[:, 1 * D:2 * D])
        g = jnp.tanh(gates[:, 2 * D:3 * D])
        o = jax.nn.sigmoid(gates[:, 3 * D:4 * D])
        c_new = f * c + i * g
        return o * jnp.tanh(c_new), c_new

    def step(t, carry):
        h1, c1, h2, c2, ah1, ac1, loss = carry
        bsz = bsizes_ref[t]                                   # active rows this step
        mask = (row_ids < bsz).astype(jnp.float32)            # (B, 1)

        # --- top-down LSTM: fused dot [h2 | h1] @ [W_h2 ; W_hh] ----------------
        td_gates = favgpre + embtd_ref[t] + mm(
            jnp.concatenate([h2, h1], axis=1), td_stack)
        h1n, c1n = lstm_from_gates(td_gates, c1)
        h1n_bf = h1n.astype(bf16)                             # cast once, reused

        # --- fused h1n consumers: sentinel gate | att_decoder | lang W_h1 ------
        fused = jnp.dot(h1n_bf, h1_stack, preferred_element_type=jnp.float32)
        gate = jax.nn.sigmoid(embgate_ref[t] + fused[:, :D])  # gh_b folded upstream
        h1_att = fused[:, D:D + A]                            # ad_b folded upstream
        lang_h1 = fused[:, D + A:]
        sent = gate * jnp.tanh(c1n)

        # --- adaptive attention -------------------------------------------------
        sent_att = mm(sent, atts_w) + atts_b                  # (B, A)
        att1 = jnp.maximum(h1_att[:, None, :] + imgatt, 0.0)  # (B, R, A) relu
        attn_img = jnp.sum(att1 * att_v[None, :, :], axis=2)  # (B, R)
        sent1 = jnp.maximum(sent_att + h1_att, 0.0)
        attn_sent = jnp.sum(sent1 * att_v, axis=1, keepdims=True)   # (B, 1)
        # (att-layer bias shifts every logit equally -> softmax-invariant, dropped)
        m = jnp.maximum(jnp.max(attn_img, axis=1, keepdims=True), attn_sent)
        e_img = jnp.exp(attn_img - m)
        e_sent = jnp.exp(attn_sent - m)
        inv = 1.0 / (jnp.sum(e_img, axis=1, keepdims=True) + e_sent)   # exact
        w_img = e_img * inv
        w_sent = e_sent * inv

        aw_sent = mm(sent * w_sent, ws_w) + ws_b              # (B, F)
        # TODO(synk): at production R (36-196 regions) do this weighted sum on the
        # MXU (einsum 'br,brf->bf') instead of the XLU sublane reduce.
        aw_images = jnp.sum(feats * w_img[:, :, None], axis=1) + aw_sent

        # --- language LSTM: fused dot [aw | h2] @ [W_aw ; W_hh] -----------------
        lang_gates = (mm(jnp.concatenate([aw_images, h2], axis=1), lang_stack)
                      + lang_h1 + lang_b)
        h2n, c2n = lstm_from_gates(lang_gates, c2)

        # --- ARNet hidden LSTM: fused dot [h1n | ah1] @ [W_ih ; W_hh] -----------
        hl_lhs = jnp.concatenate([h1n_bf, ah1.astype(bf16)], axis=1)
        hl_gates = jnp.dot(hl_lhs, hl_stack, preferred_element_type=jnp.float32) + hl_b
        ah1n, ac1n = lstm_from_gates(hl_gates, ac1)

        # --- ARNet reconstruction loss (contributes only for t > 0) -------------
        pred_prev = jnp.dot(ah1n.astype(bf16), ar_w,
                            preferred_element_type=jnp.float32) + ar_b
        diff = (pred_prev - h1) * mask                        # h1 == hidden1 at t-1
        row_sq = jnp.sum(diff * diff, axis=1, keepdims=True)  # (B, 1)
        tot = jnp.sum(row_sq, axis=0, keepdims=True)          # (1, 1)
        w = ((t > 0).astype(jnp.float32)
             * (jnp.float32(0.005) / bsz.astype(jnp.float32)))
        loss = loss + tot * w

        # --- emit activations for the hoisted vocab projection ------------------
        h2_out_ref[t] = h2n
        aw_out_ref[t] = aw_images

        return (h1n, c1n, h2n, c2n, ah1n, ac1n, loss)

    z = lambda: jnp.zeros((B, D), jnp.float32)
    carry0 = (z(), z(), z(), z(), z(), z(), jnp.zeros((1, 1), jnp.float32))
    final = lax.fori_loop(0, T, step, carry0)
    loss_ref[...] = final[6]


# ----------------------------- parameter init ------------------------------ #

def wn_linear(key, in_f, out_f):
    """weight_norm(nn.Linear) -> effective (W, b) in PyTorch (out,in) layout."""
    k1, k2, k3 = jax.random.split(key, 3)
    v = jax.random.normal(k1, (out_f, in_f), jnp.float32) * 0.1
    g = jax.random.uniform(k2, (out_f, 1), jnp.float32, minval=0.5, maxval=1.5)
    w = g * v / (jnp.linalg.norm(v, axis=1, keepdims=True) + 1e-12)
    b = jax.random.normal(k3, (out_f,), jnp.float32) * 0.1
    return w, b


def plain_linear(key, in_f, out_f, scale=0.1, zero_bias=False):
    k1, k2 = jax.random.split(key)
    w = jax.random.uniform(k1, (out_f, in_f), jnp.float32, minval=-scale, maxval=scale)
    b = (jnp.zeros((out_f,), jnp.float32) if zero_bias else
         jax.random.uniform(k2, (out_f,), jnp.float32, minval=-scale, maxval=scale))
    return w, b


def lstm_params(key, in_f, D):
    k = jax.random.split(key, 4)
    std = 1.0 / np.sqrt(D)
    w_ih = jax.random.uniform(k[0], (4 * D, in_f), jnp.float32, -std, std)
    w_hh = jax.random.uniform(k[1], (4 * D, D), jnp.float32, -std, std)
    b_ih = jax.random.uniform(k[2], (4 * D,), jnp.float32, -std, std)
    b_hh = jax.random.uniform(k[3], (4 * D,), jnp.float32, -std, std)
    return w_ih, w_hh, b_ih, b_hh


def init_params(key, F, D, A, E, V):
    ks = iter(jax.random.split(key, 16))
    p = {}
    # Adap_AttModule
    p["att_feat"] = wn_linear(next(ks), F, A)
    p["att_decoder"] = wn_linear(next(ks), D, A)
    p["att_sent"] = wn_linear(next(ks), D, A)
    p["weight_sent"] = wn_linear(next(ks), D, F)
    p["att"] = wn_linear(next(ks), A, 1)
    # Decoder
    p["embedding"] = jax.random.uniform(next(ks), (V, E), jnp.float32, -0.1, 0.1)
    p["TD"] = lstm_params(next(ks), E + F + D, D)
    p["lang"] = lstm_params(next(ks), F + D, D)
    p["hidden_lstm"] = lstm_params(next(ks), D, D)
    p["gate_hidden"] = wn_linear(next(ks), D, D)
    p["gate_embedding"] = wn_linear(next(ks), E, D)
    p["linear_hidden"] = plain_linear(next(ks), D, V, scale=0.1, zero_bias=True)
    p["linear_image"] = plain_linear(next(ks), F, V, scale=0.1, zero_bias=True)
    p["arnet_linear"] = plain_linear(next(ks), D, D, scale=1.0 / np.sqrt(D))
    return p


# ----------------------------- fused forward (jitted) ---------------------- #

@jax.jit
def _fused_forward(params, feats_s, seq_s, bsizes):
    B, R, F = feats_s.shape
    T = bsizes.shape[0]

    emb_tab = params["embedding"]
    V, E = emb_tab.shape
    td_wih, td_whh, td_bih, td_bhh = params["TD"]
    D = td_whh.shape[1]
    ad_w, ad_b = params["att_decoder"]
    A = ad_w.shape[0]

    gh_w, gh_b = params["gate_hidden"]
    ge_w, ge_b = params["gate_embedding"]
    as_w, as_b = params["att_sent"]
    af_w, af_b = params["att_feat"]
    av_w, _av_b = params["att"]           # att bias dropped: softmax shift-invariant
    ws_w, ws_b = params["weight_sent"]
    lg_wih, lg_whh, lg_bih, lg_bhh = params["lang"]
    hl_wih, hl_whh, hl_bih, hl_bhh = params["hidden_lstm"]
    ar_w, ar_b = params["arnet_linear"]
    lh_w, lh_b = params["linear_hidden"]
    li_w, li_b = params["linear_image"]

    # ---- hoisted, timestep-invariant precomputes (regular XLA) --------------
    embeddings = jnp.take(emb_tab, seq_s[:, :T], axis=0)              # (B, T, E)
    favg = jnp.mean(feats_s, axis=1)                                  # (B, F)

    td_T = td_wih.T                                                   # (D+F+E, 4D)
    td_wh2, td_wfa, td_wemb = td_T[:D], td_T[D:D + F], td_T[D + F:]
    favgpre = favg @ td_wfa + (td_bih + td_bhh)[None, :]              # (B, 4D)
    embtd = jnp.einsum("bte,eg->tbg", embeddings, td_wemb)            # (T, B, 4D)
    embgate = (jnp.einsum("bte,ed->tbd", embeddings, ge_w.T)
               + (ge_b + gh_b)[None, None, :])                        # gate biases folded
    imgatt = (jnp.einsum("brf,fa->bra", feats_s, af_w.T)
              + (af_b + ad_b)[None, None, :])                         # att biases folded

    lg_T = lg_wih.T                                                   # (F+D, 4D)
    bf = lambda w: w.astype(jnp.bfloat16)
    rowv = lambda b: jnp.asarray(b, jnp.float32).reshape(1, -1)

    weights = [
        bf(jnp.concatenate([td_wh2, td_whh.T], axis=0)),              # td_stack  (2D,4D)
        bf(jnp.concatenate([gh_w.T, ad_w.T, lg_T[F:]], axis=1)),      # h1_stack  (D,D+A+4D)
        bf(as_w.T), rowv(as_b + ad_b),                                # att_sent
        av_w.reshape(1, A).astype(jnp.float32),                       # att vector
        bf(ws_w.T), rowv(ws_b),                                       # weight_sent
        bf(jnp.concatenate([lg_T[:F], lg_whh.T], axis=0)),            # lang_stack (F+D,4D)
        rowv(lg_bih + lg_bhh),
        bf(jnp.concatenate([hl_wih.T, hl_whh.T], axis=0)),            # hl_stack  (2D,4D)
        rowv(hl_bih + hl_bhh),
        bf(ar_w.T), rowv(ar_b),                                       # arnet_linear
    ]

    smem = pl.BlockSpec(memory_space=pltpu.MemorySpace.SMEM)
    vmem = pl.BlockSpec(memory_space=pltpu.MemorySpace.VMEM)
    in_specs = [smem] + [vmem] * (5 + len(weights))
    out_specs = (vmem, vmem, vmem)
    out_shape = (
        jax.ShapeDtypeStruct((T, B, D), jnp.float32),                 # h2 per step
        jax.ShapeDtypeStruct((T, B, F), jnp.float32),                 # aw_images per step
        jax.ShapeDtypeStruct((1, 1), jnp.float32),                    # ARNet loss
    )

    h2_all, aw_all, loss = pl.pallas_call(
        decoder_kernel,
        out_shape=out_shape,
        in_specs=in_specs,
        out_specs=out_specs,
    )(bsizes, feats_s, favgpre, imgatt, embtd, embgate, *weights)

    # ---- hoisted vocab projection: one (T*B, D+F) @ (D+F, V) matmul ---------
    hw = jnp.concatenate([h2_all, aw_all], axis=-1)                   # (T, B, D+F)
    w_proj = jnp.concatenate([lh_w.T, li_w.T], axis=0)                # (D+F, V)
    preds = jnp.einsum("tbk,kv->btv", hw, w_proj,
                       preferred_element_type=jnp.float32)            # (B, T, V) directly
    preds = preds + (lh_b + li_b)[None, None, :]
    # rows >= bSize at step t stay zero (PyTorch writes only preds[:bSize, t, :])
    mask = (jnp.arange(B)[:, None] < bsizes[None, :]).astype(preds.dtype)   # (B, T)
    preds = preds * mask[:, :, None]
    return preds, loss[0, 0]


# ----------------------------- forward wrapper ------------------------------ #

def decoder_forward(params, feats, sequences, sizes):
    """Matches DecoderARnetAdap_AttModule.forward (dropout = identity)."""
    # host-side sort by caption length, descending (torch.sort equivalent)
    sizes_np = np.asarray(jax.device_get(sizes)).reshape(-1)
    order = np.argsort(-sizes_np, kind="stable")
    sizes_sorted = sizes_np[order]
    decode_lengths = [int(s) - 1 for s in sizes_sorted]
    T = max(decode_lengths)
    bsizes = np.array([sum(1 for l in decode_lengths if l > t) for t in range(T)],
                      dtype=np.int32)

    order_j = jnp.asarray(order, dtype=jnp.int32)
    feats_s = jnp.take(feats, order_j, axis=0)
    seq_s = jnp.take(sequences, order_j, axis=0)

    preds, loss_ar = _fused_forward(params, feats_s, seq_s, jnp.asarray(bsizes))
    return preds, seq_s, decode_lengths, order_j, loss_ar


# --------------------------------- main ------------------------------------ #

if __name__ == "__main__":
    # small but lane-dense shapes (last dims multiples of 128, V multiple of 128)
    B, R = 8, 8                 # batch, number of bottom-up image regions
    F = 128                     # featureSize
    D = 128                     # decodeSize
    A = 128                     # attSize
    E = 128                     # embedSize
    V = 256                     # vocabSize
    S = 8                       # max sequence length

    key = jax.random.PRNGKey(0)
    k_param, k_feat, k_seq = jax.random.split(key, 3)

    params = init_params(k_param, F, D, A, E, V)
    feats = jax.random.normal(k_feat, (B, R, F), jnp.float32)
    sequences = jax.random.randint(k_seq, (B, S), 0, V, dtype=jnp.int32)
    sizes = jnp.array([[8], [4], [6], [7], [8], [3], [5], [2]], dtype=jnp.int32)

    preds, seqs_sorted, dec_lens, positions, loss_ar = decoder_forward(
        params, feats, sequences, sizes)

    jax.block_until_ready((preds, loss_ar))
    assert preds.shape == (B, max(dec_lens), V)
    assert np.isfinite(np.asarray(preds)).all()
    assert np.isfinite(float(loss_ar))
    print("KERNEL_OK")
</pallas_src>

<mosaic_0001>
module attributes {stable_mosaic.version = 11 : i64} {
  func.func @decoder_kernel(%arg0: memref<7xi32, #tpu.memory_space<smem>>, %arg1: memref<8x8x128xf32, #tpu.memory_space<vmem>>, %arg2: memref<8x512xf32, #tpu.memory_space<vmem>>, %arg3: memref<8x8x128xf32, #tpu.memory_space<vmem>>, %arg4: memref<7x8x512xf32, #tpu.memory_space<vmem>>, %arg5: memref<7x8x128xf32, #tpu.memory_space<vmem>>, %arg6: memref<256x512xbf16, #tpu.memory_space<vmem>>, %arg7: memref<128x768xbf16, #tpu.memory_space<vmem>>, %arg8: memref<128x128xbf16, #tpu.memory_space<vmem>>, %arg9: memref<1x128xf32, #tpu.memory_space<vmem>>, %arg10: memref<1x128xf32, #tpu.memory_space<vmem>>, %arg11: memref<128x128xbf16, #tpu.memory_space<vmem>>, %arg12: memref<1x128xf32, #tpu.memory_space<vmem>>, %arg13: memref<256x512xbf16, #tpu.memory_space<vmem>>, %arg14: memref<1x512xf32, #tpu.memory_space<vmem>>, %arg15: memref<256x512xbf16, #tpu.memory_space<vmem>>, %arg16: memref<1x512xf32, #tpu.memory_space<vmem>>, %arg17: memref<128x128xbf16, #tpu.memory_space<vmem>>, %arg18: memref<1x128xf32, #tpu.memory_space<vmem>>, %arg19: memref<7x8x128xf32, #tpu.memory_space<vmem>>, %arg20: memref<7x8x128xf32, #tpu.memory_space<vmem>>, %arg21: memref<1x1xf32, #tpu.memory_space<vmem>>) attributes {dimension_semantics = [], scalar_prefetch = 0 : i64, scratch_operands = 0 : i64, tpu.core_type = #tpu.core_type<tc>} {
    %c0 = arith.constant 0 : index
    %c0_0 = arith.constant 0 : index
    %c0_1 = arith.constant 0 : index
    %0 = vector.load %arg1[%c0, %c0_0, %c0_1] : memref<8x8x128xf32, #tpu.memory_space<vmem>>, vector<8x8x128xf32>
    %c0_2 = arith.constant 0 : index
    %c0_3 = arith.constant 0 : index
    %1 = vector.load %arg2[%c0_2, %c0_3] : memref<8x512xf32, #tpu.memory_space<vmem>>, vector<8x512xf32>
    %c0_4 = arith.constant 0 : index
    %c0_5 = arith.constant 0 : index
    %c0_6 = arith.constant 0 : index
    %2 = vector.load %arg3[%c0_4, %c0_5, %c0_6] : memref<8x8x128xf32, #tpu.memory_space<vmem>>, vector<8x8x128xf32>
    %c0_7 = arith.constant 0 : index
    %c0_8 = arith.constant 0 : index
    %3 = vector.load %arg6[%c0_7, %c0_8] : memref<256x512xbf16, #tpu.memory_space<vmem>>, vector<256x512xbf16>
    %c0_9 = arith.constant 0 : index
    %c0_10 = arith.constant 0 : index
    %4 = vector.load %arg7[%c0_9, %c0_10] : memref<128x768xbf16, #tpu.memory_space<vmem>>, vector<128x768xbf16>
    %c0_11 = arith.constant 0 : index
    %c0_12 = arith.constant 0 : index
    %5 = vector.load %arg8[%c0_11, %c0_12] : memref<128x128xbf16, #tpu.memory_space<vmem>>, vector<128x128xbf16>
    %c0_13 = arith.constant 0 : index
    %c0_14 = arith.constant 0 : index
    %6 = vector.load %arg9[%c0_13, %c0_14] : memref<1x128xf32, #tpu.memory_space<vmem>>, vector<1x128xf32>
    %c0_15 = arith.constant 0 : index
    %c0_16 = arith.constant 0 : index
    %7 = vector.load %arg10[%c0_15, %c0_16] : memref<1x128xf32, #tpu.memory_space<vmem>>, vector<1x128xf32>
    %c0_17 = arith.constant 0 : index
    %c0_18 = arith.constant 0 : index
    %8 = vector.load %arg11[%c0_17, %c0_18] : memref<128x128xbf16, #tpu.memory_space<vmem>>, vector<128x128xbf16>
    %c0_19 = arith.constant 0 : index
    %c0_20 = arith.constant 0 : index
    %9 = vector.load %arg12[%c0_19, %c0_20] : memref<1x128xf32, #tpu.memory_space<vmem>>, vector<1x128xf32>
    %c0_21 = arith.constant 0 : index
    %c0_22 = arith.constant 0 : index
    %10 = vector.load %arg13[%c0_21, %c0_22] : memref<256x512xbf16, #tpu.memory_space<vmem>>, vector<256x512xbf16>
    %c0_23 = arith.constant 0 : index
    %c0_24 = arith.constant 0 : index
    %11 = vector.load %arg14[%c0_23, %c0_24] : memref<1x512xf32, #tpu.memory_space<vmem>>, vector<1x512xf32>
    %c0_25 = arith.constant 0 : index
    %c0_26 = arith.constant 0 : index
    %12 = vector.load %arg15[%c0_25, %c0_26] : memref<256x512xbf16, #tpu.memory_space<vmem>>, vector<256x512xbf16>
    %c0_27 = arith.constant 0 : index
    %c0_28 = arith.constant 0 : index
    %13 = vector.load %arg16[%c0_27, %c0_28] : memref<1x512xf32, #tpu.memory_space<vmem>>, vector<1x512xf32>
    %c0_29 = arith.constant 0 : index
    %c0_30 = arith.constant 0 : index
    %14 = vector.load %arg17[%c0_29, %c0_30] : memref<128x128xbf16, #tpu.memory_space<vmem>>, vector<128x128xbf16>
    %c0_31 = arith.constant 0 : index
    %c0_32 = arith.constant 0 : index
    %15 = vector.load %arg18[%c0_31, %c0_32] : memref<1x128xf32, #tpu.memory_space<vmem>>, vector<1x128xf32>
    %16 = tpu.iota {dimensions = array<i32: 0>} : vector<8x1xi32>
    %cst = arith.constant 0.000000e+00 : f32
    %17 = vector.broadcast %cst : f32 to vector<8x128xf32>
    %cst_33 = arith.constant 0.000000e+00 : f32
    %18 = vector.broadcast %cst_33 : f32 to vector<8x128xf32>
    %cst_34 = arith.constant 0.000000e+00 : f32
    %19 = vector.broadcast %cst_34 : f32 to vector<8x128xf32>
    %cst_35 = arith.constant 0.000000e+00 : f32
    %20 = vector.broadcast %cst_35 : f32 to vector<8x128xf32>
    %cst_36 = arith.constant 0.000000e+00 : f32
    %21 = vector.broadcast %cst_36 : f32 to vector<8x128xf32>
    %cst_37 = arith.constant 0.000000e+00 : f32
    %22 = vector.broadcast %cst_37 : f32 to vector<8x128xf32>
    %cst_38 = arith.constant 0.000000e+00 : f32
    %23 = vector.broadcast %cst_38 : f32 to vector<1x1xf32>
    %c0_i32 = arith.constant 0 : i32
    %c7_i32 = arith.constant 7 : i32
    %24 = arith.addi %c0_i32, %c7_i32 : i32
    %c1_i32 = arith.constant 1 : i32
    %25:7 = scf.for %arg22 = %c0_i32 to %24 step %c1_i32 iter_args(%arg23 = %17, %arg24 = %18, %arg25 = %19, %arg26 = %20, %arg27 = %21, %arg28 = %22, %arg29 = %23) -> (vector<8x128xf32>, vector<8x128xf32>, vector<8x128xf32>, vector<8x128xf32>, vector<8x128xf32>, vector<8x128xf32>, vector<1x1xf32>)  : i32 {
      %27 = arith.index_cast %arg22 : i32 to index
      %28 = memref.load %arg0[%27] : memref<7xi32, #tpu.memory_space<smem>>
      %29 = vector.broadcast %28 : i32 to vector<8x1xi32>
      %30 = arith.cmpi slt, %16, %29 : vector<8x1xi32>
      %31 = arith.extui %30 : vector<8x1xi1> to vector<8x1xi32>
      %32 = arith.sitofp %31 : vector<8x1xi32> to vector<8x1xf32>
      %33 = arith.index_cast %arg22 : i32 to index
      %c0_42 = arith.constant 0 : index
      %c0_43 = arith.constant 0 : index
      %34 = vector.load %arg4[%33, %c0_42, %c0_43] : memref<7x8x512xf32, #tpu.memory_space<vmem>>, vector<1x8x512xf32>
      %35 = vector.shape_cast %34 : vector<1x8x512xf32> to vector<8x512xf32>
      %36 = arith.addf %1, %35 : vector<8x512xf32>
      %37 = tpu.concatenate %arg25, %arg23 in 1 : vector<8x128xf32>, vector<8x128xf32> -> vector<8x256xf32>
      %38 = arith.truncf %37 : vector<8x256xf32> to vector<8x256xbf16>
      %cst_44 = arith.constant dense<0.000000e+00> : vector<8x512xf32>
      %39 = tpu.matmul %38, %3, %cst_44 {dimension_numbers = #tpu.dot_dimension_numbers<[1], [0], [0], [1], [0, 0, 1, 1], [], []>} : vector<8x256xbf16>, vector<256x512xbf16>, vector<8x512xf32> -> vector<8x512xf32>
      %40 = arith.addf %36, %39 : vector<8x512xf32>
      %41 = vector.extract_strided_slice %40 {offsets = [0, 0], sizes = [8, 128], strides = [1, 1]} : vector<8x512xf32> to vector<8x128xf32>
      %42 = arith.negf %41 : vector<8x128xf32>
      %43 = math.exp %42 : vector<8x128xf32>
      %cst_45 = arith.constant 1.000000e+00 : f32
      %44 = vector.broadcast %cst_45 : f32 to vector<8x128xf32>
      %45 = arith.addf %44, %43 : vector<8x128xf32>
      %46 = arith.divf %44, %45 : vector<8x128xf32>
      %47 = vector.extract_strided_slice %40 {offsets = [0, 128], sizes = [8, 128], strides = [1, 1]} : vector<8x512xf32> to vector<8x128xf32>
      %48 = arith.negf %47 : vector<8x128xf32>
      %49 = math.exp %48 : vector<8x128xf32>
      %cst_46 = arith.constant 1.000000e+00 : f32
      %50 = vector.broadcast %cst_46 : f32 to vector<8x128xf32>
      %51 = arith.addf %50, %49 : vector<8x128xf32>
      %52 = arith.divf %50, %51 : vector<8x128xf32>
      %53 = vector.extract_strided_slice %40 {offsets = [0, 256], sizes = [8, 128], strides = [1, 1]} : vector<8x512xf32> to vector<8x128xf32>
      %54 = math.tanh %53 : vector<8x128xf32>
      %55 = vector.extract_strided_slice %40 {offsets = [0, 384], sizes = [8, 128], strides = [1, 1]} : vector<8x512xf32> to vector<8x128xf32>
      %56 = arith.negf %55 : vector<8x128xf32>
      %57 = math.exp %56 : vector<8x128xf32>
      %cst_47 = arith.constant 1.000000e+00 : f32
      %58 = vector.broadcast %cst_47 : f32 to vector<8x128xf32>
      %59 = arith.addf %58, %57 : vector<8x128xf32>
      %60 = arith.divf %58, %59 : vector<8x128xf32>
      %61 = arith.mulf %52, %arg24 : vector<8x128xf32>
      %62 = arith.mulf %46, %54 : vector<8x128xf32>
      %63 = arith.addf %61, %62 : vector<8x128xf32>
      %64 = math.tanh %63 : vector<8x128xf32>
      %65 = arith.mulf %60, %64 : vector<8x128xf32>
      %66 = arith.truncf %65 : vector<8x128xf32> to vector<8x128xbf16>
      %cst_48 = arith.constant dense<0.000000e+00> : vector<8x768xf32>
      %67 = tpu.matmul %66, %4, %cst_48 {dimension_numbers = #tpu.dot_dimension_numbers<[1], [0], [0], [1], [0, 0, 1, 1], [], []>} : vector<8x128xbf16>, vector<128x768xbf16>, vector<8x768xf32> -> vector<8x768xf32>
      %68 = arith.index_cast %arg22 : i32 to index
      %c0_49 = arith.constant 0 : index
      %c0_50 = arith.constant 0 : index
      %69 = vector.load %arg5[%68, %c0_49, %c0_50] : memref<7x8x128xf32, #tpu.memory_space<vmem>>, vector<1x8x128xf32>
      %70 = vector.shape_cast %69 : vector<1x8x128xf32> to vector<8x128xf32>
      %71 = vector.extract_strided_slice %67 {offsets = [0, 0], sizes = [8, 128], strides = [1, 1]} : vector<8x768xf32> to vector<8x128xf32>
      %72 = arith.addf %70, %71 : vector<8x128xf32>
      %73 = arith.negf %72 : vector<8x128xf32>
      %74 = math.exp %73 : vector<8x128xf32>
      %cst_51 = arith.constant 1.000000e+00 : f32
      %75 = vector.broadcast %cst_51 : f32 to vector<8x128xf32>
      %76 = arith.addf %75, %74 : vector<8x128xf32>
      %77 = arith.divf %75, %76 : vector<8x128xf32>
      %78 = vector.extract_strided_slice %67 {offsets = [0, 128], sizes = [8, 128], strides = [1, 1]} : vector<8x768xf32> to vector<8x128xf32>
      %79 = vector.extract_strided_slice %67 {offsets = [0, 256], sizes = [8, 512], strides = [1, 1]} : vector<8x768xf32> to vector<8x512xf32>
      %80 = math.tanh %63 : vector<8x128xf32>
      %81 = arith.mulf %77, %80 : vector<8x128xf32>
      %82 = arith.truncf %81 : vector<8x128xf32> to vector<8x128xbf16>
      %cst_52 = arith.constant dense<0.000000e+00> : vector<8x128xf32>
      %83 = tpu.matmul %82, %5, %cst_52 {dimension_numbers = #tpu.dot_dimension_numbers<[1], [0], [0], [1], [0, 0, 1, 1], [], []>} : vector<8x128xbf16>, vector<128x128xbf16>, vector<8x128xf32> -> vector<8x128xf32>
      %84 = vector.broadcast %6 : vector<1x128xf32> to vector<8x128xf32>
      %85 = arith.addf %83, %84 : vector<8x128xf32>
      %86 = vector.shape_cast %78 : vector<8x128xf32> to vector<8x1x128xf32>
      %87 = vector.broadcast %86 : vector<8x1x128xf32> to vector<8x8x128xf32>
      %88 = arith.addf %87, %2 : vector<8x8x128xf32>
      %cst_53 = arith.constant 0.000000e+00 : f32
      %89 = vector.broadcast %cst_53 : f32 to vector<8x8x128xf32>
      %90 = arith.maximumf %88, %89 : vector<8x8x128xf32>
      %91 = vector.shape_cast %7 : vector<1x128xf32> to vector<1x1x128xf32>
      %92 = vector.broadcast %91 : vector<1x1x128xf32> to vector<8x8x128xf32>
      %93 = arith.mulf %90, %92 : vector<8x8x128xf32>
      %cst_54 = arith.constant dense<0.000000e+00> : vector<8x8xf32>
      %94 = vector.multi_reduction <add>, %93, %cst_54 [2] : vector<8x8x128xf32> to vector<8x8xf32>
      %95 = arith.addf %85, %78 : vector<8x128xf32>
      %cst_55 = arith.constant 0.000000e+00 : f32
      %96 = vector.broadcast %cst_55 : f32 to vector<8x128xf32>
      %97 = arith.maximumf %95, %96 : vector<8x128xf32>
      %98 = vector.broadcast %7 : vector<1x128xf32> to vector<8x128xf32>
      %99 = arith.mulf %97, %98 : vector<8x128xf32>
      %cst_56 = arith.constant dense<0.000000e+00> : vector<8xf32>
      %100 = vector.multi_reduction <add>, %99, %cst_56 [1] : vector<8x128xf32> to vector<8xf32>
      %101 = vector.shape_cast %100 : vector<8xf32> to vector<8x1xf32>
      %cst_57 = arith.constant dense<0xFF800000> : vector<8xf32>
      %102 = vector.multi_reduction <maximumf>, %94, %cst_57 [1] : vector<8x8xf32> to vector<8xf32>
      %103 = vector.shape_cast %102 : vector<8xf32> to vector<8x1xf32>
      %104 = arith.maximumf %103, %101 : vector<8x1xf32>
      %105 = vector.broadcast %104 : vector<8x1xf32> to vector<8x8xf32>
      %106 = arith.subf %94, %105 : vector<8x8xf32>
      %107 = math.exp %106 : vector<8x8xf32>
      %108 = arith.subf %101, %104 : vector<8x1xf32>
      %109 = math.exp %108 : vector<8x1xf32>
      %cst_58 = arith.constant dense<0.000000e+00> : vector<8xf32>
      %110 = vector.multi_reduction <add>, %107, %cst_58 [1] : vector<8x8xf32> to vector<8xf32>
      %111 = vector.shape_cast %110 : vector<8xf32> to vector<8x1xf32>
      %112 = arith.addf %111, %109 : vector<8x1xf32>
      %cst_59 = arith.constant 1.000000e+00 : f32
      %113 = vector.broadcast %cst_59 : f32 to vector<8x1xf32>
      %114 = arith.divf %113, %112 : vector<8x1xf32>
      %115 = vector.broadcast %114 : vector<8x1xf32> to vector<8x8xf32>
      %116 = arith.mulf %107, %115 : vector<8x8xf32>
      %117 = arith.mulf %109, %114 : vector<8x1xf32>
      %118 = vector.broadcast %117 : vector<8x1xf32> to vector<8x128xf32>
      %119 = arith.mulf %81, %118 : vector<8x128xf32>
      %120 = arith.truncf %119 : vector<8x128xf32> to vector<8x128xbf16>
      %cst_60 = arith.constant dense<0.000000e+00> : vector<8x128xf32>
      %121 = tpu.matmul %120, %8, %cst_60 {dimension_numbers = #tpu.dot_dimension_numbers<[1], [0], [0], [1], [0, 0, 1, 1], [], []>} : vector<8x128xbf16>, vector<128x128xbf16>, vector<8x128xf32> -> vector<8x128xf32>
      %122 = vector.broadcast %9 : vector<1x128xf32> to vector<8x128xf32>
      %123 = arith.addf %121, %122 : vector<8x128xf32>
      %124 = vector.shape_cast %116 : vector<8x8xf32> to vector<8x8x1xf32>
      %125 = vector.broadcast %124 : vector<8x8x1xf32> to vector<8x8x128xf32>
      %126 = arith.mulf %0, %125 : vector<8x8x128xf32>
      %cst_61 = arith.constant dense<0.000000e+00> : vector<8x128xf32>
      %127 = vector.multi_reduction <add>, %126, %cst_61 [1] : vector<8x8x128xf32> to vector<8x128xf32>
      %128 = arith.addf %127, %123 : vector<8x128xf32>
      %129 = tpu.concatenate %128, %arg25 in 1 : vector<8x128xf32>, vector<8x128xf32> -> vector<8x256xf32>
      %130 = arith.truncf %129 : vector<8x256xf32> to vector<8x256xbf16>
      %cst_62 = arith.constant dense<0.000000e+00> : vector<8x512xf32>
      %131 = tpu.matmul %130, %10, %cst_62 {dimension_numbers = #tpu.dot_dimension_numbers<[1], [0], [0], [1], [0, 0, 1, 1], [], []>} : vector<8x256xbf16>, vector<256x512xbf16>, vector<8x512xf32> -> vector<8x512xf32>
      %132 = arith.addf %131, %79 : vector<8x512xf32>
      %133 = vector.broadcast %11 : vector<1x512xf32> to vector<8x512xf32>
      %134 = arith.addf %132, %133 : vector<8x512xf32>
      %135 = vector.extract_strided_slice %134 {offsets = [0, 0], sizes = [8, 128], strides = [1, 1]} : vector<8x512xf32> to vector<8x128xf32>
      %136 = arith.negf %135 : vector<8x128xf32>
      %137 = math.exp %136 : vector<8x128xf32>
      %cst_63 = arith.constant 1.000000e+00 : f32
      %138 = vector.broadcast %cst_63 : f32 to vector<8x128xf32>
      %139 = arith.addf %138, %137 : vector<8x128xf32>
      %140 = arith.divf %138, %139 : vector<8x128xf32>
      %141 = vector.extract_strided_slice %134 {offsets = [0, 128], sizes = [8, 128], strides = [1, 1]} : vector<8x512xf32> to vector<8x128xf32>
      %142 = arith.negf %141 : vector<8x128xf32>
      %143 = math.exp %142 : vector<8x128xf32>
      %cst_64 = arith.constant 1.000000e+00 : f32
      %144 = vector.broadcast %cst_64 : f32 to vector<8x128xf32>
      %145 = arith.addf %144, %143 : vector<8x128xf32>
      %146 = arith.divf %144, %145 : vector<8x128xf32>
      %147 = vector.extract_strided_slice %134 {offsets = [0, 256], sizes = [8, 128], strides = [1, 1]} : vector<8x512xf32> to vector<8x128xf32>
      %148 = math.tanh %147 : vector<8x128xf32>
      %149 = vector.extract_strided_slice %134 {offsets = [0, 384], sizes = [8, 128], strides = [1, 1]} : vector<8x512xf32> to vector<8x128xf32>
      %150 = arith.negf %149 : vector<8x128xf32>
      %151 = math.exp %150 : vector<8x128xf32>
      %cst_65 = arith.constant 1.000000e+00 : f32
      %152 = vector.broadcast %cst_65 : f32 to vector<8x128xf32>
      %153 = arith.addf %152, %151 : vector<8x128xf32>
      %154 = arith.divf %152, %153 : vector<8x128xf32>
      %155 = arith.mulf %146, %arg26 : vector<8x128xf32>
      %156 = arith.mulf %140, %148 : vector<8x128xf32>
      %157 = arith.addf %155, %156 : vector<8x128xf32>
      %158 = math.tanh %157 : vector<8x128xf32>
      %159 = arith.mulf %154, %158 : vector<8x128xf32>
      %160 = arith.truncf %arg27 : vector<8x128xf32> to vector<8x128xbf16>
      %161 = tpu.concatenate %66, %160 in 1 : vector<8x128xbf16>, vector<8x128xbf16> -> vector<8x256xbf16>
      %cst_66 = arith.constant dense<0.000000e+00> : vector<8x512xf32>
      %162 = tpu.matmul %161, %12, %cst_66 {dimension_numbers = #tpu.dot_dimension_numbers<[1], [0], [0], [1], [0, 0, 1, 1], [], []>} : vector<8x256xbf16>, vector<256x512xbf16>, vector<8x512xf32> -> vector<8x512xf32>
      %163 = vector.broadcast %13 : vector<1x512xf32> to vector<8x512xf32>
      %164 = arith.addf %162, %163 : vector<8x512xf32>
      %165 = vector.extract_strided_slice %164 {offsets = [0, 0], sizes = [8, 128], strides = [1, 1]} : vector<8x512xf32> to vector<8x128xf32>
      %166 = arith.negf %165 : vector<8x128xf32>
      %167 = math.exp %166 : vector<8x128xf32>
      %cst_67 = arith.constant 1.000000e+00 : f32
      %168 = vector.broadcast %cst_67 : f32 to vector<8x128xf32>
      %169 = arith.addf %168, %167 : vector<8x128xf32>
      %170 = arith.divf %168, %169 : vector<8x128xf32>
      %171 = vector.extract_strided_slice %164 {offsets = [0, 128], sizes = [8, 128], strides = [1, 1]} : vector<8x512xf32> to vector<8x128xf32>
      %172 = arith.negf %171 : vector<8x128xf32>
      %173 = math.exp %172 : vector<8x128xf32>
      %cst_68 = arith.constant 1.000000e+00 : f32
      %174 = vector.broadcast %cst_68 : f32 to vector<8x128xf32>
      %175 = arith.addf %174, %173 : vector<8x128xf32>
      %176 = arith.divf %174, %175 : vector<8x128xf32>
      %177 = vector.extract_strided_slice %164 {offsets = [0, 256], sizes = [8, 128], strides = [1, 1]} : vector<8x512xf32> to vector<8x128xf32>
      %178 = math.tanh %177 : vector<8x128xf32>
      %179 = vector.extract_strided_slice %164 {offsets = [0, 384], sizes = [8, 128], strides = [1, 1]} : vector<8x512xf32> to vector<8x128xf32>
      %180 = arith.negf %179 : vector<8x128xf32>
      %181 = math.exp %180 : vector<8x128xf32>
      %cst_69 = arith.constant 1.000000e+00 : f32
      %182 = vector.broadcast %cst_69 : f32 to vector<8x128xf32>
      %183 = arith.addf %182, %181 : vector<8x128xf32>
      %184 = arith.divf %182, %183 : vector<8x128xf32>
      %185 = arith.mulf %176, %arg28 : vector<8x128xf32>
      %186 = arith.mulf %170, %178 : vector<8x128xf32>
      %187 = arith.addf %185, %186 : vector<8x128xf32>
      %188 = math.tanh %187 : vector<8x128xf32>
      %189 = arith.mulf %184, %188 : vector<8x128xf32>
      %190 = arith.truncf %189 : vector<8x128xf32> to vector<8x128xbf16>
      %cst_70 = arith.constant dense<0.000000e+00> : vector<8x128xf32>
      %191 = tpu.matmul %190, %14, %cst_70 {dimension_numbers = #tpu.dot_dimension_numbers<[1], [0], [0], [1], [0, 0, 1, 1], [], []>} : vector<8x128xbf16>, vector<128x128xbf16>, vector<8x128xf32> -> vector<8x128xf32>
      %192 = vector.broadcast %15 : vector<1x128xf32> to vector<8x128xf32>
      %193 = arith.addf %191, %192 : vector<8x128xf32>
      %194 = arith.subf %193, %arg23 : vector<8x128xf32>
      %195 = vector.broadcast %32 : vector<8x1xf32> to vector<8x128xf32>
      %196 = arith.mulf %194, %195 : vector<8x128xf32>
      %197 = arith.mulf %196, %196 : vector<8x128xf32>
      %cst_71 = arith.constant dense<0.000000e+00> : vector<8xf32>
      %198 = vector.multi_reduction <add>, %197, %cst_71 [1] : vector<8x128xf32> to vector<8xf32>
      %199 = vector.shape_cast %198 : vector<8xf32> to vector<8x1xf32>
      %cst_72 = arith.constant dense<0.000000e+00> : vector<1xf32>
      %200 = vector.multi_reduction <add>, %199, %cst_72 [0] : vector<8x1xf32> to vector<1xf32>
      %201 = vector.shape_cast %200 : vector<1xf32> to vector<1x1xf32>
      %c0_i32_73 = arith.constant 0 : i32
      %202 = arith.cmpi sgt, %arg22, %c0_i32_73 : i32
      %203 = arith.extui %202 : i1 to i32
      %204 = arith.sitofp %203 : i32 to f32
      %205 = arith.sitofp %28 : i32 to f32
      %cst_74 = arith.constant 5.000000e-03 : f32
      %206 = arith.divf %cst_74, %205 : f32
      %207 = arith.mulf %204, %206 : f32
      %208 = vector.broadcast %207 : f32 to vector<1x1xf32>
      %209 = arith.mulf %201, %208 : vector<1x1xf32>
      %210 = arith.addf %arg29, %209 : vector<1x1xf32>
      %211 = arith.index_cast %arg22 : i32 to index
      %c0_75 = arith.constant 0 : index
      %c0_76 = arith.constant 0 : index
      %212 = vector.load %arg19[%211, %c0_75, %c0_76] : memref<7x8x128xf32, #tpu.memory_space<vmem>>, vector<1x8x128xf32>
      %213 = vector.shape_cast %212 : vector<1x8x128xf32> to vector<8x128xf32>
      %214 = vector.shape_cast %159 : vector<8x128xf32> to vector<1x8x128xf32>
      tpu.vector_store %arg19[%211, %c0_75, %c0_76], %214 {strides = array<i32>} : memref<7x8x128xf32, #tpu.memory_space<vmem>>, vector<1x8x128xf32>,
      %215 = arith.index_cast %arg22 : i32 to index
      %c0_77 = arith.constant 0 : index
      %c0_78 = arith.constant 0 : index
      %216 = vector.load %arg20[%215, %c0_77, %c0_78] : memref<7x8x128xf32, #tpu.memory_space<vmem>>, vector<1x8x128xf32>
      %217 = vector.shape_cast %216 : vector<1x8x128xf32> to vector<8x128xf32>
      %218 = vector.shape_cast %128 : vector<8x128xf32> to vector<1x8x128xf32>
      tpu.vector_store %arg20[%215, %c0_77, %c0_78], %218 {strides = array<i32>} : memref<7x8x128xf32, #tpu.memory_space<vmem>>, vector<1x8x128xf32>,
      scf.yield %65, %63, %159, %157, %189, %187, %210 : vector<8x128xf32>, vector<8x128xf32>, vector<8x128xf32>, vector<8x128xf32>, vector<8x128xf32>, vector<8x128xf32>, vector<1x1xf32>
    }
    %c7_i32_39 = arith.constant 7 : i32
    %c0_40 = arith.constant 0 : index
    %c0_41 = arith.constant 0 : index
    %26 = vector.load %arg21[%c0_40, %c0_41] : memref<1x1xf32, #tpu.memory_space<vmem>>, vector<1x1xf32>
    tpu.vector_store %arg21[%c0_40, %c0_41], %25#6 {strides = array<i32>} : memref<1x1xf32, #tpu.memory_space<vmem>>, vector<1x1xf32>,
    return
  }
}

</mosaic_0001>

<bundles_post_ra>
// kernel: _fused_forward.1
= control target key start
LH: loop header
LB: loop body
LE: loop exit
PB: predicated region body
PF: predicated region fallthrough
CT: control target
= control target key end

     0   :  { %s8343_s0 = inlined_call_operand.vmem [shape: s32[7], index: 0, kind: input, shape index: {}]   ;;  %s8344_s1 = inlined_call_operand.vmem [shape: f32[8,8,128], index: 1, kind: input, shape index: {}]   ;;  %s8345_s2 = inlined_call_operand.vmem [shape: f32[8,512], index: 2, kind: input, shape index: {}]   ;;  %s8346_s3 = inlined_call_operand.vmem [shape: f32[8,8,128], index: 3, kind: input, shape index: {}]   ;;  %s8347_s4 = inlined_call_operand.vmem [shape: f32[7,8,512], index: 4, kind: input, shape index: {}]   ;;  %s8348_s5 = inlined_call_operand.vmem [shape: f32[7,8,128], index: 5, kind: input, shape index: {}]   ;;  %s8349_s6 = inlined_call_operand.vmem [shape: bf16[256,512], index: 6, kind: input, shape index: {}]   ;;  %s8350_s7 = inlined_call_operand.vmem [shape: bf16[128,768], index: 7, kind: input, shape index: {}]   ;;  %s8351_s8 = inlined_call_operand.vmem [shape: bf16[128,128], index: 8, kind: input, shape index: {}]   ;;  %s8352_s9 = inlined_call_operand.vmem [shape: f32[1,128], index: 9, kind: input, shape index: {}]   ;;  %s8353_s10 = inlined_call_operand.vmem [shape: f32[1,128], index: 10, kind: input, shape index: {}]   ;;  %s8354_s11 = inlined_call_operand.vmem [shape: bf16[128,128], index: 11, kind: input, shape index: {}]   ;;  %s8355_s12 = inlined_call_operand.vmem [shape: f32[1,128], index: 12, kind: input, shape index: {}]   ;;  %s8356_s13 = inlined_call_operand.vmem [shape: bf16[256,512], index: 13, kind: input, shape index: {}]   ;;  %s8357_s14 = inlined_call_operand.vmem [shape: f32[1,512], index: 14, kind: input, shape index: {}]   ;;  %s8358_s15 = inlined_call_operand.vmem [shape: bf16[256,512], index: 15, kind: input, shape index: {}]   ;;  %s8359_s16 = inlined_call_operand.vmem [shape: f32[1,512], index: 16, kind: input, shape index: {}]   ;;  %s8360_s17 = inlined_call_operand.vmem [shape: bf16[128,128], index: 17, kind: input, shape index: {}]   ;;  %s8361_s18 = inlined_call_operand.vmem [shape: f32[1,128], index: 18, kind: input, shape index: {}]   ;;  %s8362_s19 = inlined_call_operand.vmem [shape: f32[7,8,128], index: 19, kind: output, shape index: {0}]   ;;  %s8363_s20 = inlined_call_operand.vmem [shape: f32[7,8,128], index: 20, kind: output, shape index: {1}]   ;;  %s8364_s21 = inlined_call_operand.hbm [shape: f32[1,1], index: 21, kind: output, shape index: {2}]  }
   0x1   :  { %8370 = sst [smem:[#allocation545_spill]] %s8343_s0 }
   0x2   :  { %8371 = sst [smem:[#allocation546_spill]] %s8344_s1 }
   0x3   :  { %8372 = sst [smem:[#allocation547_spill]] %s8345_s2 }
   0x4   :  { %8373 = sst [smem:[#allocation548_spill]] %s8346_s3 }
   0x5   :  { %8374 = sst [smem:[#allocation549_spill]] %s8347_s4 }
   0x6   :  { %8375 = sst [smem:[#allocation550_spill]] %s8348_s5 }
   0x7   :  { %27 = vsyncpa [#allocation4], 0 }
   0x8   :  { %28 = vsyncpa [#allocation3], 0  ;;  %s8376_s26 = sld [smem:[#allocation545_spill]]  ;;  %s4531_s3 = smov [#allocation2]  }
   0xe   :  { %s34_s27 = sshll.u32 %s8376_s26, 4  ;;  %s35_s27 = int_to_ptr.vmem [resolvable:$true] %s34_s27 }
   0xf   :  { %37 = dma.vmem_to_smem %s35_s27, 16, %s4531_s3, [#allocation4]  }
  0x10   :  { %4495 = dma.done.wait [#allocation4], 16  }
  0x11   :  { %4496 = vsyncadd [#allocation4], 4294967280 }
  0x12   :  { %78 = sfence }
  0x13   :  { %s8377_s0 = sld [smem:[#allocation546_spill]]  ;;  %v4751_v20 = vld [vmem:[%s8349_s6 + $0x4] sm:$0xf]  ;;  %v4756_v21 = vld [vmem:[%s8349_s6] sm:$0xf] }
  0x14   :  { %s8386_s5 = sld [smem:[#allocation547_spill]]  ;;  %8400 = vst [vmem:[#allocation28_spill] sm:$0xff] %v4751_v20  ;;  %v4761_v22 = vld [vmem:[%s8349_s6 + $0xc] sm:$0xf]  ;;  %v4766_v23 = vld [vmem:[%s8349_s6 + $0x8] sm:$0xf] }
  0x15   :  { %s8391_s27 = sld [smem:[#allocation548_spill]]  ;;  %8401 = vst [vmem:[#allocation29_spill] sm:$0xff] %v4756_v21  ;;  %v4771_v24 = vld [vmem:[%s8349_s6 + $0x10] sm:$0xf0]  ;;  %v4776_v25 = vld [vmem:[%s8349_s6 + $0xc] sm:$0xf0] }
  0x16   :  { %8402 = vst [vmem:[#allocation30_spill] sm:$0xff] %v4761_v22  ;;  %v4781_v26 = vld [vmem:[%s8349_s6 + $0x18] sm:$0xf0]  ;;  %v4786_v27 = vld [vmem:[%s8349_s6 + $0x14] sm:$0xf0]  ;;  %v7425_v21 = vmov 0.0  }
  0x17   :  { %8403 = vst [vmem:[#allocation31_spill] sm:$0xff] %v4766_v23  ;;  %v4791_v28 = vld [vmem:[%s8349_s6 + $0x24] sm:$0xf]  ;;  %v4796_v29 = vld [vmem:[%s8349_s6 + $0x20] sm:$0xf] }
  0x18   :  { %8404 = vst [vmem:[#allocation32_spill] sm:$0xff] %v4771_v24  ;;  %v4801_v30 = vld [vmem:[%s8349_s6 + $0x2c] sm:$0xf]  ;;  %v4806_v31 = vld [vmem:[%s8349_s6 + $0x28] sm:$0xf] }
  0x19   :  { %v4651_v0 = vld [vmem:[%s8377_s0] sm:$0xff]  ;;  %v4656_v1 = vld [vmem:[%s8377_s0 + $0x8] sm:$0xff]  ;;  %v4661_v2 = vld [vmem:[%s8377_s0 + $0x10] sm:$0xff]  ;;  %8405 = vst [vmem:[#allocation33_spill] sm:$0xff] %v4776_v25  ;;  %v7421_v25 = vmov 0.0  }
  0x1a   :  { %8378 = vst [vmem:[#allocation8_spill] sm:$0xff] %v4651_v0  ;;  %v4666_v3 = vld [vmem:[%s8377_s0 + $0x18] sm:$0xff]  ;;  %v4671_v4 = vld [vmem:[%s8377_s0 + $0x20] sm:$0xff]  ;;  %v4676_v5 = vld [vmem:[%s8377_s0 + $0x28] sm:$0xff] }
  0x1b   :  { %8379 = vst [vmem:[#allocation9_spill] sm:$0xff] %v4656_v1  ;;  %v4681_v6 = vld [vmem:[%s8377_s0 + $0x30] sm:$0xff]  ;;  %v4686_v7 = vld [vmem:[%s8377_s0 + $0x38] sm:$0xff]  ;;  %v4691_v8 = vld [vmem:[%s8386_s5] sm:$0xff] }
  0x1c   :  { %8380 = vst [vmem:[#allocation10_spill] sm:$0xff] %v4661_v2  ;;  %v4696_v9 = vld [vmem:[%s8386_s5 + $0x8] sm:$0xff]  ;;  %v4701_v10 = vld [vmem:[%s8386_s5 + $0x10] sm:$0xff]  ;;  %v4706_v11 = vld [vmem:[%s8386_s5 + $0x18] sm:$0xff] }
  0x1d   :  { %8381 = vst [vmem:[#allocation11_spill] sm:$0xff] %v4666_v3  ;;  %v4711_v12 = vld [vmem:[%s8391_s27] sm:$0xff]  ;;  %v4716_v13 = vld [vmem:[%s8391_s27 + $0x8] sm:$0xff]  ;;  %v4721_v14 = vld [vmem:[%s8391_s27 + $0x10] sm:$0xff] }
  0x1e   :  { %8382 = vst [vmem:[#allocation12_spill] sm:$0xff] %v4671_v4  ;;  %v4726_v15 = vld [vmem:[%s8391_s27 + $0x18] sm:$0xff]  ;;  %v4731_v16 = vld [vmem:[%s8391_s27 + $0x20] sm:$0xff]  ;;  %v4736_v17 = vld [vmem:[%s8391_s27 + $0x28] sm:$0xff] }
  0x1f   :  { %8383 = vst [vmem:[#allocation13_spill] sm:$0xff] %v4676_v5  ;;  %v4741_v18 = vld [vmem:[%s8391_s27 + $0x30] sm:$0xff]  ;;  %v4746_v19 = vld [vmem:[%s8391_s27 + $0x38] sm:$0xff]  ;;  %v4831_v36 = vld [vmem:[%s8349_s6 + $0x44] sm:$0xf] }
  0x20   :  { %8384 = vst [vmem:[#allocation14_spill] sm:$0xff] %v4681_v6  ;;  %v4811_v32 = vld [vmem:[%s8349_s6 + $0x30] sm:$0xf0]  ;;  %v4816_v33 = vld [vmem:[%s8349_s6 + $0x2c] sm:$0xf0] }
  0x21   :  { %8385 = vst [vmem:[#allocation15_spill] sm:$0xff] %v4686_v7  ;;  %v4821_v34 = vld [vmem:[%s8349_s6 + $0x38] sm:$0xf0]  ;;  %v4826_v35 = vld [vmem:[%s8349_s6 + $0x34] sm:$0xf0] }
  0x22   :  { %8387 = vst [vmem:[#allocation16_spill] sm:$0xff] %v4691_v8  ;;  %v4836_v37 = vld [vmem:[%s8349_s6 + $0x40] sm:$0xf]  ;;  %v4841_v38 = vld [vmem:[%s8349_s6 + $0x4c] sm:$0xf] }
  0x23   :  { %8388 = vst [vmem:[#allocation17_spill] sm:$0xff] %v4696_v9  ;;  %v4846_v39 = vld [vmem:[%s8349_s6 + $0x48] sm:$0xf]  ;;  %v4851_v40 = vld [vmem:[%s8349_s6 + $0x50] sm:$0xf0] }
  0x24   :  { %8389 = vst [vmem:[#allocation18_spill] sm:$0xff] %v4701_v10  ;;  %v4856_v41 = vld [vmem:[%s8349_s6 + $0x4c] sm:$0xf0]  ;;  %v4861_v42 = vld [vmem:[%s8349_s6 + $0x58] sm:$0xf0] }
  0x25   :  { %8390 = vst [vmem:[#allocation19_spill] sm:$0xff] %v4706_v11  ;;  %v4866_v43 = vld [vmem:[%s8349_s6 + $0x54] sm:$0xf0]  ;;  %v4871_v44 = vld [vmem:[%s8349_s6 + $0x64] sm:$0xf] }
  0x26   :  { %8392 = vst [vmem:[#allocation20_spill] sm:$0xff] %v4711_v12  ;;  %v4876_v45 = vld [vmem:[%s8349_s6 + $0x60] sm:$0xf]  ;;  %v4881_v46 = vld [vmem:[%s8349_s6 + $0x6c] sm:$0xf] }
  0x27   :  { %8393 = vst [vmem:[#allocation21_spill] sm:$0xff] %v4716_v13  ;;  %v4886_v47 = vld [vmem:[%s8349_s6 + $0x68] sm:$0xf]  ;;  %v4891_v48 = vld [vmem:[%s8349_s6 + $0x70] sm:$0xf0] }
  0x28   :  { %8394 = vst [vmem:[#allocation22_spill] sm:$0xff] %v4721_v14  ;;  %v4896_v49 = vld [vmem:[%s8349_s6 + $0x6c] sm:$0xf0]  ;;  %v4901_v50 = vld [vmem:[%s8349_s6 + $0x78] sm:$0xf0] }
  0x29   :  { %8395 = vst [vmem:[#allocation23_spill] sm:$0xff] %v4726_v15  ;;  %v4906_v51 = vld [vmem:[%s8349_s6 + $0x74] sm:$0xf0]  ;;  %v4911_v52 = vld [vmem:[%s8349_s6 + $0x84] sm:$0xf] }
  0x2a   :  { %8396 = vst [vmem:[#allocation24_spill] sm:$0xff] %v4731_v16  ;;  %v4916_v53 = vld [vmem:[%s8349_s6 + $0x80] sm:$0xf]  ;;  %v4921_v54 = vld [vmem:[%s8349_s6 + $0x8c] sm:$0xf] }
  0x2b   :  { %8397 = vst [vmem:[#allocation25_spill] sm:$0xff] %v4736_v17  ;;  %v4926_v55 = vld [vmem:[%s8349_s6 + $0x88] sm:$0xf]  ;;  %v4931_v56 = vld [vmem:[%s8349_s6 + $0x90] sm:$0xf0] }
  0x2c   :  { %8398 = vst [vmem:[#allocation26_spill] sm:$0xff] %v4741_v18  ;;  %v4936_v57 = vld [vmem:[%s8349_s6 + $0x8c] sm:$0xf0]  ;;  %v4941_v58 = vld [vmem:[%s8349_s6 + $0x98] sm:$0xf0] }
  0x2d   :  { %8399 = vst [vmem:[#allocation27_spill] sm:$0xff] %v4746_v19  ;;  %v4946_v59 = vld [vmem:[%s8349_s6 + $0x94] sm:$0xf0]  ;;  %v4951_v60 = vld [vmem:[%s8349_s6 + $0xa4] sm:$0xf] }
  0x2e   :  { %8406 = vst [vmem:[#allocation34_spill] sm:$0xff] %v4781_v26  ;;  %v4956_v61 = vld [vmem:[%s8349_s6 + $0xa0] sm:$0xf]  ;;  %v4961_v62 = vld [vmem:[%s8349_s6 + $0xac] sm:$0xf] }
  0x2f   :  { %8407 = vst [vmem:[#allocation35_spill] sm:$0xff] %v4786_v27  ;;  %v4966_v63 = vld [vmem:[%s8349_s6 + $0xa8] sm:$0xf]  ;;  %v4971_v6 = vld [vmem:[%s8349_s6 + $0xb0] sm:$0xf0] }
  0x30   :  { %8408 = vst [vmem:[#allocation36_spill] sm:$0xff] %v4791_v28  ;;  %v4976_v4 = vld [vmem:[%s8349_s6 + $0xac] sm:$0xf0]  ;;  %v4981_v7 = vld [vmem:[%s8349_s6 + $0xb8] sm:$0xf0] }
  0x31   :  { %8409 = vst [vmem:[#allocation37_spill] sm:$0xff] %v4796_v29  ;;  %v4986_v0 = vld [vmem:[%s8349_s6 + $0xb4] sm:$0xf0]  ;;  %v4991_v5 = vld [vmem:[%s8349_s6 + $0xc4] sm:$0xf] }
  0x32   :  { %8410 = vst [vmem:[#allocation38_spill] sm:$0xff] %v4801_v30  ;;  %v4996_v3 = vld [vmem:[%s8349_s6 + $0xc0] sm:$0xf]  ;;  %v5001_v1 = vld [vmem:[%s8349_s6 + $0xcc] sm:$0xf] }
  0x33   :  { %8411 = vst [vmem:[#allocation39_spill] sm:$0xff] %v4806_v31  ;;  %v5006_v2 = vld [vmem:[%s8349_s6 + $0xc8] sm:$0xf]  ;;  %v5011_v19 = vld [vmem:[%s8349_s6 + $0xd0] sm:$0xf0] }
  0x34   :  { %8412 = vst [vmem:[#allocation40_spill] sm:$0xff] %v4811_v32  ;;  %v5016_v18 = vld [vmem:[%s8349_s6 + $0xcc] sm:$0xf0]  ;;  %v5021_v15 = vld [vmem:[%s8349_s6 + $0xd8] sm:$0xf0] }
  0x35   :  { %8413 = vst [vmem:[#allocation41_spill] sm:$0xff] %v4816_v33  ;;  %v5026_v17 = vld [vmem:[%s8349_s6 + $0xd4] sm:$0xf0]  ;;  %v5031_v13 = vld [vmem:[%s8349_s6 + $0xe4] sm:$0xf] }
  0x36   :  { %8414 = vst [vmem:[#allocation42_spill] sm:$0xff] %v4821_v34  ;;  %v5036_v14 = vld [vmem:[%s8349_s6 + $0xe0] sm:$0xf]  ;;  %v5041_v16 = vld [vmem:[%s8349_s6 + $0xec] sm:$0xf] }
  0x37   :  { %8415 = vst [vmem:[#allocation43_spill] sm:$0xff] %v4826_v35  ;;  %v5046_v12 = vld [vmem:[%s8349_s6 + $0xe8] sm:$0xf]  ;;  %v5051_v10 = vld [vmem:[%s8349_s6 + $0xf0] sm:$0xf0] }
  0x38   :  { %8416 = vst [vmem:[#allocation44_spill] sm:$0xff] %v4831_v36  ;;  %v5056_v11 = vld [vmem:[%s8349_s6 + $0xec] sm:$0xf0]  ;;  %v5061_v9 = vld [vmem:[%s8349_s6 + $0xf8] sm:$0xf0] }
  0x39   :  { %8417 = vst [vmem:[#allocation45_spill] sm:$0xff] %v4836_v37  ;;  %v5066_v8 = vld [vmem:[%s8349_s6 + $0xf4] sm:$0xf0]  ;;  %v5071_v22 = vld [vmem:[%s8349_s6 + $0x104] sm:$0xf] }
  0x3a   :  { %8418 = vst [vmem:[#allocation46_spill] sm:$0xff] %v4841_v38  ;;  %v5076_v26 = vld [vmem:[%s8349_s6 + $0x100] sm:$0xf]  ;;  %v5081_v27 = vld [vmem:[%s8349_s6 + $0x10c] sm:$0xf] }
  0x3b   :  { %8419 = vst [vmem:[#allocation47_spill] sm:$0xff] %v4846_v39  ;;  %v5086_v23 = vld [vmem:[%s8349_s6 + $0x108] sm:$0xf]  ;;  %v5091_v30 = vld [vmem:[%s8349_s6 + $0x110] sm:$0xf0] }
  0x3c   :  { %8420 = vst [vmem:[#allocation48_spill] sm:$0xff] %v4851_v40  ;;  %v5096_v34 = vld [vmem:[%s8349_s6 + $0x10c] sm:$0xf0]  ;;  %v5101_v35 = vld [vmem:[%s8349_s6 + $0x118] sm:$0xf0] }
  0x3d   :  { %8421 = vst [vmem:[#allocation49_spill] sm:$0xff] %v4856_v41  ;;  %v5116_v31 = vld [vmem:[%s8349_s6 + $0x120] sm:$0xf]  ;;  %v5121_v38 = vld [vmem:[%s8349_s6 + $0x12c] sm:$0xf] }
  0x3e   :  { %8422 = vst [vmem:[#allocation50_spill] sm:$0xff] %v4861_v42  ;;  %v5136_v42 = vld [vmem:[%s8349_s6 + $0x12c] sm:$0xf0]  ;;  %v5156_v39 = vld [vmem:[%s8349_s6 + $0x140] sm:$0xf] }
  0x3f   :  { %8423 = vst [vmem:[#allocation51_spill] sm:$0xff] %v4866_v43  ;;  %v5141_v43 = vld [vmem:[%s8349_s6 + $0x138] sm:$0xf0]  ;;  %v5396_v24 = vld [vmem:[%s8350_s7] sm:$0xf] }
  0x40   :  { %8424 = vst [vmem:[#allocation52_spill] sm:$0xff] %v4881_v46  ;;  %v5161_v46 = vld [vmem:[%s8349_s6 + $0x14c] sm:$0xf]  ;;  %v5381_v20 = vld [vmem:[%s8349_s6 + $0x1f8] sm:$0xf0] }
  0x41   :  { %8425 = vst [vmem:[#allocation53_spill] sm:$0xff] %v4886_v47  ;;  %v5196_v47 = vld [vmem:[%s8349_s6 + $0x160] sm:$0xf] }
  0x42   :  { %8426 = vst [vmem:[#allocation54_spill] sm:$0xff] %v4901_v50  ;;  %v5176_v50 = vld [vmem:[%s8349_s6 + $0x14c] sm:$0xf0] }
  0x43   :  { %8427 = vst [vmem:[#allocation55_spill] sm:$0xff] %v4906_v51  ;;  %v5181_v51 = vld [vmem:[%s8349_s6 + $0x158] sm:$0xf0] }
  0x44   :  { %8428 = vst [vmem:[#allocation56_spill] sm:$0xff] %v4921_v54  ;;  %v5201_v54 = vld [vmem:[%s8349_s6 + $0x16c] sm:$0xf] }
  0x45   :  { %8429 = vst [vmem:[#allocation57_spill] sm:$0xff] %v4926_v55  ;;  %v5236_v55 = vld [vmem:[%s8349_s6 + $0x180] sm:$0xf] }
  0x46   :  { %8430 = vst [vmem:[#allocation58_spill] sm:$0xff] %v4941_v58  ;;  %v5216_v58 = vld [vmem:[%s8349_s6 + $0x16c] sm:$0xf0] }
  0x47   :  { %8431 = vst [vmem:[#allocation59_spill] sm:$0xff] %v4946_v59  ;;  %v5221_v59 = vld [vmem:[%s8349_s6 + $0x178] sm:$0xf0] }
  0x48   :  { %8432 = vst [vmem:[#allocation60_spill] sm:$0xff] %v4961_v62  ;;  %v5241_v62 = vld [vmem:[%s8349_s6 + $0x18c] sm:$0xf] }
  0x49   :  { %8433 = vst [vmem:[#allocation61_spill] sm:$0xff] %v4966_v63  ;;  %v5276_v63 = vld [vmem:[%s8349_s6 + $0x1a0] sm:$0xf] }
  0x4a   :  { %8434 = vst [vmem:[#allocation62_spill] sm:$0xff] %v4971_v6 }
  0x4b   :  { %8435 = vst [vmem:[#allocation63_spill] sm:$0xff] %v4976_v4 }
  0x4c   :  { %8436 = vst [vmem:[#allocation64_spill] sm:$0xff] %v4981_v7  ;;  %v5256_v7 = vld [vmem:[%s8349_s6 + $0x18c] sm:$0xf0] }
  0x4d   :  { %8437 = vst [vmem:[#allocation65_spill] sm:$0xff] %v4986_v0  ;;  %v5261_v0 = vld [vmem:[%s8349_s6 + $0x198] sm:$0xf0] }
  0x4e   :  { %8438 = vst [vmem:[#allocation66_spill] sm:$0xff] %v4991_v5 }
  0x4f   :  { %8439 = vst [vmem:[#allocation67_spill] sm:$0xff] %v4996_v3 }
  0x50   :  { %8440 = vst [vmem:[#allocation68_spill] sm:$0xff] %v5001_v1  ;;  %v5281_v1 = vld [vmem:[%s8349_s6 + $0x1ac] sm:$0xf] }
  0x51   :  { %8441 = vst [vmem:[#allocation69_spill] sm:$0xff] %v5006_v2  ;;  %v5316_v2 = vld [vmem:[%s8349_s6 + $0x1c0] sm:$0xf] }
  0x52   :  { %8442 = vst [vmem:[#allocation70_spill] sm:$0xff] %v5011_v19 }
  0x53   :  { %8443 = vst [vmem:[#allocation71_spill] sm:$0xff] %v5016_v18 }
  0x54   :  { %8444 = vst [vmem:[#allocation72_spill] sm:$0xff] %v5021_v15  ;;  %v5296_v15 = vld [vmem:[%s8349_s6 + $0x1ac] sm:$0xf0] }
  0x55   :  { %8445 = vst [vmem:[#allocation73_spill] sm:$0xff] %v5026_v17  ;;  %v5301_v17 = vld [vmem:[%s8349_s6 + $0x1b8] sm:$0xf0] }
  0x56   :  { %8446 = vst [vmem:[#allocation74_spill] sm:$0xff] %v5031_v13 }
  0x57   :  { %8447 = vst [vmem:[#allocation75_spill] sm:$0xff] %v5036_v14 }
  0x58   :  { %8448 = vst [vmem:[#allocation76_spill] sm:$0xff] %v5041_v16  ;;  %v5321_v16 = vld [vmem:[%s8349_s6 + $0x1cc] sm:$0xf] }
  0x59   :  { %8449 = vst [vmem:[#allocation77_spill] sm:$0xff] %v5046_v12  ;;  %v5356_v12 = vld [vmem:[%s8349_s6 + $0x1e0] sm:$0xf] }
  0x5a   :  { %8450 = vst [vmem:[#allocation78_spill] sm:$0xff] %v5051_v10 }
  0x5b   :  { %8451 = vst [vmem:[#allocation79_spill] sm:$0xff] %v5056_v11 }
  0x5c   :  { %8452 = vst [vmem:[#allocation80_spill] sm:$0xff] %v5061_v9  ;;  %v5336_v9 = vld [vmem:[%s8349_s6 + $0x1cc] sm:$0xf0] }
  0x5d   :  { %8453 = vst [vmem:[#allocation81_spill] sm:$0xff] %v5066_v8  ;;  %v5341_v8 = vld [vmem:[%s8349_s6 + $0x1d8] sm:$0xf0] }
  0x5e   :  { %8454 = vst [vmem:[#allocation82_spill] sm:$0xff] %v5071_v22  ;;  %v5361_v22 = vld [vmem:[%s8349_s6 + $0x1ec] sm:$0xf] }
  0x5f   :  { %8455 = vst [vmem:[#allocation83_spill] sm:$0xff] %v5076_v26 }
  0x60   :  { %8456 = vst [vmem:[#allocation84_spill] sm:$0xff] %v5081_v27  ;;  %v5106_v27 = vld [vmem:[%s8349_s6 + $0x114] sm:$0xf0] }
  0x61   :  { %8457 = vst [vmem:[#allocation85_spill] sm:$0xff] %v5086_v23  ;;  %v5111_v23 = vld [vmem:[%s8349_s6 + $0x124] sm:$0xf] }
  0x62   :  { %8458 = vst [vmem:[#allocation86_spill] sm:$0xff] %v5091_v30  ;;  %v5376_v30 = vld [vmem:[%s8349_s6 + $0x1ec] sm:$0xf0] }
  0x63   :  { %8459 = vst [vmem:[#allocation87_spill] sm:$0xff] %v5096_v34  ;;  %v5401_v34 = vld [vmem:[%s8350_s7 + $0xc] sm:$0xf] }
  0x64   :  { %8460 = vst [vmem:[#allocation88_spill] sm:$0xff] %v5101_v35  ;;  %v5126_v35 = vld [vmem:[%s8349_s6 + $0x128] sm:$0xf] }
  0x65   :  { %8461 = vst [vmem:[#allocation89_spill] sm:$0xff] %v5106_v27  ;;  %v5131_v27 = vld [vmem:[%s8349_s6 + $0x130] sm:$0xf0] }
  0x66   :  { %8462 = vst [vmem:[#allocation90_spill] sm:$0xff] %v5111_v23  ;;  %v7429_v23 = vmov 0.0  }
  0x67   :  { %8463 = vst [vmem:[#allocation91_spill] sm:$0xff] %v5116_v31 }
  0x68   :  { %8464 = vst [vmem:[#allocation92_spill] sm:$0xff] %v5121_v38  ;;  %v5146_v38 = vld [vmem:[%s8349_s6 + $0x134] sm:$0xf0] }
  0x69   :  { %8465 = vst [vmem:[#allocation93_spill] sm:$0xff] %v5126_v35  ;;  %v5151_v35 = vld [vmem:[%s8349_s6 + $0x144] sm:$0xf] }
  0x6a   :  { %8466 = vst [vmem:[#allocation94_spill] sm:$0xff] %v5131_v27  ;;  %v7431_v27 = vmov 0.0  }
  0x6b   :  { %8467 = vst [vmem:[#allocation95_spill] sm:$0xff] %v5136_v42 }
  0x6c   :  { %8468 = vst [vmem:[#allocation96_spill] sm:$0xff] %v5141_v43  ;;  %v5166_v43 = vld [vmem:[%s8349_s6 + $0x148] sm:$0xf] }
  0x6d   :  { %8469 = vst [vmem:[#allocation97_spill] sm:$0xff] %v5146_v38  ;;  %v5171_v38 = vld [vmem:[%s8349_s6 + $0x150] sm:$0xf0] }
  0x6e   :  { %8470 = vst [vmem:[#allocation98_spill] sm:$0xff] %v5151_v35 }
  0x6f   :  { %8471 = vst [vmem:[#allocation99_spill] sm:$0xff] %v5156_v39 }
  0x70   :  { %8472 = vst [vmem:[#allocation100_spill] sm:$0xff] %v5161_v46  ;;  %v5186_v46 = vld [vmem:[%s8349_s6 + $0x154] sm:$0xf0] }
  0x71   :  { %8473 = vst [vmem:[#allocation101_spill] sm:$0xff] %v5166_v43  ;;  %v5191_v43 = vld [vmem:[%s8349_s6 + $0x164] sm:$0xf] }
  0x72   :  { %8474 = vst [vmem:[#allocation102_spill] sm:$0xff] %v5171_v38 }
  0x73   :  { %8475 = vst [vmem:[#allocation103_spill] sm:$0xff] %v5181_v51  ;;  %v5206_v51 = vld [vmem:[%s8349_s6 + $0x168] sm:$0xf] }
  0x74   :  { %8476 = vst [vmem:[#allocation104_spill] sm:$0xff] %v5186_v46  ;;  %v5211_v46 = vld [vmem:[%s8349_s6 + $0x170] sm:$0xf0] }
  0x75   :  { %8477 = vst [vmem:[#allocation105_spill] sm:$0xff] %v5201_v54  ;;  %v5226_v54 = vld [vmem:[%s8349_s6 + $0x174] sm:$0xf0] }
  0x76   :  { %8478 = vst [vmem:[#allocation106_spill] sm:$0xff] %v5206_v51  ;;  %v5231_v51 = vld [vmem:[%s8349_s6 + $0x184] sm:$0xf] }
  0x77   :  { %8479 = vst [vmem:[#allocation107_spill] sm:$0xff] %v5221_v59  ;;  %v5246_v59 = vld [vmem:[%s8349_s6 + $0x188] sm:$0xf] }
  0x78   :  { %8480 = vst [vmem:[#allocation108_spill] sm:$0xff] %v5226_v54  ;;  %v5251_v54 = vld [vmem:[%s8349_s6 + $0x190] sm:$0xf0] }
  0x79   :  { %8481 = vst [vmem:[#allocation109_spill] sm:$0xff] %v5241_v62  ;;  %v5266_v62 = vld [vmem:[%s8349_s6 + $0x194] sm:$0xf0] }
  0x7a   :  { %8482 = vst [vmem:[#allocation110_spill] sm:$0xff] %v5246_v59  ;;  %v5271_v59 = vld [vmem:[%s8349_s6 + $0x1a4] sm:$0xf] }
  0x7b   :  { %8483 = vst [vmem:[#allocation111_spill] sm:$0xff] %v5256_v7 }
  0x7c   :  { %8484 = vst [vmem:[#allocation112_spill] sm:$0xff] %v5261_v0  ;;  %v5286_v0 = vld [vmem:[%s8349_s6 + $0x1a8] sm:$0xf] }
  0x7d   :  { %8485 = vst [vmem:[#allocation113_spill] sm:$0xff] %v5266_v62  ;;  %v5291_v62 = vld [vmem:[%s8349_s6 + $0x1b0] sm:$0xf0] }
  0x7e   :  { %8486 = vst [vmem:[#allocation114_spill] sm:$0xff] %v5281_v1  ;;  %v5306_v1 = vld [vmem:[%s8349_s6 + $0x1b4] sm:$0xf0] }
  0x7f   :  { %8487 = vst [vmem:[#allocation115_spill] sm:$0xff] %v5286_v0  ;;  %v5311_v0 = vld [vmem:[%s8349_s6 + $0x1c4] sm:$0xf] }
  0x80   :  { %8488 = vst [vmem:[#allocation116_spill] sm:$0xff] %v5296_v15 }
  0x81   :  { %8489 = vst [vmem:[#allocation117_spill] sm:$0xff] %v5301_v17  ;;  %v5326_v17 = vld [vmem:[%s8349_s6 + $0x1c8] sm:$0xf] }
  0x82   :  { %8490 = vst [vmem:[#allocation118_spill] sm:$0xff] %v5306_v1  ;;  %v5331_v1 = vld [vmem:[%s8349_s6 + $0x1d0] sm:$0xf0] }
  0x83   :  { %8491 = vst [vmem:[#allocation119_spill] sm:$0xff] %v5311_v0 }
  0x84   :  { %8492 = vst [vmem:[#allocation120_spill] sm:$0xff] %v5316_v2 }
  0x85   :  { %8493 = vst [vmem:[#allocation121_spill] sm:$0xff] %v5321_v16  ;;  %v5346_v16 = vld [vmem:[%s8349_s6 + $0x1d4] sm:$0xf0] }
  0x86   :  { %8494 = vst [vmem:[#allocation122_spill] sm:$0xff] %v5326_v17  ;;  %v5351_v17 = vld [vmem:[%s8349_s6 + $0x1e4] sm:$0xf] }
  0x87   :  { %8495 = vst [vmem:[#allocation123_spill] sm:$0xff] %v5331_v1 }
  0x88   :  { %8496 = vst [vmem:[#allocation124_spill] sm:$0xff] %v5336_v9 }
  0x89   :  { %8497 = vst [vmem:[#allocation125_spill] sm:$0xff] %v5341_v8  ;;  %v5366_v8 = vld [vmem:[%s8349_s6 + $0x1e8] sm:$0xf] }
  0x8a   :  { %8498 = vst [vmem:[#allocation126_spill] sm:$0xff] %v5346_v16  ;;  %v5371_v16 = vld [vmem:[%s8349_s6 + $0x1f0] sm:$0xf0] }
  0x8b   :  { %8499 = vst [vmem:[#allocation127_spill] sm:$0xff] %v5351_v17 }
  0x8c   :  { %8500 = vst [vmem:[#allocation128_spill] sm:$0xff] %v5356_v12 }
  0x8d   :  { %8501 = vst [vmem:[#allocation129_spill] sm:$0xff] %v5361_v22  ;;  %v5386_v22 = vld [vmem:[%s8349_s6 + $0x1f4] sm:$0xf0] }
  0x8e   :  { %8502 = vst [vmem:[#allocation130_spill] sm:$0xff] %v5366_v8  ;;  %v5391_v8 = vld [vmem:[%s8350_s7 + $0x4] sm:$0xf] }
  0x8f   :  { %8503 = vst [vmem:[#allocation131_spill] sm:$0xff] %v5371_v16 }
  0x90   :  { %8504 = vst [vmem:[#allocation132_spill] sm:$0xff] %v5376_v30 }
  0x91   :  { %8505 = vst [vmem:[#allocation133_spill] sm:$0xff] %v5381_v20  ;;  %v5406_v20 = vld [vmem:[%s8350_s7 + $0x8] sm:$0xf] }
  0x92   :  { %8506 = vst [vmem:[#allocation134_spill] sm:$0xff] %v5386_v22  ;;  %v5411_v22 = vld [vmem:[%s8350_s7 + $0x14] sm:$0xf] }
  0x93   :  { %8507 = vst [vmem:[#allocation135_spill] sm:$0xff] %v5391_v8  ;;  %v5416_v8 = vld [vmem:[%s8350_s7 + $0x10] sm:$0xf] }
  0x94   :  { %8508 = vst [vmem:[#allocation136_spill] sm:$0xff] %v5396_v24  ;;  %v5421_v24 = vld [vmem:[%s8350_s7 + $0x18] sm:$0xf0] }
  0x95   :  { %8509 = vst [vmem:[#allocation137_spill] sm:$0xff] %v5401_v34  ;;  %v5426_v34 = vld [vmem:[%s8350_s7 + $0x14] sm:$0xf0] }
  0x96   :  { %8510 = vst [vmem:[#allocation138_spill] sm:$0xff] %v5406_v20  ;;  %v5431_v20 = vld [vmem:[%s8350_s7 + $0x20] sm:$0xf0] }
  0x97   :  { %8511 = vst [vmem:[#allocation139_spill] sm:$0xff] %v5411_v22  ;;  %v5436_v22 = vld [vmem:[%s8350_s7 + $0x1c] sm:$0xf0] }
  0x98   :  { %8512 = vst [vmem:[#allocation140_spill] sm:$0xff] %v5416_v8  ;;  %v5441_v8 = vld [vmem:[%s8350_s7 + $0x28] sm:$0xf0] }
  0x99   :  { %8513 = vst [vmem:[#allocation141_spill] sm:$0xff] %v5421_v24  ;;  %v5446_v24 = vld [vmem:[%s8350_s7 + $0x24] sm:$0xf0] }
  0x9a   :  { %8514 = vst [vmem:[#allocation142_spill] sm:$0xff] %v5426_v34  ;;  %v5451_v34 = vld [vmem:[%s8350_s7 + $0x34] sm:$0xf] }
  0x9b   :  { %8515 = vst [vmem:[#allocation143_spill] sm:$0xff] %v5431_v20  ;;  %v5456_v20 = vld [vmem:[%s8350_s7 + $0x30] sm:$0xf] }
  0x9c   :  { %8516 = vst [vmem:[#allocation144_spill] sm:$0xff] %v5436_v22  ;;  %v5461_v22 = vld [vmem:[%s8350_s7 + $0x3c] sm:$0xf] }
  0x9d   :  { %8517 = vst [vmem:[#allocation145_spill] sm:$0xff] %v5441_v8  ;;  %v5466_v8 = vld [vmem:[%s8350_s7 + $0x38] sm:$0xf] }
  0x9e   :  { %8518 = vst [vmem:[#allocation146_spill] sm:$0xff] %v5446_v24  ;;  %v5471_v24 = vld [vmem:[%s8350_s7 + $0x44] sm:$0xf] }
  0x9f   :  { %8519 = vst [vmem:[#allocation147_spill] sm:$0xff] %v5451_v34  ;;  %v5476_v34 = vld [vmem:[%s8350_s7 + $0x40] sm:$0xf] }
  0xa0   :  { %8520 = vst [vmem:[#allocation148_spill] sm:$0xff] %v5456_v20  ;;  %v5481_v20 = vld [vmem:[%s8350_s7 + $0x48] sm:$0xf0] }
  0xa1   :  { %8521 = vst [vmem:[#allocation149_spill] sm:$0xff] %v5461_v22  ;;  %v5486_v22 = vld [vmem:[%s8350_s7 + $0x44] sm:$0xf0] }
  0xa2   :  { %8522 = vst [vmem:[#allocation150_spill] sm:$0xff] %v5466_v8  ;;  %v5491_v8 = vld [vmem:[%s8350_s7 + $0x50] sm:$0xf0] }
  0xa3   :  { %8523 = vst [vmem:[#allocation151_spill] sm:$0xff] %v5471_v24  ;;  %v5496_v24 = vld [vmem:[%s8350_s7 + $0x4c] sm:$0xf0] }
  0xa4   :  { %8524 = vst [vmem:[#allocation152_spill] sm:$0xff] %v5476_v34  ;;  %v5501_v34 = vld [vmem:[%s8350_s7 + $0x58] sm:$0xf0] }
  0xa5   :  { %8525 = vst [vmem:[#allocation153_spill] sm:$0xff] %v5481_v20  ;;  %v5506_v20 = vld [vmem:[%s8350_s7 + $0x54] sm:$0xf0] }
  0xa6   :  { %8526 = vst [vmem:[#allocation154_spill] sm:$0xff] %v5486_v22  ;;  %v5511_v22 = vld [vmem:[%s8350_s7 + $0x64] sm:$0xf] }
  0xa7   :  { %8527 = vst [vmem:[#allocation155_spill] sm:$0xff] %v5491_v8  ;;  %v5516_v8 = vld [vmem:[%s8350_s7 + $0x60] sm:$0xf] }
  0xa8   :  { %8528 = vst [vmem:[#allocation156_spill] sm:$0xff] %v5496_v24  ;;  %v5521_v24 = vld [vmem:[%s8350_s7 + $0x6c] sm:$0xf] }
  0xa9   :  { %8529 = vst [vmem:[#allocation157_spill] sm:$0xff] %v5501_v34  ;;  %v5526_v34 = vld [vmem:[%s8350_s7 + $0x68] sm:$0xf] }
  0xaa   :  { %8530 = vst [vmem:[#allocation158_spill] sm:$0xff] %v5506_v20  ;;  %v5531_v20 = vld [vmem:[%s8350_s7 + $0x74] sm:$0xf] }
  0xab   :  { %8531 = vst [vmem:[#allocation159_spill] sm:$0xff] %v5511_v22  ;;  %v5536_v22 = vld [vmem:[%s8350_s7 + $0x70] sm:$0xf] }
  0xac   :  { %8532 = vst [vmem:[#allocation160_spill] sm:$0xff] %v5516_v8  ;;  %v5541_v8 = vld [vmem:[%s8350_s7 + $0x78] sm:$0xf0] }
  0xad   :  { %8533 = vst [vmem:[#allocation161_spill] sm:$0xff] %v5521_v24  ;;  %v5546_v24 = vld [vmem:[%s8350_s7 + $0x74] sm:$0xf0] }
  0xae   :  { %8534 = vst [vmem:[#allocation162_spill] sm:$0xff] %v5526_v34  ;;  %v5551_v34 = vld [vmem:[%s8350_s7 + $0x80] sm:$0xf0] }
  0xaf   :  { %8535 = vst [vmem:[#allocation163_spill] sm:$0xff] %v5531_v20  ;;  %v5556_v20 = vld [vmem:[%s8350_s7 + $0x7c] sm:$0xf0] }
  0xb0   :  { %8536 = vst [vmem:[#allocation164_spill] sm:$0xff] %v5536_v22  ;;  %v5561_v22 = vld [vmem:[%s8350_s7 + $0x88] sm:$0xf0] }
  0xb1   :  { %8537 = vst [vmem:[#allocation165_spill] sm:$0xff] %v5541_v8  ;;  %v5566_v8 = vld [vmem:[%s8350_s7 + $0x84] sm:$0xf0] }
  0xb2   :  { %8538 = vst [vmem:[#allocation166_spill] sm:$0xff] %v5546_v24  ;;  %v5571_v24 = vld [vmem:[%s8350_s7 + $0x94] sm:$0xf] }
  0xb3   :  { %8539 = vst [vmem:[#allocation167_spill] sm:$0xff] %v5551_v34  ;;  %v5576_v34 = vld [vmem:[%s8350_s7 + $0x90] sm:$0xf] }
  0xb4   :  { %8540 = vst [vmem:[#allocation168_spill] sm:$0xff] %v5556_v20  ;;  %v5581_v20 = vld [vmem:[%s8350_s7 + $0x9c] sm:$0xf] }
  0xb5   :  { %8541 = vst [vmem:[#allocation169_spill] sm:$0xff] %v5561_v22  ;;  %v5586_v22 = vld [vmem:[%s8350_s7 + $0x98] sm:$0xf] }
  0xb6   :  { %8542 = vst [vmem:[#allocation170_spill] sm:$0xff] %v5566_v8  ;;  %v5591_v8 = vld [vmem:[%s8350_s7 + $0xa4] sm:$0xf] }
  0xb7   :  { %8543 = vst [vmem:[#allocation171_spill] sm:$0xff] %v5571_v24  ;;  %v5596_v24 = vld [vmem:[%s8350_s7 + $0xa0] sm:$0xf] }
  0xb8   :  { %8544 = vst [vmem:[#allocation172_spill] sm:$0xff] %v5576_v34  ;;  %v5601_v34 = vld [vmem:[%s8350_s7 + $0xa8] sm:$0xf0] }
  0xb9   :  { %8545 = vst [vmem:[#allocation173_spill] sm:$0xff] %v5581_v20  ;;  %v5606_v20 = vld [vmem:[%s8350_s7 + $0xa4] sm:$0xf0] }
  0xba   :  { %8546 = vst [vmem:[#allocation174_spill] sm:$0xff] %v5586_v22  ;;  %v5611_v22 = vld [vmem:[%s8350_s7 + $0xb0] sm:$0xf0] }
  0xbb   :  { %8547 = vst [vmem:[#allocation175_spill] sm:$0xff] %v5591_v8  ;;  %v5616_v8 = vld [vmem:[%s8350_s7 + $0xac] sm:$0xf0] }
  0xbc   :  { %8548 = vst [vmem:[#allocation176_spill] sm:$0xff] %v5596_v24  ;;  %v5621_v24 = vld [vmem:[%s8350_s7 + $0xb8] sm:$0xf0] }
  0xbd   :  { %8549 = vst [vmem:[#allocation177_spill] sm:$0xff] %v5601_v34  ;;  %v5626_v34 = vld [vmem:[%s8350_s7 + $0xb4] sm:$0xf0] }
  0xbe   :  { %8550 = vst [vmem:[#allocation178_spill] sm:$0xff] %v5606_v20  ;;  %v5631_v20 = vld [vmem:[%s8350_s7 + $0xc4] sm:$0xf] }
  0xbf   :  { %8551 = vst [vmem:[#allocation179_spill] sm:$0xff] %v5611_v22  ;;  %v5636_v22 = vld [vmem:[%s8350_s7 + $0xc0] sm:$0xf] }
  0xc0   :  { %8552 = vst [vmem:[#allocation180_spill] sm:$0xff] %v5616_v8  ;;  %v5641_v8 = vld [vmem:[%s8350_s7 + $0xcc] sm:$0xf] }
  0xc1   :  { %8553 = vst [vmem:[#allocation181_spill] sm:$0xff] %v5621_v24  ;;  %v5646_v24 = vld [vmem:[%s8350_s7 + $0xc8] sm:$0xf] }
  0xc2   :  { %8554 = vst [vmem:[#allocation182_spill] sm:$0xff] %v5626_v34  ;;  %v5651_v34 = vld [vmem:[%s8350_s7 + $0xd4] sm:$0xf] }
  0xc3   :  { %8555 = vst [vmem:[#allocation183_spill] sm:$0xff] %v5631_v20  ;;  %v5656_v20 = vld [vmem:[%s8350_s7 + $0xd0] sm:$0xf] }
  0xc4   :  { %8556 = vst [vmem:[#allocation184_spill] sm:$0xff] %v5636_v22  ;;  %v5661_v22 = vld [vmem:[%s8350_s7 + $0xd8] sm:$0xf0] }
  0xc5   :  { %8557 = vst [vmem:[#allocation185_spill] sm:$0xff] %v5641_v8  ;;  %v5666_v8 = vld [vmem:[%s8350_s7 + $0xd4] sm:$0xf0] }
  0xc6   :  { %8558 = vst [vmem:[#allocation186_spill] sm:$0xff] %v5646_v24  ;;  %v5671_v24 = vld [vmem:[%s8350_s7 + $0xe0] sm:$0xf0] }
  0xc7   :  { %8559 = vst [vmem:[#allocation187_spill] sm:$0xff] %v5651_v34  ;;  %v5676_v34 = vld [vmem:[%s8350_s7 + $0xdc] sm:$0xf0] }
  0xc8   :  { %8560 = vst [vmem:[#allocation188_spill] sm:$0xff] %v5656_v20  ;;  %v5681_v20 = vld [vmem:[%s8350_s7 + $0xe8] sm:$0xf0] }
  0xc9   :  { %8561 = vst [vmem:[#allocation189_spill] sm:$0xff] %v5661_v22  ;;  %v5686_v22 = vld [vmem:[%s8350_s7 + $0xe4] sm:$0xf0] }
  0xca   :  { %8562 = vst [vmem:[#allocation190_spill] sm:$0xff] %v5666_v8  ;;  %v5691_v8 = vld [vmem:[%s8350_s7 + $0xf4] sm:$0xf] }
  0xcb   :  { %8563 = vst [vmem:[#allocation191_spill] sm:$0xff] %v5671_v24  ;;  %v5696_v24 = vld [vmem:[%s8350_s7 + $0xf0] sm:$0xf] }
  0xcc   :  { %8564 = vst [vmem:[#allocation192_spill] sm:$0xff] %v5676_v34  ;;  %v5701_v34 = vld [vmem:[%s8350_s7 + $0xfc] sm:$0xf] }
  0xcd   :  { %8565 = vst [vmem:[#allocation193_spill] sm:$0xff] %v5681_v20  ;;  %v5706_v20 = vld [vmem:[%s8350_s7 + $0xf8] sm:$0xf] }
  0xce   :  { %8566 = vst [vmem:[#allocation194_spill] sm:$0xff] %v5686_v22  ;;  %v5711_v22 = vld [vmem:[%s8350_s7 + $0x104] sm:$0xf] }
  0xcf   :  { %8567 = vst [vmem:[#allocation195_spill] sm:$0xff] %v5691_v8  ;;  %v5716_v8 = vld [vmem:[%s8350_s7 + $0x100] sm:$0xf] }
  0xd0   :  { %8568 = vst [vmem:[#allocation196_spill] sm:$0xff] %v5696_v24  ;;  %v5721_v24 = vld [vmem:[%s8350_s7 + $0x108] sm:$0xf0] }
  0xd1   :  { %8569 = vst [vmem:[#allocation197_spill] sm:$0xff] %v5701_v34  ;;  %v5726_v34 = vld [vmem:[%s8350_s7 + $0x104] sm:$0xf0] }
  0xd2   :  { %8570 = vst [vmem:[#allocation198_spill] sm:$0xff] %v5706_v20  ;;  %v5731_v20 = vld [vmem:[%s8350_s7 + $0x110] sm:$0xf0] }
  0xd3   :  { %8571 = vst [vmem:[#allocation199_spill] sm:$0xff] %v5711_v22  ;;  %v5736_v22 = vld [vmem:[%s8350_s7 + $0x10c] sm:$0xf0] }
  0xd4   :  { %8572 = vst [vmem:[#allocation200_spill] sm:$0xff] %v5716_v8  ;;  %v5741_v8 = vld [vmem:[%s8350_s7 + $0x118] sm:$0xf0] }
  0xd5   :  { %8573 = vst [vmem:[#allocation201_spill] sm:$0xff] %v5721_v24  ;;  %v5746_v24 = vld [vmem:[%s8350_s7 + $0x114] sm:$0xf0] }
  0xd6   :  { %8574 = vst [vmem:[#allocation202_spill] sm:$0xff] %v5726_v34  ;;  %v5751_v34 = vld [vmem:[%s8350_s7 + $0x124] sm:$0xf] }
  0xd7   :  { %8575 = vst [vmem:[#allocation203_spill] sm:$0xff] %v5731_v20  ;;  %v5756_v20 = vld [vmem:[%s8350_s7 + $0x120] sm:$0xf] }
  0xd8   :  { %8576 = vst [vmem:[#allocation204_spill] sm:$0xff] %v5736_v22  ;;  %v5761_v22 = vld [vmem:[%s8350_s7 + $0x12c] sm:$0xf] }
  0xd9   :  { %8577 = vst [vmem:[#allocation205_spill] sm:$0xff] %v5741_v8  ;;  %v5766_v8 = vld [vmem:[%s8350_s7 + $0x128] sm:$0xf] }
  0xda   :  { %8578 = vst [vmem:[#allocation206_spill] sm:$0xff] %v5746_v24  ;;  %v5771_v24 = vld [vmem:[%s8350_s7 + $0x134] sm:$0xf] }
  0xdb   :  { %8579 = vst [vmem:[#allocation207_spill] sm:$0xff] %v5751_v34  ;;  %v5776_v34 = vld [vmem:[%s8350_s7 + $0x130] sm:$0xf] }
  0xdc   :  { %8580 = vst [vmem:[#allocation208_spill] sm:$0xff] %v5756_v20  ;;  %v5781_v20 = vld [vmem:[%s8350_s7 + $0x138] sm:$0xf0] }
  0xdd   :  { %8581 = vst [vmem:[#allocation209_spill] sm:$0xff] %v5761_v22  ;;  %v5786_v22 = vld [vmem:[%s8350_s7 + $0x134] sm:$0xf0] }
  0xde   :  { %8582 = vst [vmem:[#allocation210_spill] sm:$0xff] %v5766_v8  ;;  %v5791_v8 = vld [vmem:[%s8350_s7 + $0x140] sm:$0xf0] }
  0xdf   :  { %8583 = vst [vmem:[#allocation211_spill] sm:$0xff] %v5771_v24  ;;  %v5796_v24 = vld [vmem:[%s8350_s7 + $0x13c] sm:$0xf0] }
  0xe0   :  { %8584 = vst [vmem:[#allocation212_spill] sm:$0xff] %v5776_v34  ;;  %v5801_v34 = vld [vmem:[%s8350_s7 + $0x148] sm:$0xf0] }
  0xe1   :  { %8585 = vst [vmem:[#allocation213_spill] sm:$0xff] %v5781_v20  ;;  %v5806_v20 = vld [vmem:[%s8350_s7 + $0x144] sm:$0xf0] }
  0xe2   :  { %8586 = vst [vmem:[#allocation214_spill] sm:$0xff] %v5786_v22  ;;  %v5811_v22 = vld [vmem:[%s8350_s7 + $0x154] sm:$0xf] }
  0xe3   :  { %8587 = vst [vmem:[#allocation215_spill] sm:$0xff] %v5791_v8  ;;  %v5816_v8 = vld [vmem:[%s8350_s7 + $0x150] sm:$0xf] }
  0xe4   :  { %8588 = vst [vmem:[#allocation216_spill] sm:$0xff] %v5796_v24  ;;  %v5821_v24 = vld [vmem:[%s8350_s7 + $0x15c] sm:$0xf] }
  0xe5   :  { %8589 = vst [vmem:[#allocation217_spill] sm:$0xff] %v5801_v34  ;;  %v5826_v34 = vld [vmem:[%s8350_s7 + $0x158] sm:$0xf] }
  0xe6   :  { %8590 = vst [vmem:[#allocation218_spill] sm:$0xff] %v5806_v20  ;;  %v5831_v20 = vld [vmem:[%s8350_s7 + $0x164] sm:$0xf] }
  0xe7   :  { %8591 = vst [vmem:[#allocation219_spill] sm:$0xff] %v5811_v22  ;;  %v5836_v22 = vld [vmem:[%s8350_s7 + $0x160] sm:$0xf] }
  0xe8   :  { %8592 = vst [vmem:[#allocation220_spill] sm:$0xff] %v5816_v8  ;;  %v5841_v8 = vld [vmem:[%s8350_s7 + $0x168] sm:$0xf0] }
  0xe9   :  { %8593 = vst [vmem:[#allocation221_spill] sm:$0xff] %v5821_v24  ;;  %v5846_v24 = vld [vmem:[%s8350_s7 + $0x164] sm:$0xf0] }
  0xea   :  { %8594 = vst [vmem:[#allocation222_spill] sm:$0xff] %v5826_v34  ;;  %v5851_v34 = vld [vmem:[%s8350_s7 + $0x170] sm:$0xf0] }
  0xeb   :  { %8595 = vst [vmem:[#allocation223_spill] sm:$0xff] %v5831_v20  ;;  %v5856_v20 = vld [vmem:[%s8350_s7 + $0x16c] sm:$0xf0] }
  0xec   :  { %8596 = vst [vmem:[#allocation224_spill] sm:$0xff] %v5836_v22  ;;  %v5861_v22 = vld [vmem:[%s8350_s7 + $0x178] sm:$0xf0] }
  0xed   :  { %8597 = vst [vmem:[#allocation225_spill] sm:$0xff] %v5841_v8  ;;  %v5866_v8 = vld [vmem:[%s8350_s7 + $0x174] sm:$0xf0] }
  0xee   :  { %8598 = vst [vmem:[#allocation226_spill] sm:$0xff] %v5846_v24  ;;  %v5871_v24 = vld [vmem:[%s8351_s8] sm:$0xf] }
  0xef   :  { %8599 = vst [vmem:[#allocation227_spill] sm:$0xff] %v5851_v34  ;;  %v5876_v34 = vld [vmem:[%s8351_s8] sm:$0xf0] }
  0xf0   :  { %8600 = vst [vmem:[#allocation228_spill] sm:$0xff] %v5856_v20  ;;  %v5881_v20 = vld [vmem:[%s8351_s8 + $0x8] sm:$0xf] }
  0xf1   :  { %8601 = vst [vmem:[#allocation229_spill] sm:$0xff] %v5861_v22  ;;  %v5886_v22 = vld [vmem:[%s8351_s8 + $0x8] sm:$0xf0] }
  0xf2   :  { %8602 = vst [vmem:[#allocation230_spill] sm:$0xff] %v5866_v8  ;;  %v5891_v8 = vld [vmem:[%s8351_s8 + $0x10] sm:$0xf] }
  0xf3   :  { %8603 = vst [vmem:[#allocation231_spill] sm:$0xff] %v5871_v24  ;;  %v5896_v24 = vld [vmem:[%s8351_s8 + $0x10] sm:$0xf0] }
  0xf4   :  { %8604 = vst [vmem:[#allocation232_spill] sm:$0xff] %v5876_v34  ;;  %v5901_v34 = vld [vmem:[%s8351_s8 + $0x18] sm:$0xf] }
  0xf5   :  { %8605 = vst [vmem:[#allocation233_spill] sm:$0xff] %v5881_v20  ;;  %v5906_v20 = vld [vmem:[%s8351_s8 + $0x18] sm:$0xf0] }
  0xf6   :  { %8606 = vst [vmem:[#allocation234_spill] sm:$0xff] %v5886_v22  ;;  %v5911_v22 = vld [vmem:[%s8351_s8 + $0x20] sm:$0xf] }
  0xf7   :  { %8607 = vst [vmem:[#allocation235_spill] sm:$0xff] %v5891_v8  ;;  %v5916_v8 = vld [vmem:[%s8351_s8 + $0x20] sm:$0xf0] }
  0xf8   :  { %8608 = vst [vmem:[#allocation236_spill] sm:$0xff] %v5896_v24  ;;  %v5921_v24 = vld [vmem:[%s8351_s8 + $0x28] sm:$0xf] }
  0xf9   :  { %8609 = vst [vmem:[#allocation237_spill] sm:$0xff] %v5901_v34  ;;  %v5926_v34 = vld [vmem:[%s8351_s8 + $0x28] sm:$0xf0] }
  0xfa   :  { %8610 = vst [vmem:[#allocation238_spill] sm:$0xff] %v5906_v20  ;;  %v5931_v20 = vld [vmem:[%s8351_s8 + $0x30] sm:$0xf] }
  0xfb   :  { %8611 = vst [vmem:[#allocation239_spill] sm:$0xff] %v5911_v22  ;;  %v5936_v22 = vld [vmem:[%s8351_s8 + $0x30] sm:$0xf0] }
  0xfc   :  { %8612 = vst [vmem:[#allocation240_spill] sm:$0xff] %v5916_v8  ;;  %v5941_v8 = vld [vmem:[%s8351_s8 + $0x38] sm:$0xf] }
  0xfd   :  { %8613 = vst [vmem:[#allocation241_spill] sm:$0xff] %v5921_v24  ;;  %v5946_v24 = vld [vmem:[%s8351_s8 + $0x38] sm:$0xf0] }
  0xfe   :  { %8614 = vst [vmem:[#allocation242_spill] sm:$0xff] %v5926_v34  ;;  %v5951_v34 = vld [vmem:[%s8352_s9] sm:$0x1] }
  0xff   :  { %8615 = vst [vmem:[#allocation243_spill] sm:$0xff] %v5931_v20  ;;  %v5956_v20 = vld [vmem:[%s8353_s10] sm:$0x1] }
 0x100   :  { %8616 = vst [vmem:[#allocation244_spill] sm:$0xff] %v5936_v22  ;;  %v5961_v22 = vld [vmem:[%s8354_s11] sm:$0xf] }
 0x101   :  { %8617 = vst [vmem:[#allocation245_spill] sm:$0xff] %v5941_v8  ;;  %v5966_v8 = vld [vmem:[%s8354_s11] sm:$0xf0] }
 0x102   :  { %8618 = vst [vmem:[#allocation246_spill] sm:$0xff] %v5946_v24  ;;  %v5971_v24 = vld [vmem:[%s8354_s11 + $0x8] sm:$0xf] }
 0x103   :  { %8619 = vst [vmem:[#allocation247_spill] sm:$0xff] %v5951_v34  ;;  %v5976_v34 = vld [vmem:[%s8354_s11 + $0x8] sm:$0xf0] }
 0x104   :  { %8620 = vst [vmem:[#allocation248_spill] sm:$0xff] %v5956_v20  ;;  %v5981_v20 = vld [vmem:[%s8354_s11 + $0x10] sm:$0xf] }
 0x105   :  { %8621 = vst [vmem:[#allocation249_spill] sm:$0xff] %v5961_v22  ;;  %v5986_v22 = vld [vmem:[%s8354_s11 + $0x10] sm:$0xf0] }
 0x106   :  { %8622 = vst [vmem:[#allocation250_spill] sm:$0xff] %v5966_v8  ;;  %v5991_v8 = vld [vmem:[%s8354_s11 + $0x18] sm:$0xf] }
 0x107   :  { %8623 = vst [vmem:[#allocation251_spill] sm:$0xff] %v5971_v24  ;;  %v5996_v24 = vld [vmem:[%s8354_s11 + $0x18] sm:$0xf0] }
 0x108   :  { %8624 = vst [vmem:[#allocation252_spill] sm:$0xff] %v5976_v34  ;;  %v6001_v34 = vld [vmem:[%s8354_s11 + $0x20] sm:$0xf] }
 0x109   :  { %8625 = vst [vmem:[#allocation253_spill] sm:$0xff] %v5981_v20  ;;  %v6006_v20 = vld [vmem:[%s8354_s11 + $0x20] sm:$0xf0] }
 0x10a   :  { %8626 = vst [vmem:[#allocation254_spill] sm:$0xff] %v5986_v22  ;;  %v6011_v22 = vld [vmem:[%s8354_s11 + $0x28] sm:$0xf] }
 0x10b   :  { %8627 = vst [vmem:[#allocation255_spill] sm:$0xff] %v5991_v8  ;;  %v6016_v8 = vld [vmem:[%s8354_s11 + $0x28] sm:$0xf0] }
 0x10c   :  { %8628 = vst [vmem:[#allocation256_spill] sm:$0xff] %v5996_v24  ;;  %v6021_v24 = vld [vmem:[%s8354_s11 + $0x30] sm:$0xf] }
 0x10d   :  { %8629 = vst [vmem:[#allocation257_spill] sm:$0xff] %v6001_v34  ;;  %v6026_v34 = vld [vmem:[%s8354_s11 + $0x30] sm:$0xf0] }
 0x10e   :  { %8630 = vst [vmem:[#allocation258_spill] sm:$0xff] %v6006_v20  ;;  %v6031_v20 = vld [vmem:[%s8354_s11 + $0x38] sm:$0xf] }
 0x10f   :  { %8631 = vst [vmem:[#allocation259_spill] sm:$0xff] %v6011_v22  ;;  %v6036_v22 = vld [vmem:[%s8354_s11 + $0x38] sm:$0xf0] }
 0x110   :  { %8632 = vst [vmem:[#allocation260_spill] sm:$0xff] %v6016_v8  ;;  %v6041_v8 = vld [vmem:[%s8355_s12] sm:$0x1] }
 0x111   :  { %8633 = vst [vmem:[#allocation261_spill] sm:$0xff] %v6021_v24  ;;  %v6046_v24 = vld [vmem:[%s8356_s13 + $0x4] sm:$0xf] }
 0x112   :  { %8634 = vst [vmem:[#allocation262_spill] sm:$0xff] %v6026_v34  ;;  %v6051_v34 = vld [vmem:[%s8356_s13] sm:$0xf] }
 0x113   :  { %8635 = vst [vmem:[#allocation263_spill] sm:$0xff] %v6031_v20  ;;  %v6056_v20 = vld [vmem:[%s8356_s13 + $0xc] sm:$0xf] }
 0x114   :  { %8636 = vst [vmem:[#allocation264_spill] sm:$0xff] %v6036_v22  ;;  %v6061_v22 = vld [vmem:[%s8356_s13 + $0x8] sm:$0xf] }
 0x115   :  { %8637 = vst [vmem:[#allocation265_spill] sm:$0xff] %v6041_v8  ;;  %v6066_v8 = vld [vmem:[%s8356_s13 + $0x10] sm:$0xf0] }
 0x116   :  { %8638 = vst [vmem:[#allocation266_spill] sm:$0xff] %v6046_v24  ;;  %v6071_v24 = vld [vmem:[%s8356_s13 + $0xc] sm:$0xf0] }
 0x117   :  { %8639 = vst [vmem:[#allocation267_spill] sm:$0xff] %v6051_v34  ;;  %v6076_v34 = vld [vmem:[%s8356_s13 + $0x18] sm:$0xf0] }
 0x118   :  { %8640 = vst [vmem:[#allocation268_spill] sm:$0xff] %v6056_v20  ;;  %v6081_v20 = vld [vmem:[%s8356_s13 + $0x14] sm:$0xf0] }
 0x119   :  { %8641 = vst [vmem:[#allocation269_spill] sm:$0xff] %v6061_v22  ;;  %v6086_v22 = vld [vmem:[%s8356_s13 + $0x24] sm:$0xf] }
 0x11a   :  { %8642 = vst [vmem:[#allocation270_spill] sm:$0xff] %v6066_v8  ;;  %v6091_v8 = vld [vmem:[%s8356_s13 + $0x20] sm:$0xf] }
 0x11b   :  { %8643 = vst [vmem:[#allocation271_spill] sm:$0xff] %v6071_v24  ;;  %v6096_v24 = vld [vmem:[%s8356_s13 + $0x2c] sm:$0xf] }
 0x11c   :  { %8644 = vst [vmem:[#allocation272_spill] sm:$0xff] %v6076_v34  ;;  %v6101_v34 = vld [vmem:[%s8356_s13 + $0x28] sm:$0xf] }
 0x11d   :  { %8645 = vst [vmem:[#allocation273_spill] sm:$0xff] %v6081_v20  ;;  %v6106_v20 = vld [vmem:[%s8356_s13 + $0x30] sm:$0xf0] }
 0x11e   :  { %8646 = vst [vmem:[#allocation274_spill] sm:$0xff] %v6086_v22  ;;  %v6111_v22 = vld [vmem:[%s8356_s13 + $0x2c] sm:$0xf0] }
 0x11f   :  { %8647 = vst [vmem:[#allocation275_spill] sm:$0xff] %v6091_v8  ;;  %v6116_v8 = vld [vmem:[%s8356_s13 + $0x38] sm:$0xf0] }
 0x120   :  { %8648 = vst [vmem:[#allocation276_spill] sm:$0xff] %v6096_v24  ;;  %v6121_v24 = vld [vmem:[%s8356_s13 + $0x34] sm:$0xf0] }
 0x121   :  { %8649 = vst [vmem:[#allocation277_spill] sm:$0xff] %v6101_v34  ;;  %v6126_v34 = vld [vmem:[%s8356_s13 + $0x44] sm:$0xf] }
 0x122   :  { %8650 = vst [vmem:[#allocation278_spill] sm:$0xff] %v6106_v20  ;;  %v6131_v20 = vld [vmem:[%s8356_s13 + $0x40] sm:$0xf] }
 0x123   :  { %8651 = vst [vmem:[#allocation279_spill] sm:$0xff] %v6111_v22  ;;  %v6136_v22 = vld [vmem:[%s8356_s13 + $0x4c] sm:$0xf] }
 0x124   :  { %8652 = vst [vmem:[#allocation280_spill] sm:$0xff] %v6116_v8  ;;  %v6141_v8 = vld [vmem:[%s8356_s13 + $0x48] sm:$0xf] }
 0x125   :  { %8653 = vst [vmem:[#allocation281_spill] sm:$0xff] %v6121_v24  ;;  %v6146_v24 = vld [vmem:[%s8356_s13 + $0x50] sm:$0xf0] }
 0x126   :  { %8654 = vst [vmem:[#allocation282_spill] sm:$0xff] %v6126_v34  ;;  %v6151_v34 = vld [vmem:[%s8356_s13 + $0x4c] sm:$0xf0] }
 0x127   :  { %8655 = vst [vmem:[#allocation283_spill] sm:$0xff] %v6131_v20  ;;  %v6156_v20 = vld [vmem:[%s8356_s13 + $0x58] sm:$0xf0] }
 0x128   :  { %8656 = vst [vmem:[#allocation284_spill] sm:$0xff] %v6136_v22  ;;  %v6161_v22 = vld [vmem:[%s8356_s13 + $0x54] sm:$0xf0] }
 0x129   :  { %8657 = vst [vmem:[#allocation285_spill] sm:$0xff] %v6141_v8  ;;  %v6166_v8 = vld [vmem:[%s8356_s13 + $0x64] sm:$0xf] }
 0x12a   :  { %8658 = vst [vmem:[#allocation286_spill] sm:$0xff] %v6146_v24  ;;  %v6171_v24 = vld [vmem:[%s8356_s13 + $0x60] sm:$0xf] }
 0x12b   :  { %8659 = vst [vmem:[#allocation287_spill] sm:$0xff] %v6151_v34  ;;  %v6176_v34 = vld [vmem:[%s8356_s13 + $0x6c] sm:$0xf] }
 0x12c   :  { %8660 = vst [vmem:[#allocation288_spill] sm:$0xff] %v6156_v20  ;;  %v6181_v20 = vld [vmem:[%s8356_s13 + $0x68] sm:$0xf] }
 0x12d   :  { %8661 = vst [vmem:[#allocation289_spill] sm:$0xff] %v6161_v22  ;;  %v6186_v22 = vld [vmem:[%s8356_s13 + $0x70] sm:$0xf0] }
 0x12e   :  { %8662 = vst [vmem:[#allocation290_spill] sm:$0xff] %v6166_v8  ;;  %v6191_v8 = vld [vmem:[%s8356_s13 + $0x6c] sm:$0xf0] }
 0x12f   :  { %8663 = vst [vmem:[#allocation291_spill] sm:$0xff] %v6171_v24  ;;  %v6196_v24 = vld [vmem:[%s8356_s13 + $0x78] sm:$0xf0] }
 0x130   :  { %8664 = vst [vmem:[#allocation292_spill] sm:$0xff] %v6176_v34  ;;  %v6201_v34 = vld [vmem:[%s8356_s13 + $0x74] sm:$0xf0] }
 0x131   :  { %8665 = vst [vmem:[#allocation293_spill] sm:$0xff] %v6181_v20  ;;  %v6206_v20 = vld [vmem:[%s8356_s13 + $0x84] sm:$0xf] }
 0x132   :  { %8666 = vst [vmem:[#allocation294_spill] sm:$0xff] %v6186_v22  ;;  %v6211_v22 = vld [vmem:[%s8356_s13 + $0x80] sm:$0xf] }
 0x133   :  { %8667 = vst [vmem:[#allocation295_spill] sm:$0xff] %v6191_v8  ;;  %v6216_v8 = vld [vmem:[%s8356_s13 + $0x8c] sm:$0xf] }
 0x134   :  { %8668 = vst [vmem:[#allocation296_spill] sm:$0xff] %v6196_v24  ;;  %v6221_v24 = vld [vmem:[%s8356_s13 + $0x88] sm:$0xf] }
 0x135   :  { %8669 = vst [vmem:[#allocation297_spill] sm:$0xff] %v6201_v34  ;;  %v6226_v34 = vld [vmem:[%s8356_s13 + $0x90] sm:$0xf0] }
 0x136   :  { %8670 = vst [vmem:[#allocation298_spill] sm:$0xff] %v6206_v20  ;;  %v6231_v20 = vld [vmem:[%s8356_s13 + $0x8c] sm:$0xf0] }
 0x137   :  { %8671 = vst [vmem:[#allocation299_spill] sm:$0xff] %v6211_v22  ;;  %v6236_v22 = vld [vmem:[%s8356_s13 + $0x98] sm:$0xf0] }
 0x138   :  { %8672 = vst [vmem:[#allocation300_spill] sm:$0xff] %v6216_v8  ;;  %v6241_v8 = vld [vmem:[%s8356_s13 + $0x94] sm:$0xf0] }
 0x139   :  { %8673 = vst [vmem:[#allocation301_spill] sm:$0xff] %v6221_v24  ;;  %v6246_v24 = vld [vmem:[%s8356_s13 + $0xa4] sm:$0xf] }
 0x13a   :  { %8674 = vst [vmem:[#allocation302_spill] sm:$0xff] %v6226_v34  ;;  %v6251_v34 = vld [vmem:[%s8356_s13 + $0xa0] sm:$0xf] }
 0x13b   :  { %8675 = vst [vmem:[#allocation303_spill] sm:$0xff] %v6231_v20  ;;  %v6256_v20 = vld [vmem:[%s8356_s13 + $0xac] sm:$0xf] }
 0x13c   :  { %8676 = vst [vmem:[#allocation304_spill] sm:$0xff] %v6236_v22  ;;  %v6261_v22 = vld [vmem:[%s8356_s13 + $0xa8] sm:$0xf] }
 0x13d   :  { %8677 = vst [vmem:[#allocation305_spill] sm:$0xff] %v6241_v8  ;;  %v6266_v8 = vld [vmem:[%s8356_s13 + $0xb0] sm:$0xf0] }
 0x13e   :  { %8678 = vst [vmem:[#allocation306_spill] sm:$0xff] %v6246_v24  ;;  %v6271_v24 = vld [vmem:[%s8356_s13 + $0xac] sm:$0xf0] }
 0x13f   :  { %8679 = vst [vmem:[#allocation307_spill] sm:$0xff] %v6251_v34  ;;  %v6276_v34 = vld [vmem:[%s8356_s13 + $0xb8] sm:$0xf0] }
 0x140   :  { %8680 = vst [vmem:[#allocation308_spill] sm:$0xff] %v6256_v20  ;;  %v6281_v20 = vld [vmem:[%s8356_s13 + $0xb4] sm:$0xf0] }
 0x141   :  { %8681 = vst [vmem:[#allocation309_spill] sm:$0xff] %v6261_v22  ;;  %v6286_v22 = vld [vmem:[%s8356_s13 + $0xc4] sm:$0xf] }
 0x142   :  { %8682 = vst [vmem:[#allocation310_spill] sm:$0xff] %v6266_v8  ;;  %v6291_v8 = vld [vmem:[%s8356_s13 + $0xc0] sm:$0xf] }
 0x143   :  { %8683 = vst [vmem:[#allocation311_spill] sm:$0xff] %v6271_v24  ;;  %v6296_v24 = vld [vmem:[%s8356_s13 + $0xcc] sm:$0xf] }
 0x144   :  { %8684 = vst [vmem:[#allocation312_spill] sm:$0xff] %v6276_v34  ;;  %v6301_v34 = vld [vmem:[%s8356_s13 + $0xc8] sm:$0xf] }
 0x145   :  { %8685 = vst [vmem:[#allocation313_spill] sm:$0xff] %v6281_v20  ;;  %v6306_v20 = vld [vmem:[%s8356_s13 + $0xd0] sm:$0xf0] }
 0x146   :  { %8686 = vst [vmem:[#allocation314_spill] sm:$0xff] %v6286_v22  ;;  %v6311_v22 = vld [vmem:[%s8356_s13 + $0xcc] sm:$0xf0] }
 0x147   :  { %8687 = vst [vmem:[#allocation315_spill] sm:$0xff] %v6291_v8  ;;  %v6316_v8 = vld [vmem:[%s8356_s13 + $0xd8] sm:$0xf0] }
 0x148   :  { %8688 = vst [vmem:[#allocation316_spill] sm:$0xff] %v6296_v24  ;;  %v6321_v24 = vld [vmem:[%s8356_s13 + $0xd4] sm:$0xf0] }
 0x149   :  { %8689 = vst [vmem:[#allocation317_spill] sm:$0xff] %v6301_v34  ;;  %v6326_v34 = vld [vmem:[%s8356_s13 + $0xe4] sm:$0xf] }
 0x14a   :  { %8690 = vst [vmem:[#allocation318_spill] sm:$0xff] %v6306_v20  ;;  %v6331_v20 = vld [vmem:[%s8356_s13 + $0xe0] sm:$0xf] }
 0x14b   :  { %8691 = vst [vmem:[#allocation319_spill] sm:$0xff] %v6311_v22  ;;  %v6336_v22 = vld [vmem:[%s8356_s13 + $0xec] sm:$0xf] }
 0x14c   :  { %8692 = vst [vmem:[#allocation320_spill] sm:$0xff] %v6316_v8  ;;  %v6341_v8 = vld [vmem:[%s8356_s13 + $0xe8] sm:$0xf] }
 0x14d   :  { %8693 = vst [vmem:[#allocation321_spill] sm:$0xff] %v6321_v24  ;;  %v6346_v24 = vld [vmem:[%s8356_s13 + $0xf0] sm:$0xf0] }
 0x14e   :  { %8694 = vst [vmem:[#allocation322_spill] sm:$0xff] %v6326_v34  ;;  %v6351_v34 = vld [vmem:[%s8356_s13 + $0xec] sm:$0xf0] }
 0x14f   :  { %8695 = vst [vmem:[#allocation323_spill] sm:$0xff] %v6331_v20  ;;  %v6356_v20 = vld [vmem:[%s8356_s13 + $0xf8] sm:$0xf0] }
 0x150   :  { %8696 = vst [vmem:[#allocation324_spill] sm:$0xff] %v6336_v22  ;;  %v6361_v22 = vld [vmem:[%s8356_s13 + $0xf4] sm:$0xf0] }
 0x151   :  { %8697 = vst [vmem:[#allocation325_spill] sm:$0xff] %v6341_v8  ;;  %v6366_v8 = vld [vmem:[%s8356_s13 + $0x104] sm:$0xf] }
 0x152   :  { %8698 = vst [vmem:[#allocation326_spill] sm:$0xff] %v6346_v24  ;;  %v6371_v24 = vld [vmem:[%s8356_s13 + $0x100] sm:$0xf] }
 0x153   :  { %8699 = vst [vmem:[#allocation327_spill] sm:$0xff] %v6351_v34  ;;  %v6376_v34 = vld [vmem:[%s8356_s13 + $0x10c] sm:$0xf] }
 0x154   :  { %8700 = vst [vmem:[#allocation328_spill] sm:$0xff] %v6356_v20  ;;  %v6381_v20 = vld [vmem:[%s8356_s13 + $0x108] sm:$0xf] }
 0x155   :  { %8701 = vst [vmem:[#allocation329_spill] sm:$0xff] %v6361_v22  ;;  %v6386_v22 = vld [vmem:[%s8356_s13 + $0x110] sm:$0xf0] }
 0x156   :  { %8702 = vst [vmem:[#allocation330_spill] sm:$0xff] %v6366_v8  ;;  %v6391_v8 = vld [vmem:[%s8356_s13 + $0x10c] sm:$0xf0] }
 0x157   :  { %8703 = vst [vmem:[#allocation331_spill] sm:$0xff] %v6371_v24  ;;  %v6396_v24 = vld [vmem:[%s8356_s13 + $0x118] sm:$0xf0] }
 0x158   :  { %8704 = vst [vmem:[#allocation332_spill] sm:$0xff] %v6376_v34  ;;  %v6401_v34 = vld [vmem:[%s8356_s13 + $0x114] sm:$0xf0] }
 0x159   :  { %8705 = vst [vmem:[#allocation333_spill] sm:$0xff] %v6381_v20  ;;  %v6406_v20 = vld [vmem:[%s8356_s13 + $0x124] sm:$0xf] }
 0x15a   :  { %8706 = vst [vmem:[#allocation334_spill] sm:$0xff] %v6386_v22  ;;  %v6411_v22 = vld [vmem:[%s8356_s13 + $0x120] sm:$0xf] }
 0x15b   :  { %8707 = vst [vmem:[#allocation335_spill] sm:$0xff] %v6391_v8  ;;  %v6416_v8 = vld [vmem:[%s8356_s13 + $0x12c] sm:$0xf] }
 0x15c   :  { %8708 = vst [vmem:[#allocation336_spill] sm:$0xff] %v6396_v24  ;;  %v6421_v24 = vld [vmem:[%s8356_s13 + $0x128] sm:$0xf] }
 0x15d   :  { %8709 = vst [vmem:[#allocation337_spill] sm:$0xff] %v6401_v34  ;;  %v6426_v34 = vld [vmem:[%s8356_s13 + $0x130] sm:$0xf0] }
 0x15e   :  { %8710 = vst [vmem:[#allocation338_spill] sm:$0xff] %v6406_v20  ;;  %v6431_v20 = vld [vmem:[%s8356_s13 + $0x12c] sm:$0xf0] }
 0x15f   :  { %8711 = vst [vmem:[#allocation339_spill] sm:$0xff] %v6411_v22  ;;  %v6436_v22 = vld [vmem:[%s8356_s13 + $0x138] sm:$0xf0] }
 0x160   :  { %8712 = vst [vmem:[#allocation340_spill] sm:$0xff] %v6416_v8  ;;  %v6441_v8 = vld [vmem:[%s8356_s13 + $0x134] sm:$0xf0] }
 0x161   :  { %8713 = vst [vmem:[#allocation341_spill] sm:$0xff] %v6421_v24  ;;  %v6446_v24 = vld [vmem:[%s8356_s13 + $0x144] sm:$0xf] }
 0x162   :  { %8714 = vst [vmem:[#allocation342_spill] sm:$0xff] %v6426_v34  ;;  %v6451_v34 = vld [vmem:[%s8356_s13 + $0x140] sm:$0xf] }
 0x163   :  { %8715 = vst [vmem:[#allocation343_spill] sm:$0xff] %v6431_v20  ;;  %v6456_v20 = vld [vmem:[%s8356_s13 + $0x14c] sm:$0xf] }
 0x164   :  { %8716 = vst [vmem:[#allocation344_spill] sm:$0xff] %v6436_v22  ;;  %v6461_v22 = vld [vmem:[%s8356_s13 + $0x148] sm:$0xf] }
 0x165   :  { %8717 = vst [vmem:[#allocation345_spill] sm:$0xff] %v6441_v8  ;;  %v6466_v8 = vld [vmem:[%s8356_s13 + $0x150] sm:$0xf0] }
 0x166   :  { %8718 = vst [vmem:[#allocation346_spill] sm:$0xff] %v6446_v24  ;;  %v6471_v24 = vld [vmem:[%s8356_s13 + $0x14c] sm:$0xf0] }
 0x167   :  { %8719 = vst [vmem:[#allocation347_spill] sm:$0xff] %v6451_v34  ;;  %v6476_v34 = vld [vmem:[%s8356_s13 + $0x158] sm:$0xf0] }
 0x168   :  { %8720 = vst [vmem:[#allocation348_spill] sm:$0xff] %v6456_v20  ;;  %v6481_v20 = vld [vmem:[%s8356_s13 + $0x154] sm:$0xf0] }
 0x169   :  { %8721 = vst [vmem:[#allocation349_spill] sm:$0xff] %v6461_v22  ;;  %v6486_v22 = vld [vmem:[%s8356_s13 + $0x164] sm:$0xf] }
 0x16a   :  { %8722 = vst [vmem:[#allocation350_spill] sm:$0xff] %v6466_v8  ;;  %v6491_v8 = vld [vmem:[%s8356_s13 + $0x160] sm:$0xf] }
 0x16b   :  { %8723 = vst [vmem:[#allocation351_spill] sm:$0xff] %v6471_v24  ;;  %v6496_v24 = vld [vmem:[%s8356_s13 + $0x16c] sm:$0xf] }
 0x16c   :  { %8724 = vst [vmem:[#allocation352_spill] sm:$0xff] %v6476_v34  ;;  %v6501_v34 = vld [vmem:[%s8356_s13 + $0x168] sm:$0xf] }
 0x16d   :  { %8725 = vst [vmem:[#allocation353_spill] sm:$0xff] %v6481_v20  ;;  %v6506_v20 = vld [vmem:[%s8356_s13 + $0x170] sm:$0xf0] }
 0x16e   :  { %8726 = vst [vmem:[#allocation354_spill] sm:$0xff] %v6486_v22  ;;  %v6511_v22 = vld [vmem:[%s8356_s13 + $0x16c] sm:$0xf0] }
 0x16f   :  { %8727 = vst [vmem:[#allocation355_spill] sm:$0xff] %v6491_v8  ;;  %v6516_v8 = vld [vmem:[%s8356_s13 + $0x178] sm:$0xf0] }
 0x170   :  { %8728 = vst [vmem:[#allocation356_spill] sm:$0xff] %v6496_v24  ;;  %v6521_v24 = vld [vmem:[%s8356_s13 + $0x174] sm:$0xf0] }
 0x171   :  { %8729 = vst [vmem:[#allocation357_spill] sm:$0xff] %v6501_v34  ;;  %v6526_v34 = vld [vmem:[%s8356_s13 + $0x184] sm:$0xf] }
 0x172   :  { %8730 = vst [vmem:[#allocation358_spill] sm:$0xff] %v6506_v20  ;;  %v6531_v20 = vld [vmem:[%s8356_s13 + $0x180] sm:$0xf] }
 0x173   :  { %8731 = vst [vmem:[#allocation359_spill] sm:$0xff] %v6511_v22  ;;  %v6536_v22 = vld [vmem:[%s8356_s13 + $0x18c] sm:$0xf] }
 0x174   :  { %8732 = vst [vmem:[#allocation360_spill] sm:$0xff] %v6516_v8  ;;  %v6541_v8 = vld [vmem:[%s8356_s13 + $0x188] sm:$0xf] }
 0x175   :  { %8733 = vst [vmem:[#allocation361_spill] sm:$0xff] %v6521_v24  ;;  %v6546_v24 = vld [vmem:[%s8356_s13 + $0x190] sm:$0xf0] }
 0x176   :  { %8734 = vst [vmem:[#allocation362_spill] sm:$0xff] %v6526_v34  ;;  %v6551_v34 = vld [vmem:[%s8356_s13 + $0x18c] sm:$0xf0] }
 0x177   :  { %8735 = vst [vmem:[#allocation363_spill] sm:$0xff] %v6531_v20  ;;  %v6556_v20 = vld [vmem:[%s8356_s13 + $0x198] sm:$0xf0] }
 0x178   :  { %8736 = vst [vmem:[#allocation364_spill] sm:$0xff] %v6536_v22  ;;  %v6561_v22 = vld [vmem:[%s8356_s13 + $0x194] sm:$0xf0] }
 0x179   :  { %8737 = vst [vmem:[#allocation365_spill] sm:$0xff] %v6541_v8  ;;  %v6566_v8 = vld [vmem:[%s8356_s13 + $0x1a4] sm:$0xf] }
 0x17a   :  { %8738 = vst [vmem:[#allocation366_spill] sm:$0xff] %v6546_v24  ;;  %v6571_v24 = vld [vmem:[%s8356_s13 + $0x1a0] sm:$0xf] }
 0x17b   :  { %8739 = vst [vmem:[#allocation367_spill] sm:$0xff] %v6551_v34  ;;  %v6576_v34 = vld [vmem:[%s8356_s13 + $0x1ac] sm:$0xf] }
 0x17c   :  { %8740 = vst [vmem:[#allocation368_spill] sm:$0xff] %v6556_v20  ;;  %v6581_v20 = vld [vmem:[%s8356_s13 + $0x1a8] sm:$0xf] }
 0x17d   :  { %8741 = vst [vmem:[#allocation369_spill] sm:$0xff] %v6561_v22  ;;  %v6586_v22 = vld [vmem:[%s8356_s13 + $0x1b0] sm:$0xf0] }
 0x17e   :  { %8742 = vst [vmem:[#allocation370_spill] sm:$0xff] %v6566_v8  ;;  %v6591_v8 = vld [vmem:[%s8356_s13 + $0x1ac] sm:$0xf0] }
 0x17f   :  { %8743 = vst [vmem:[#allocation371_spill] sm:$0xff] %v6571_v24  ;;  %v6596_v24 = vld [vmem:[%s8356_s13 + $0x1b8] sm:$0xf0] }
 0x180   :  { %8744 = vst [vmem:[#allocation372_spill] sm:$0xff] %v6576_v34  ;;  %v6601_v34 = vld [vmem:[%s8356_s13 + $0x1b4] sm:$0xf0] }
 0x181   :  { %8745 = vst [vmem:[#allocation373_spill] sm:$0xff] %v6581_v20  ;;  %v6606_v20 = vld [vmem:[%s8356_s13 + $0x1c4] sm:$0xf] }
 0x182   :  { %8746 = vst [vmem:[#allocation374_spill] sm:$0xff] %v6586_v22  ;;  %v6611_v22 = vld [vmem:[%s8356_s13 + $0x1c0] sm:$0xf] }
 0x183   :  { %8747 = vst [vmem:[#allocation375_spill] sm:$0xff] %v6591_v8  ;;  %v6616_v8 = vld [vmem:[%s8356_s13 + $0x1cc] sm:$0xf] }
 0x184   :  { %8748 = vst [vmem:[#allocation376_spill] sm:$0xff] %v6596_v24  ;;  %v6621_v24 = vld [vmem:[%s8356_s13 + $0x1c8] sm:$0xf] }
 0x185   :  { %8749 = vst [vmem:[#allocation377_spill] sm:$0xff] %v6601_v34  ;;  %v6626_v34 = vld [vmem:[%s8356_s13 + $0x1d0] sm:$0xf0] }
 0x186   :  { %8750 = vst [vmem:[#allocation378_spill] sm:$0xff] %v6606_v20  ;;  %v6631_v20 = vld [vmem:[%s8356_s13 + $0x1cc] sm:$0xf0] }
 0x187   :  { %8751 = vst [vmem:[#allocation379_spill] sm:$0xff] %v6611_v22  ;;  %v6636_v22 = vld [vmem:[%s8356_s13 + $0x1d8] sm:$0xf0] }
 0x188   :  { %8752 = vst [vmem:[#allocation380_spill] sm:$0xff] %v6616_v8  ;;  %v6641_v8 = vld [vmem:[%s8356_s13 + $0x1d4] sm:$0xf0] }
 0x189   :  { %8753 = vst [vmem:[#allocation381_spill] sm:$0xff] %v6621_v24  ;;  %v6646_v24 = vld [vmem:[%s8356_s13 + $0x1e4] sm:$0xf] }
 0x18a   :  { %8754 = vst [vmem:[#allocation382_spill] sm:$0xff] %v6626_v34  ;;  %v6651_v34 = vld [vmem:[%s8356_s13 + $0x1e0] sm:$0xf] }
 0x18b   :  { %8755 = vst [vmem:[#allocation383_spill] sm:$0xff] %v6631_v20  ;;  %v6656_v20 = vld [vmem:[%s8356_s13 + $0x1ec] sm:$0xf] }
 0x18c   :  { %8756 = vst [vmem:[#allocation384_spill] sm:$0xff] %v6636_v22  ;;  %v6661_v22 = vld [vmem:[%s8356_s13 + $0x1e8] sm:$0xf] }
 0x18d   :  { %8757 = vst [vmem:[#allocation385_spill] sm:$0xff] %v6641_v8  ;;  %v6666_v8 = vld [vmem:[%s8356_s13 + $0x1f0] sm:$0xf0] }
 0x18e   :  { %8758 = vst [vmem:[#allocation386_spill] sm:$0xff] %v6646_v24  ;;  %v6671_v24 = vld [vmem:[%s8356_s13 + $0x1ec] sm:$0xf0] }
 0x18f   :  { %8759 = vst [vmem:[#allocation387_spill] sm:$0xff] %v6651_v34  ;;  %v6676_v34 = vld [vmem:[%s8356_s13 + $0x1f8] sm:$0xf0] }
 0x190   :  { %8760 = vst [vmem:[#allocation388_spill] sm:$0xff] %v6656_v20  ;;  %v6681_v20 = vld [vmem:[%s8356_s13 + $0x1f4] sm:$0xf0] }
 0x191   :  { %8761 = vst [vmem:[#allocation389_spill] sm:$0xff] %v6661_v22  ;;  %v6686_v22 = vld [vmem:[%s8357_s14] sm:$0xf] }
 0x192   :  { %8762 = vst [vmem:[#allocation390_spill] sm:$0xff] %v6666_v8  ;;  %v6691_v8 = vld [vmem:[%s8358_s15 + $0x4] sm:$0xf] }
 0x193   :  { %8763 = vst [vmem:[#allocation391_spill] sm:$0xff] %v6671_v24  ;;  %v6696_v24 = vld [vmem:[%s8358_s15] sm:$0xf] }
 0x194   :  { %8764 = vst [vmem:[#allocation392_spill] sm:$0xff] %v6676_v34  ;;  %v6701_v34 = vld [vmem:[%s8358_s15 + $0xc] sm:$0xf] }
 0x195   :  { %8765 = vst [vmem:[#allocation393_spill] sm:$0xff] %v6681_v20  ;;  %v6706_v20 = vld [vmem:[%s8358_s15 + $0x8] sm:$0xf] }
 0x196   :  { %8766 = vst [vmem:[#allocation394_spill] sm:$0xff] %v6686_v22  ;;  %v6711_v22 = vld [vmem:[%s8358_s15 + $0x10] sm:$0xf0] }
 0x197   :  { %8767 = vst [vmem:[#allocation395_spill] sm:$0xff] %v6691_v8  ;;  %v6716_v8 = vld [vmem:[%s8358_s15 + $0xc] sm:$0xf0] }
 0x198   :  { %8768 = vst [vmem:[#allocation396_spill] sm:$0xff] %v6696_v24  ;;  %v6721_v24 = vld [vmem:[%s8358_s15 + $0x18] sm:$0xf0] }
 0x199   :  { %8769 = vst [vmem:[#allocation397_spill] sm:$0xff] %v6701_v34  ;;  %v6726_v34 = vld [vmem:[%s8358_s15 + $0x14] sm:$0xf0] }
 0x19a   :  { %8770 = vst [vmem:[#allocation398_spill] sm:$0xff] %v6706_v20  ;;  %v6731_v20 = vld [vmem:[%s8358_s15 + $0x24] sm:$0xf] }
 0x19b   :  { %8771 = vst [vmem:[#allocation399_spill] sm:$0xff] %v6711_v22  ;;  %v6736_v22 = vld [vmem:[%s8358_s15 + $0x20] sm:$0xf] }
 0x19c   :  { %8772 = vst [vmem:[#allocation400_spill] sm:$0xff] %v6716_v8  ;;  %v6741_v8 = vld [vmem:[%s8358_s15 + $0x2c] sm:$0xf] }
 0x19d   :  { %8773 = vst [vmem:[#allocation401_spill] sm:$0xff] %v6721_v24  ;;  %v6746_v24 = vld [vmem:[%s8358_s15 + $0x28] sm:$0xf] }
 0x19e   :  { %8774 = vst [vmem:[#allocation402_spill] sm:$0xff] %v6726_v34  ;;  %v6751_v34 = vld [vmem:[%s8358_s15 + $0x30] sm:$0xf0] }
 0x19f   :  { %8775 = vst [vmem:[#allocation403_spill] sm:$0xff] %v6731_v20  ;;  %v6756_v20 = vld [vmem:[%s8358_s15 + $0x2c] sm:$0xf0] }
 0x1a0   :  { %8776 = vst [vmem:[#allocation404_spill] sm:$0xff] %v6736_v22  ;;  %v6761_v22 = vld [vmem:[%s8358_s15 + $0x38] sm:$0xf0] }
 0x1a1   :  { %8777 = vst [vmem:[#allocation405_spill] sm:$0xff] %v6741_v8  ;;  %v6766_v8 = vld [vmem:[%s8358_s15 + $0x34] sm:$0xf0] }
 0x1a2   :  { %8778 = vst [vmem:[#allocation406_spill] sm:$0xff] %v6746_v24  ;;  %v6771_v24 = vld [vmem:[%s8358_s15 + $0x44] sm:$0xf] }
 0x1a3   :  { %8779 = vst [vmem:[#allocation407_spill] sm:$0xff] %v6751_v34  ;;  %v6776_v34 = vld [vmem:[%s8358_s15 + $0x40] sm:$0xf] }
 0x1a4   :  { %8780 = vst [vmem:[#allocation408_spill] sm:$0xff] %v6756_v20  ;;  %v6781_v20 = vld [vmem:[%s8358_s15 + $0x4c] sm:$0xf] }
 0x1a5   :  { %8781 = vst [vmem:[#allocation409_spill] sm:$0xff] %v6761_v22  ;;  %v6786_v22 = vld [vmem:[%s8358_s15 + $0x48] sm:$0xf] }
 0x1a6   :  { %8782 = vst [vmem:[#allocation410_spill] sm:$0xff] %v6766_v8  ;;  %v6791_v8 = vld [vmem:[%s8358_s15 + $0x50] sm:$0xf0] }
 0x1a7   :  { %8783 = vst [vmem:[#allocation411_spill] sm:$0xff] %v6771_v24  ;;  %v6796_v24 = vld [vmem:[%s8358_s15 + $0x4c] sm:$0xf0] }
 0x1a8   :  { %8784 = vst [vmem:[#allocation412_spill] sm:$0xff] %v6776_v34  ;;  %v6801_v34 = vld [vmem:[%s8358_s15 + $0x58] sm:$0xf0] }
 0x1a9   :  { %8785 = vst [vmem:[#allocation413_spill] sm:$0xff] %v6781_v20  ;;  %v6806_v20 = vld [vmem:[%s8358_s15 + $0x54] sm:$0xf0] }
 0x1aa   :  { %8786 = vst [vmem:[#allocation414_spill] sm:$0xff] %v6786_v22  ;;  %v6811_v22 = vld [vmem:[%s8358_s15 + $0x64] sm:$0xf] }
 0x1ab   :  { %8787 = vst [vmem:[#allocation415_spill] sm:$0xff] %v6791_v8  ;;  %v6816_v8 = vld [vmem:[%s8358_s15 + $0x60] sm:$0xf] }
 0x1ac   :  { %8788 = vst [vmem:[#allocation416_spill] sm:$0xff] %v6796_v24  ;;  %v6821_v24 = vld [vmem:[%s8358_s15 + $0x6c] sm:$0xf] }
 0x1ad   :  { %8789 = vst [vmem:[#allocation417_spill] sm:$0xff] %v6801_v34  ;;  %v6826_v34 = vld [vmem:[%s8358_s15 + $0x68] sm:$0xf] }
 0x1ae   :  { %8790 = vst [vmem:[#allocation418_spill] sm:$0xff] %v6806_v20  ;;  %v6831_v20 = vld [vmem:[%s8358_s15 + $0x70] sm:$0xf0] }
 0x1af   :  { %8791 = vst [vmem:[#allocation419_spill] sm:$0xff] %v6811_v22  ;;  %v6836_v22 = vld [vmem:[%s8358_s15 + $0x6c] sm:$0xf0] }
 0x1b0   :  { %8792 = vst [vmem:[#allocation420_spill] sm:$0xff] %v6816_v8  ;;  %v6841_v8 = vld [vmem:[%s8358_s15 + $0x78] sm:$0xf0] }
 0x1b1   :  { %8793 = vst [vmem:[#allocation421_spill] sm:$0xff] %v6821_v24  ;;  %v6846_v24 = vld [vmem:[%s8358_s15 + $0x74] sm:$0xf0] }
 0x1b2   :  { %8794 = vst [vmem:[#allocation422_spill] sm:$0xff] %v6826_v34  ;;  %v6851_v34 = vld [vmem:[%s8358_s15 + $0x84] sm:$0xf] }
 0x1b3   :  { %8795 = vst [vmem:[#allocation423_spill] sm:$0xff] %v6831_v20  ;;  %v6856_v20 = vld [vmem:[%s8358_s15 + $0x80] sm:$0xf] }
 0x1b4   :  { %8796 = vst [vmem:[#allocation424_spill] sm:$0xff] %v6836_v22  ;;  %v6861_v22 = vld [vmem:[%s8358_s15 + $0x8c] sm:$0xf] }
 0x1b5   :  { %8797 = vst [vmem:[#allocation425_spill] sm:$0xff] %v6841_v8  ;;  %v6866_v8 = vld [vmem:[%s8358_s15 + $0x88] sm:$0xf] }
 0x1b6   :  { %8798 = vst [vmem:[#allocation426_spill] sm:$0xff] %v6846_v24  ;;  %v6871_v24 = vld [vmem:[%s8358_s15 + $0x90] sm:$0xf0] }
 0x1b7   :  { %8799 = vst [vmem:[#allocation427_spill] sm:$0xff] %v6851_v34  ;;  %v6876_v34 = vld [vmem:[%s8358_s15 + $0x8c] sm:$0xf0] }
 0x1b8   :  { %8800 = vst [vmem:[#allocation428_spill] sm:$0xff] %v6856_v20  ;;  %v6881_v20 = vld [vmem:[%s8358_s15 + $0x98] sm:$0xf0] }
 0x1b9   :  { %8801 = vst [vmem:[#allocation429_spill] sm:$0xff] %v6861_v22  ;;  %v6886_v22 = vld [vmem:[%s8358_s15 + $0x94] sm:$0xf0] }
 0x1ba   :  { %8802 = vst [vmem:[#allocation430_spill] sm:$0xff] %v6866_v8  ;;  %v6891_v8 = vld [vmem:[%s8358_s15 + $0xa4] sm:$0xf] }
 0x1bb   :  { %8803 = vst [vmem:[#allocation431_spill] sm:$0xff] %v6871_v24  ;;  %v6896_v24 = vld [vmem:[%s8358_s15 + $0xa0] sm:$0xf] }
 0x1bc   :  { %8804 = vst [vmem:[#allocation432_spill] sm:$0xff] %v6876_v34  ;;  %v6901_v34 = vld [vmem:[%s8358_s15 + $0xac] sm:$0xf] }
 0x1bd   :  { %8805 = vst [vmem:[#allocation433_spill] sm:$0xff] %v6881_v20  ;;  %v6906_v20 = vld [vmem:[%s8358_s15 + $0xa8] sm:$0xf] }
 0x1be   :  { %8806 = vst [vmem:[#allocation434_spill] sm:$0xff] %v6886_v22  ;;  %v6911_v22 = vld [vmem:[%s8358_s15 + $0xb0] sm:$0xf0] }
 0x1bf   :  { %8807 = vst [vmem:[#allocation435_spill] sm:$0xff] %v6891_v8  ;;  %v6916_v8 = vld [vmem:[%s8358_s15 + $0xac] sm:$0xf0] }
 0x1c0   :  { %8808 = vst [vmem:[#allocation436_spill] sm:$0xff] %v6896_v24  ;;  %v6921_v24 = vld [vmem:[%s8358_s15 + $0xb8] sm:$0xf0] }
 0x1c1   :  { %8809 = vst [vmem:[#allocation437_spill] sm:$0xff] %v6901_v34  ;;  %v6926_v34 = vld [vmem:[%s8358_s15 + $0xb4] sm:$0xf0] }
 0x1c2   :  { %8810 = vst [vmem:[#allocation438_spill] sm:$0xff] %v6906_v20  ;;  %v6931_v20 = vld [vmem:[%s8358_s15 + $0xc4] sm:$0xf] }
 0x1c3   :  { %8811 = vst [vmem:[#allocation439_spill] sm:$0xff] %v6911_v22  ;;  %v6936_v22 = vld [vmem:[%s8358_s15 + $0xc0] sm:$0xf] }
 0x1c4   :  { %8812 = vst [vmem:[#allocation440_spill] sm:$0xff] %v6916_v8  ;;  %v6941_v8 = vld [vmem:[%s8358_s15 + $0xcc] sm:$0xf] }
 0x1c5   :  { %8813 = vst [vmem:[#allocation441_spill] sm:$0xff] %v6921_v24  ;;  %v6946_v24 = vld [vmem:[%s8358_s15 + $0xc8] sm:$0xf] }
 0x1c6   :  { %8814 = vst [vmem:[#allocation442_spill] sm:$0xff] %v6926_v34  ;;  %v6951_v34 = vld [vmem:[%s8358_s15 + $0xd0] sm:$0xf0] }
 0x1c7   :  { %8815 = vst [vmem:[#allocation443_spill] sm:$0xff] %v6931_v20  ;;  %v6956_v20 = vld [vmem:[%s8358_s15 + $0xcc] sm:$0xf0] }
 0x1c8   :  { %8816 = vst [vmem:[#allocation444_spill] sm:$0xff] %v6936_v22  ;;  %v6961_v22 = vld [vmem:[%s8358_s15 + $0xd8] sm:$0xf0] }
 0x1c9   :  { %8817 = vst [vmem:[#allocation445_spill] sm:$0xff] %v6941_v8  ;;  %v6966_v8 = vld [vmem:[%s8358_s15 + $0xd4] sm:$0xf0] }
 0x1ca   :  { %8818 = vst [vmem:[#allocation446_spill] sm:$0xff] %v6946_v24  ;;  %v6971_v24 = vld [vmem:[%s8358_s15 + $0xe4] sm:$0xf] }
 0x1cb   :  { %8819 = vst [vmem:[#allocation447_spill] sm:$0xff] %v6951_v34  ;;  %v6976_v34 = vld [vmem:[%s8358_s15 + $0xe0] sm:$0xf] }
 0x1cc   :  { %8820 = vst [vmem:[#allocation448_spill] sm:$0xff] %v6956_v20  ;;  %v6981_v20 = vld [vmem:[%s8358_s15 + $0xec] sm:$0xf] }
 0x1cd   :  { %8821 = vst [vmem:[#allocation449_spill] sm:$0xff] %v6961_v22  ;;  %v6986_v22 = vld [vmem:[%s8358_s15 + $0xe8] sm:$0xf] }
 0x1ce   :  { %8822 = vst [vmem:[#allocation450_spill] sm:$0xff] %v6966_v8  ;;  %v6991_v8 = vld [vmem:[%s8358_s15 + $0xf0] sm:$0xf0] }
 0x1cf   :  { %8823 = vst [vmem:[#allocation451_spill] sm:$0xff] %v6971_v24  ;;  %v6996_v24 = vld [vmem:[%s8358_s15 + $0xec] sm:$0xf0] }
 0x1d0   :  { %8824 = vst [vmem:[#allocation452_spill] sm:$0xff] %v6976_v34  ;;  %v7001_v34 = vld [vmem:[%s8358_s15 + $0xf8] sm:$0xf0] }
 0x1d1   :  { %8825 = vst [vmem:[#allocation453_spill] sm:$0xff] %v6981_v20  ;;  %v7006_v20 = vld [vmem:[%s8358_s15 + $0xf4] sm:$0xf0] }
 0x1d2   :  { %8826 = vst [vmem:[#allocation454_spill] sm:$0xff] %v6986_v22  ;;  %v7011_v22 = vld [vmem:[%s8358_s15 + $0x104] sm:$0xf] }
 0x1d3   :  { %8827 = vst [vmem:[#allocation455_spill] sm:$0xff] %v6991_v8  ;;  %v7016_v8 = vld [vmem:[%s8358_s15 + $0x100] sm:$0xf] }
 0x1d4   :  { %8828 = vst [vmem:[#allocation456_spill] sm:$0xff] %v6996_v24  ;;  %v7021_v24 = vld [vmem:[%s8358_s15 + $0x10c] sm:$0xf] }
 0x1d5   :  { %8829 = vst [vmem:[#allocation457_spill] sm:$0xff] %v7001_v34  ;;  %v7026_v34 = vld [vmem:[%s8358_s15 + $0x108] sm:$0xf] }
 0x1d6   :  { %8830 = vst [vmem:[#allocation458_spill] sm:$0xff] %v7006_v20  ;;  %v7031_v20 = vld [vmem:[%s8358_s15 + $0x110] sm:$0xf0] }
 0x1d7   :  { %8831 = vst [vmem:[#allocation459_spill] sm:$0xff] %v7011_v22  ;;  %v7036_v22 = vld [vmem:[%s8358_s15 + $0x10c] sm:$0xf0] }
 0x1d8   :  { %8832 = vst [vmem:[#allocation460_spill] sm:$0xff] %v7016_v8  ;;  %v7041_v8 = vld [vmem:[%s8358_s15 + $0x118] sm:$0xf0] }
 0x1d9   :  { %8833 = vst [vmem:[#allocation461_spill] sm:$0xff] %v7021_v24  ;;  %v7046_v24 = vld [vmem:[%s8358_s15 + $0x114] sm:$0xf0] }
 0x1da   :  { %8834 = vst [vmem:[#allocation462_spill] sm:$0xff] %v7026_v34  ;;  %v7051_v34 = vld [vmem:[%s8358_s15 + $0x124] sm:$0xf] }
 0x1db   :  { %8835 = vst [vmem:[#allocation463_spill] sm:$0xff] %v7031_v20  ;;  %v7056_v20 = vld [vmem:[%s8358_s15 + $0x120] sm:$0xf] }
 0x1dc   :  { %8836 = vst [vmem:[#allocation464_spill] sm:$0xff] %v7036_v22  ;;  %v7061_v22 = vld [vmem:[%s8358_s15 + $0x12c] sm:$0xf] }
 0x1dd   :  { %8837 = vst [vmem:[#allocation465_spill] sm:$0xff] %v7041_v8  ;;  %v7066_v8 = vld [vmem:[%s8358_s15 + $0x128] sm:$0xf] }
 0x1de   :  { %8838 = vst [vmem:[#allocation466_spill] sm:$0xff] %v7046_v24  ;;  %v7071_v24 = vld [vmem:[%s8358_s15 + $0x130] sm:$0xf0] }
 0x1df   :  { %8839 = vst [vmem:[#allocation467_spill] sm:$0xff] %v7051_v34  ;;  %v7076_v34 = vld [vmem:[%s8358_s15 + $0x12c] sm:$0xf0] }
 0x1e0   :  { %8840 = vst [vmem:[#allocation468_spill] sm:$0xff] %v7056_v20  ;;  %v7081_v20 = vld [vmem:[%s8358_s15 + $0x138] sm:$0xf0] }
 0x1e1   :  { %8841 = vst [vmem:[#allocation469_spill] sm:$0xff] %v7061_v22  ;;  %v7086_v22 = vld [vmem:[%s8358_s15 + $0x134] sm:$0xf0] }
 0x1e2   :  { %8842 = vst [vmem:[#allocation470_spill] sm:$0xff] %v7066_v8  ;;  %v7091_v8 = vld [vmem:[%s8358_s15 + $0x144] sm:$0xf] }
 0x1e3   :  { %8843 = vst [vmem:[#allocation471_spill] sm:$0xff] %v7071_v24  ;;  %v7096_v24 = vld [vmem:[%s8358_s15 + $0x140] sm:$0xf] }
 0x1e4   :  { %8844 = vst [vmem:[#allocation472_spill] sm:$0xff] %v7076_v34  ;;  %v7101_v34 = vld [vmem:[%s8358_s15 + $0x14c] sm:$0xf] }
 0x1e5   :  { %8845 = vst [vmem:[#allocation473_spill] sm:$0xff] %v7081_v20  ;;  %v7106_v20 = vld [vmem:[%s8358_s15 + $0x148] sm:$0xf] }
 0x1e6   :  { %8846 = vst [vmem:[#allocation474_spill] sm:$0xff] %v7086_v22  ;;  %v7111_v22 = vld [vmem:[%s8358_s15 + $0x150] sm:$0xf0] }
 0x1e7   :  { %8847 = vst [vmem:[#allocation475_spill] sm:$0xff] %v7091_v8  ;;  %v7116_v8 = vld [vmem:[%s8358_s15 + $0x14c] sm:$0xf0] }
 0x1e8   :  { %8848 = vst [vmem:[#allocation476_spill] sm:$0xff] %v7096_v24  ;;  %v7121_v24 = vld [vmem:[%s8358_s15 + $0x158] sm:$0xf0] }
 0x1e9   :  { %8849 = vst [vmem:[#allocation477_spill] sm:$0xff] %v7101_v34  ;;  %v7126_v34 = vld [vmem:[%s8358_s15 + $0x154] sm:$0xf0] }
 0x1ea   :  { %8850 = vst [vmem:[#allocation478_spill] sm:$0xff] %v7106_v20  ;;  %v7131_v20 = vld [vmem:[%s8358_s15 + $0x164] sm:$0xf] }
 0x1eb   :  { %8851 = vst [vmem:[#allocation479_spill] sm:$0xff] %v7111_v22  ;;  %v7136_v22 = vld [vmem:[%s8358_s15 + $0x160] sm:$0xf] }
 0x1ec   :  { %8852 = vst [vmem:[#allocation480_spill] sm:$0xff] %v7116_v8  ;;  %v7141_v8 = vld [vmem:[%s8358_s15 + $0x16c] sm:$0xf] }
 0x1ed   :  { %8853 = vst [vmem:[#allocation481_spill] sm:$0xff] %v7121_v24  ;;  %v7146_v24 = vld [vmem:[%s8358_s15 + $0x168] sm:$0xf] }
 0x1ee   :  { %8854 = vst [vmem:[#allocation482_spill] sm:$0xff] %v7126_v34  ;;  %v7151_v34 = vld [vmem:[%s8358_s15 + $0x170] sm:$0xf0] }
 0x1ef   :  { %8855 = vst [vmem:[#allocation483_spill] sm:$0xff] %v7131_v20  ;;  %v7156_v20 = vld [vmem:[%s8358_s15 + $0x16c] sm:$0xf0] }
 0x1f0   :  { %8856 = vst [vmem:[#allocation484_spill] sm:$0xff] %v7136_v22  ;;  %v7161_v22 = vld [vmem:[%s8358_s15 + $0x178] sm:$0xf0] }
 0x1f1   :  { %8857 = vst [vmem:[#allocation485_spill] sm:$0xff] %v7141_v8  ;;  %v7166_v8 = vld [vmem:[%s8358_s15 + $0x174] sm:$0xf0] }
 0x1f2   :  { %8858 = vst [vmem:[#allocation486_spill] sm:$0xff] %v7146_v24  ;;  %v7171_v24 = vld [vmem:[%s8358_s15 + $0x184] sm:$0xf] }
 0x1f3   :  { %8859 = vst [vmem:[#allocation487_spill] sm:$0xff] %v7151_v34  ;;  %v7176_v34 = vld [vmem:[%s8358_s15 + $0x180] sm:$0xf] }
 0x1f4   :  { %8860 = vst [vmem:[#allocation488_spill] sm:$0xff] %v7156_v20  ;;  %v7181_v20 = vld [vmem:[%s8358_s15 + $0x18c] sm:$0xf] }
 0x1f5   :  { %8861 = vst [vmem:[#allocation489_spill] sm:$0xff] %v7161_v22  ;;  %v7186_v22 = vld [vmem:[%s8358_s15 + $0x188] sm:$0xf] }
 0x1f6   :  { %8862 = vst [vmem:[#allocation490_spill] sm:$0xff] %v7166_v8  ;;  %v7191_v8 = vld [vmem:[%s8358_s15 + $0x190] sm:$0xf0] }
 0x1f7   :  { %8863 = vst [vmem:[#allocation491_spill] sm:$0xff] %v7171_v24  ;;  %v7196_v24 = vld [vmem:[%s8358_s15 + $0x18c] sm:$0xf0] }
 0x1f8   :  { %8864 = vst [vmem:[#allocation492_spill] sm:$0xff] %v7176_v34  ;;  %v7201_v34 = vld [vmem:[%s8358_s15 + $0x198] sm:$0xf0] }
 0x1f9   :  { %8865 = vst [vmem:[#allocation493_spill] sm:$0xff] %v7181_v20  ;;  %v7206_v20 = vld [vmem:[%s8358_s15 + $0x194] sm:$0xf0] }
 0x1fa   :  { %8866 = vst [vmem:[#allocation494_spill] sm:$0xff] %v7186_v22  ;;  %v7211_v22 = vld [vmem:[%s8358_s15 + $0x1a4] sm:$0xf] }
 0x1fb   :  { %8867 = vst [vmem:[#allocation495_spill] sm:$0xff] %v7191_v8  ;;  %v7216_v8 = vld [vmem:[%s8358_s15 + $0x1a0] sm:$0xf] }
 0x1fc   :  { %8868 = vst [vmem:[#allocation496_spill] sm:$0xff] %v7196_v24  ;;  %v7221_v24 = vld [vmem:[%s8358_s15 + $0x1ac] sm:$0xf] }
 0x1fd   :  { %8869 = vst [vmem:[#allocation497_spill] sm:$0xff] %v7201_v34  ;;  %v7226_v34 = vld [vmem:[%s8358_s15 + $0x1a8] sm:$0xf] }
 0x1fe   :  { %8870 = vst [vmem:[#allocation498_spill] sm:$0xff] %v7206_v20  ;;  %v7231_v20 = vld [vmem:[%s8358_s15 + $0x1b0] sm:$0xf0] }
 0x1ff   :  { %8871 = vst [vmem:[#allocation499_spill] sm:$0xff] %v7211_v22  ;;  %v7236_v22 = vld [vmem:[%s8358_s15 + $0x1ac] sm:$0xf0] }
 0x200   :  { %8872 = vst [vmem:[#allocation500_spill] sm:$0xff] %v7216_v8  ;;  %v7241_v8 = vld [vmem:[%s8358_s15 + $0x1b8] sm:$0xf0] }
 0x201   :  { %8873 = vst [vmem:[#allocation501_spill] sm:$0xff] %v7221_v24  ;;  %v7246_v24 = vld [vmem:[%s8358_s15 + $0x1b4] sm:$0xf0] }
 0x202   :  { %8874 = vst [vmem:[#allocation502_spill] sm:$0xff] %v7226_v34  ;;  %v7251_v34 = vld [vmem:[%s8358_s15 + $0x1c4] sm:$0xf] }
 0x203   :  { %8875 = vst [vmem:[#allocation503_spill] sm:$0xff] %v7231_v20  ;;  %v7256_v20 = vld [vmem:[%s8358_s15 + $0x1c0] sm:$0xf] }
 0x204   :  { %8876 = vst [vmem:[#allocation504_spill] sm:$0xff] %v7236_v22  ;;  %v7261_v22 = vld [vmem:[%s8358_s15 + $0x1cc] sm:$0xf] }
 0x205   :  { %8877 = vst [vmem:[#allocation505_spill] sm:$0xff] %v7241_v8  ;;  %v7266_v8 = vld [vmem:[%s8358_s15 + $0x1c8] sm:$0xf] }
 0x206   :  { %8878 = vst [vmem:[#allocation506_spill] sm:$0xff] %v7246_v24  ;;  %v7271_v24 = vld [vmem:[%s8358_s15 + $0x1d0] sm:$0xf0] }
 0x207   :  { %8879 = vst [vmem:[#allocation507_spill] sm:$0xff] %v7251_v34  ;;  %v7276_v34 = vld [vmem:[%s8358_s15 + $0x1cc] sm:$0xf0] }
 0x208   :  { %8880 = vst [vmem:[#allocation508_spill] sm:$0xff] %v7256_v20  ;;  %v7281_v20 = vld [vmem:[%s8358_s15 + $0x1d8] sm:$0xf0] }
 0x209   :  { %8881 = vst [vmem:[#allocation509_spill] sm:$0xff] %v7261_v22  ;;  %v7286_v22 = vld [vmem:[%s8358_s15 + $0x1d4] sm:$0xf0] }
 0x20a   :  { %8882 = vst [vmem:[#allocation510_spill] sm:$0xff] %v7266_v8  ;;  %v7291_v8 = vld [vmem:[%s8358_s15 + $0x1e4] sm:$0xf] }
 0x20b   :  { %8883 = vst [vmem:[#allocation511_spill] sm:$0xff] %v7271_v24  ;;  %v7296_v24 = vld [vmem:[%s8358_s15 + $0x1e0] sm:$0xf] }
 0x20c   :  { %8884 = vst [vmem:[#allocation512_spill] sm:$0xff] %v7276_v34  ;;  %v7301_v34 = vld [vmem:[%s8358_s15 + $0x1ec] sm:$0xf] }
 0x20d   :  { %8885 = vst [vmem:[#allocation513_spill] sm:$0xff] %v7281_v20  ;;  %v7306_v20 = vld [vmem:[%s8358_s15 + $0x1e8] sm:$0xf] }
 0x20e   :  { %8886 = vst [vmem:[#allocation514_spill] sm:$0xff] %v7286_v22  ;;  %v7311_v22 = vld [vmem:[%s8358_s15 + $0x1f0] sm:$0xf0] }
 0x20f   :  { %8887 = vst [vmem:[#allocation515_spill] sm:$0xff] %v7291_v8  ;;  %v7316_v8 = vld [vmem:[%s8358_s15 + $0x1ec] sm:$0xf0] }
 0x210   :  { %8888 = vst [vmem:[#allocation516_spill] sm:$0xff] %v7296_v24  ;;  %v7321_v24 = vld [vmem:[%s8358_s15 + $0x1f8] sm:$0xf0] }
 0x211   :  { %8889 = vst [vmem:[#allocation517_spill] sm:$0xff] %v7301_v34  ;;  %v7326_v34 = vld [vmem:[%s8358_s15 + $0x1f4] sm:$0xf0] }
 0x212   :  { %8890 = vst [vmem:[#allocation518_spill] sm:$0xff] %v7306_v20  ;;  %v7331_v20 = vld [vmem:[%s8359_s16] sm:$0xf] }
 0x213   :  { %8891 = vst [vmem:[#allocation519_spill] sm:$0xff] %v7311_v22  ;;  %v7336_v22 = vld [vmem:[%s8360_s17] sm:$0xf] }
 0x214   :  { %8892 = vst [vmem:[#allocation520_spill] sm:$0xff] %v7316_v8  ;;  %v7341_v8 = vld [vmem:[%s8360_s17] sm:$0xf0] }
 0x215   :  { %8893 = vst [vmem:[#allocation521_spill] sm:$0xff] %v7321_v24  ;;  %v7346_v24 = vld [vmem:[%s8360_s17 + $0x8] sm:$0xf] }
 0x216   :  { %8894 = vst [vmem:[#allocation522_spill] sm:$0xff] %v7326_v34  ;;  %v7351_v34 = vld [vmem:[%s8360_s17 + $0x8] sm:$0xf0] }
 0x217   :  { %8895 = vst [vmem:[#allocation523_spill] sm:$0xff] %v7331_v20  ;;  %v7356_v20 = vld [vmem:[%s8360_s17 + $0x10] sm:$0xf] }
 0x218   :  { %8896 = vst [vmem:[#allocation524_spill] sm:$0xff] %v7336_v22  ;;  %v7361_v22 = vld [vmem:[%s8360_s17 + $0x10] sm:$0xf0] }
 0x219   :  { %8897 = vst [vmem:[#allocation525_spill] sm:$0xff] %v7341_v8  ;;  %v7386_v8 = vld [vmem:[%s8360_s17 + $0x28] sm:$0xf] }
 0x21a   :  { %8898 = vst [vmem:[#allocation526_spill] sm:$0xff] %v7346_v24  ;;  %v7366_v24 = vld [vmem:[%s8360_s17 + $0x18] sm:$0xf] }
 0x21b   :  { %8899 = vst [vmem:[#allocation527_spill] sm:$0xff] %v7351_v34  ;;  %v7371_v34 = vld [vmem:[%s8360_s17 + $0x18] sm:$0xf0] }
 0x21c   :  { %8900 = vst [vmem:[#allocation528_spill] sm:$0xff] %v7356_v20  ;;  %v7376_v20 = vld [vmem:[%s8360_s17 + $0x20] sm:$0xf] }
 0x21d   :  { %8901 = vst [vmem:[#allocation529_spill] sm:$0xff] %v7361_v22  ;;  %v7381_v22 = vld [vmem:[%s8360_s17 + $0x20] sm:$0xf0] }
 0x21e   :  { %8902 = vst [vmem:[#allocation530_spill] sm:$0xff] %v7366_v24  ;;  %v7391_v24 = vld [vmem:[%s8360_s17 + $0x28] sm:$0xf0] }
 0x21f   :  { %8903 = vst [vmem:[#allocation531_spill] sm:$0xff] %v7371_v34  ;;  %v7396_v34 = vld [vmem:[%s8360_s17 + $0x30] sm:$0xf] }
 0x220   :  { %8904 = vst [vmem:[#allocation532_spill] sm:$0xff] %v7376_v20  ;;  %v7401_v20 = vld [vmem:[%s8360_s17 + $0x30] sm:$0xf0] }
 0x221   :  { %8905 = vst [vmem:[#allocation533_spill] sm:$0xff] %v7381_v22  ;;  %v7406_v22 = vld [vmem:[%s8360_s17 + $0x38] sm:$0xf] }
 0x222   :  { %8906 = vst [vmem:[#allocation534_spill] sm:$0xff] %v7386_v8  ;;  %v7411_v8 = vld [vmem:[%s8360_s17 + $0x38] sm:$0xf0]  ;;  %s7435_s17 = smov 0  }
 0x223   :  { %8907 = vst [vmem:[#allocation535_spill] sm:$0xff] %v7391_v24  ;;  %v7416_v24 = vld [vmem:[%s8361_s18] sm:$0x1] }
 0x224   :  { %8908 = vst [vmem:[#allocation536_spill] sm:$0xff] %v7396_v34  ;;  %v8913_v34 = vlaneseq }
 0x225   :  { %8909 = vst [vmem:[#allocation537_spill] sm:$0xff] %v7401_v20  ;;  %v7423_v20 = vmov 0.0  }
 0x226   :  { %8910 = vst [vmem:[#allocation538_spill] sm:$0xff] %v7406_v22  ;;  %v7419_v26 = vshrl.u32 %v8913_v34, 7  ;;  %v7427_v22 = vmov 0.0  }
 0x227   :  { %8911 = vst [vmem:[#allocation539_spill] sm:$0xff] %v7411_v8  ;;  %v7433_v8 = vmov 0.0  }
 0x228   :  { %8912 = vst [vmem:[#allocation540_spill] sm:$0xff] %v7416_v24 }
 0x229   :  { %8914 = vst [vmem:[#allocation541_spill] sm:$0xff] %v7419_v26 }
 0x22a LB: > { %8915 = vst [vmem:[#allocation542_spill] sm:$0xff] %v4501_v25  ;;  %v8918_v14 = vld [vmem:[#allocation75_spill] sm:$0xff]  ;;  %v8920_v12 = vld [vmem:[#allocation128_spill] sm:$0xff]  ;;  %v8922_v10 = vld [vmem:[#allocation78_spill] sm:$0xff]  ;;  %s4279_s18 = sshll.u32 %s4529_s17, 5  ;;  %s9029_s6 = sld [smem:[#allocation549_spill]]  ;;  %s4529_s17 = sphi %s7435_s17, %s400_s17   ;;  %v4525_v8 = vphi %v7433_v8, %v9466_v8   ;;  %v4521_v27 = vphi %v7431_v27, %v7760_v27   ;;  %v4517_v23 = vphi %v7429_v23, %v8287_v23   ;;  %v4513_v22 = vphi %v7427_v22, %v8273_v22   ;;  %v4509_v21 = vphi %v7425_v21, %v2778_v21   ;;  %v4505_v20 = vphi %v7423_v20, %v8309_v20   ;;  %v4501_v25 = vphi %v7421_v25, %v9465_v25  }
 0x22b   : > { %8916 = vst [vmem:[#allocation543_spill] sm:$0xff] %v4505_v20  ;;  %v8919_v11 = vld [vmem:[#allocation79_spill] sm:$0xff]  ;;  %v8921_v30 = vld [vmem:[#allocation132_spill] sm:$0xff]  ;;  %v8923_v13 = vld [vmem:[#allocation74_spill] sm:$0xff]  ;;  %s7791_s24 = sshll.u32 %s4529_s17, 3  ;;  %s9142_s25 = sld [smem:[#allocation550_spill]] }
 0x22c   : > { %8917 = vst [vmem:[#allocation544_spill] sm:$0xff] %v4513_v22  ;;  %v3063_v34 = vor.u32 %v8919_v11, %v8918_v14  ;;  %v3191_v25 = vor.u32 %v8921_v30, %v8920_v12  ;;  %v3067_v26 = vor.u32 %v8923_v13, %v8922_v10  ;;  %v8924_v16 = vld [vmem:[#allocation131_spill] sm:$0xff]  ;;  %v8928_v2 = vld [vmem:[#allocation120_spill] sm:$0xff]  ;;  %v8930_v19 = vld [vmem:[#allocation70_spill] sm:$0xff]  ;;  %s2882_s3 = scalar_lea.vmem %s8363_s20, %s7791_s24  ;;  %s2880_s11 = scalar_lea.vmem %s8362_s19, %s7791_s24 }
 0x22d   : > { %v8925_v17 = vld [vmem:[#allocation127_spill] sm:$0xff]  ;;  %v8929_v9 = vld [vmem:[#allocation124_spill] sm:$0xff]  ;;  %v8931_v5 = vld [vmem:[#allocation66_spill] sm:$0xff]  ;;  %s408_s4 = sld [smem:[#allocation2 + %s4529_s17]]  ;;  %p2855_p0 = scmp.gt.s32.totalorder %s4529_s17, 0 }
 0x22e   : > { %v3195_v24 = vor.u32 %v8925_v17, %v8924_v16  ;;  %746 = vmatpush.bf16.msra.mxu0 %v3063_v34  ;;  %759 = vmatpush.bf16.msra.mxu1 %v3191_v25  ;;  %v8926_v3 = vld [vmem:[#allocation67_spill] sm:$0xff]  ;;  %v3175_v22 = vor.u32 %v8929_v9, %v8928_v2  ;;  %v3051_v11 = vor.u32 %v8931_v5, %v8930_v19  ;;  %v8935_v15 = vld [vmem:[#allocation116_spill] sm:$0xff]  ;;  %v8936_v6 = vld [vmem:[#allocation62_spill] sm:$0xff]  ;;  %s400_s17 = sadd.s32 1, %s4529_s17  }
 0x22f   : > { %v8927_v18 = vld [vmem:[#allocation71_spill] sm:$0xff]  ;;  %772 = vmatpush.bf16.msra.mxu2 %v3067_v26  ;;  %v3159_v25 = vor.u32 %v8935_v15, %v5276_v63  ;;  %v3035_v26 = vor.u32 %v4951_v60, %v8936_v6  ;;  %v8938_v37 = vld [vmem:[#allocation45_spill] sm:$0xff]  ;;  %v8941_v40 = vld [vmem:[#allocation48_spill] sm:$0xff]  ;;  %s2856_s30 = scalar_select %p2855_p0, 1, 0 }
 0x230   : > { %v3047_v20 = vor.u32 %v8927_v18, %v8926_v3  ;;  %785 = vmatpush.bf16.msra.mxu3 %v3195_v24  ;;  %v8932_v1 = vld [vmem:[#allocation123_spill] sm:$0xff]  ;;  %v3163_v24 = vor.u32 %v5271_v59, %v5291_v62  ;;  %v8939_v41 = vld [vmem:[#allocation49_spill] sm:$0xff]  ;;  %v8942_v36 = vld [vmem:[#allocation44_spill] sm:$0xff]  ;;  %s7613_s1 = scalar_lea.vmem %s9029_s6, %s4279_s18  ;;  %p397_p1 = scmp.ge.s32.totalorder %s400_s17, 7  }
 0x231   : > { %v8933_v0 = vld [vmem:[#allocation119_spill] sm:$0xff]  ;;  %v8943_v38 = vld [vmem:[#allocation102_spill] sm:$0xff]  ;;  %v8945_v29 = vld [vmem:[#allocation37_spill] sm:$0xff]  ;;  %s1237_s14 = scalar_lea.vmem %s9142_s25, %s7791_s24  ;;  %s2857_s5 = scvt.s32.f32 %s2856_s30 }
 0x232   : > { %v3179_v12 = vor.u32 %v8933_v0, %v8932_v1  ;;  %747 = vmatpush.bf16.msra.mxu0 %v3047_v20  ;;  %760 = vmatpush.bf16.msra.mxu1 %v3175_v22  ;;  %v8934_v4 = vld [vmem:[#allocation63_spill] sm:$0xff]  ;;  %v3015_v20 = vor.u32 %v4936_v57, %v4916_v53  ;;  %v8944_v35 = vld [vmem:[#allocation98_spill] sm:$0xff]  ;;  %v8946_v33 = vld [vmem:[#allocation41_spill] sm:$0xff]  ;;  %s2897_s15 = sshll.u32 (%p397_p1), %s8364_s21, 4  ;;  %s4534_s10 = smov (%p397_p1), [#allocation5]   ;;  %s2898_s15 = int_to_ptr.hbm [resolvable:$true] %s2897_s15 }
 0x233   : > { %v3031_v34 = vor.u32 %v8934_v4, %v4956_v61  ;;  %773 = vmatpush.bf16.msra.mxu2 %v3051_v11  ;;  %v8937_v7 = vld [vmem:[#allocation111_spill] sm:$0xff]  ;;  %v3019_v11 = vor.u32 %v4911_v52, %v4931_v56  ;;  %v8949_v32 = vld [vmem:[#allocation40_spill] sm:$0xff]  ;;  %v8952_v0 = vld [vmem:[#allocation90_spill] sm:$0xff]  ;;  %s2858_s12 = scvt.s32.f32 %s408_s4  ;;  %s2895_s18 = sshll.u32 (%p397_p1), %s4534_s10, 4  ;;  %s2896_s18 = int_to_ptr.vmem [resolvable:$true] %s2895_s18 }
 0x234   : > { %786 = vmatpush.bf16.msra.mxu3 %v3179_v12  ;;  %v3143_v22 = vor.u32 %v8937_v7, %v5236_v55  ;;  %v3147_v12 = vor.u32 %v5231_v51, %v5251_v54  ;;  %v8940_v39 = vld [vmem:[#allocation99_spill] sm:$0xff]  ;;  %v8950_v28 = vld [vmem:[#allocation36_spill] sm:$0xff]  ;;  %v8953_v2 = vld [vmem:[#allocation29_spill] sm:$0xff] }
 0x235   : > { %v8947_v31 = vld [vmem:[#allocation91_spill] sm:$0xff]  ;;  %v8954_v3 = vld [vmem:[#allocation33_spill] sm:$0xff]  ;;  %v8957_v6 = vld [vmem:[#allocation32_spill] sm:$0xff] }
 0x236   : > { %748 = vmatpush.bf16.msra.mxu0 %v3031_v34  ;;  %761 = vmatpush.bf16.msra.mxu1 %v3159_v25  ;;  %v2999_v34 = vor.u32 %v4896_v49, %v4876_v45  ;;  %v3127_v25 = vor.u32 %v5216_v58, %v5196_v47  ;;  %v8948_v42 = vld [vmem:[#allocation95_spill] sm:$0xff]  ;;  %v8958_v7 = vld [vmem:[#allocation28_spill] sm:$0xff]  ;;  %v8960_v9 = vld [vmem:[#allocation82_spill] sm:$0xff] }
 0x237   : > { %774 = vmatpush.bf16.msra.mxu2 %v3035_v26  ;;  %v3003_v26 = vor.u32 %v4871_v44, %v4891_v48  ;;  %v8956_v4 = vld [vmem:[#allocation87_spill] sm:$0xff]  ;;  %v8961_v13 = vld [vmem:[#allocation77_spill] sm:$0xff]  ;;  %v8966_v16 = vld [vmem:[#allocation76_spill] sm:$0xff] }
 0x238   : > { %787 = vmatpush.bf16.msra.mxu3 %v3163_v24  ;;  %v3131_v24 = vor.u32 %v5191_v43, %v5211_v46  ;;  %v8962_v14 = vld [vmem:[#allocation81_spill] sm:$0xff]  ;;  %v9046_v18 = vld [vmem:[#allocation227_spill] sm:$0xff]  ;;  %v9105_v30 = vld [vmem:[#allocation188_spill] sm:$0xff] }
 0x239   : > { %v3071_v15 = vor.u32 %v8962_v14, %v8961_v13  ;;  %v8968_v17 = vld [vmem:[#allocation129_spill] sm:$0xff]  ;;  %v8971_v14 = vld [vmem:[#allocation122_spill] sm:$0xff]  ;;  %v9100_v19 = vld [vmem:[#allocation19_spill] sm:$0xff] }
 0x23a   : > { %749 = vmatpush.bf16.msra.mxu0 %v3015_v20  ;;  %762 = vmatpush.bf16.msra.mxu1 %v3143_v22  ;;  %v2983_v20 = vor.u32 %v8939_v41, %v8938_v37  ;;  %v3111_v22 = vor.u32 %v5176_v50, %v8940_v39 }
 0x23b   : > { %775 = vmatpush.bf16.msra.mxu2 %v3019_v11  ;;  %v2987_v11 = vor.u32 %v8942_v36, %v8941_v40  ;;  %v4532_v36 = vmov 0  }
 0x23c   : > { %788 = vmatpush.bf16.msra.mxu3 %v3147_v12  ;;  %v3115_v12 = vor.u32 %v8944_v35, %v8943_v38  ;;  %4352 = vset.pattern.permute.xlu0 %v4532_v36 }
 0x23d   : > { %4351 = vset.pattern.permute.xlu2 %v4532_v36  ;;  %4350 = vset.pattern.permute.xlu1 %v4532_v36 }
 0x23e   : > { %750 = vmatpush.bf16.msra.mxu0 %v2999_v34  ;;  %763 = vmatpush.bf16.msra.mxu1 %v3127_v25  ;;  %v2967_v34 = vor.u32 %v8946_v33, %v8945_v29  ;;  %v3095_v25 = vor.u32 %v8948_v42, %v8947_v31  ;;  %v9106_v31 = vld [vmem:[#allocation194_spill] sm:$0xff] }
 0x23f   : > { %776 = vmatpush.bf16.msra.mxu2 %v3003_v26  ;;  %v2971_v26 = vor.u32 %v8950_v28, %v8949_v32  ;;  %v3322_v32 = vor.u32 %v9106_v31, %v9105_v30  ;;  %v9107_v33 = vld [vmem:[#allocation18_spill] sm:$0xff]  ;;  %v9110_v30 = vld [vmem:[#allocation176_spill] sm:$0xff] }
 0x240   : > { %789 = vmatpush.bf16.msra.mxu3 %v3131_v24  ;;  %v8951_v24 = vld [vmem:[#allocation94_spill] sm:$0xff] }
 0x241   : > { %v3099_v1 = vor.u32 %v8952_v0, %v8951_v24  ;;  %v8963_v0 = vld [vmem:[#allocation130_spill] sm:$0xff]  ;;  %v8965_v24 = vld [vmem:[#allocation80_spill] sm:$0xff] }
 0x242   : > { %751 = vmatpush.bf16.msra.mxu0 %v2983_v20  ;;  %764 = vmatpush.bf16.msra.mxu1 %v3111_v22  ;;  %v2951_v20 = vor.u32 %v8954_v3, %v8953_v2  ;;  %v8955_v22 = vld [vmem:[#allocation83_spill] sm:$0xff]  ;;  %v3075_v2 = vor.u32 %v8966_v16, %v8965_v24  ;;  %v8967_v3 = vld [vmem:[#allocation133_spill] sm:$0xff]  ;;  %v8972_v16 = vld [vmem:[#allocation126_spill] sm:$0xff] }
 0x243   : > { %777 = vmatpush.bf16.msra.mxu2 %v2987_v11  ;;  %v3079_v5 = vor.u32 %v8956_v4, %v8955_v22  ;;  %v2955_v11 = vor.u32 %v8958_v7, %v8957_v6  ;;  %v3203_v4 = vor.u32 %v8968_v17, %v8967_v3  ;;  %v7539_v6 = vpack.c.bf16 %v4525_v8, %v4525_v8  ;;  %v8969_v7 = vld [vmem:[#allocation69_spill] sm:$0xff]  ;;  %v8981_v24 = vld [vmem:[#allocation64_spill] sm:$0xff]  ;;  %v9111_v31 = vld [vmem:[#allocation182_spill] sm:$0xff] }
 0x244   : > { %790 = vmatpush.bf16.msra.mxu3 %v3115_v12  ;;  %v8959_v12 = vld [vmem:[#allocation86_spill] sm:$0xff]  ;;  %v3183_v17 = vor.u32 %v8972_v16, %v8971_v14  ;;  %v8976_v22 = vld [vmem:[#allocation121_spill] sm:$0xff]  ;;  %v8986_v16 = vld [vmem:[#allocation59_spill] sm:$0xff] }
 0x245   : > { %v3083_v10 = vor.u32 %v8960_v9, %v8959_v12  ;;  %v8970_v9 = vld [vmem:[#allocation73_spill] sm:$0xff] }
 0x246   : > { %752 = vmatpush.bf16.msra.mxu0 %v2967_v34  ;;  %765 = vmatpush.bf16.msra.mxu1 %v3095_v25  ;;  %v8964_v34 = vld [vmem:[#allocation134_spill] sm:$0xff]  ;;  %v3055_v13 = vor.u32 %v8970_v9, %v8969_v7  ;;  %v8985_v14 = vld [vmem:[#allocation57_spill] sm:$0xff] }
 0x247   : > { %778 = vmatpush.bf16.msra.mxu2 %v2971_v26  ;;  %v3199_v25 = vor.u32 %v8964_v34, %v8963_v0  ;;  %v8974_v26 = vld [vmem:[#allocation68_spill] sm:$0xff]  ;;  %v8979_v0 = vld [vmem:[#allocation115_spill] sm:$0xff]  ;;  %v8980_v34 = vld [vmem:[#allocation118_spill] sm:$0xff] }
 0x248   : > { %791 = vmatpush.bf16.msra.mxu3 %v3099_v1  ;;  %v7535_v1 = vpack.c.bf16 %v4517_v23, %v4517_v23  ;;  %v8984_v7 = vld [vmem:[#allocation114_spill] sm:$0xff] }
 0x24a   : > { %753 = vmatpush.bf16.msra.mxu0 %v2951_v20  ;;  %766 = vmatpush.bf16.msra.mxu1 %v3079_v5  ;;  %v8973_v5 = vld [vmem:[#allocation72_spill] sm:$0xff]  ;;  %v8975_v20 = vld [vmem:[#allocation125_spill] sm:$0xff] }
 0x24b   : > { %779 = vmatpush.bf16.msra.mxu2 %v2955_v11  ;;  %v3059_v23 = vor.u32 %v8974_v26, %v8973_v5  ;;  %v3187_v12 = vor.u32 %v8976_v22, %v8975_v20  ;;  %v8988_v5 = vld [vmem:[#allocation113_spill] sm:$0xff]  ;;  %v8989_v20 = vld [vmem:[#allocation58_spill] sm:$0xff]  ;;  %v8990_v22 = vld [vmem:[#allocation56_spill] sm:$0xff] }
 0x24c   : > { %792 = vmatpush.bf16.msra.mxu3 %v3083_v10  ;;  %v8977_v10 = vld [vmem:[#allocation61_spill] sm:$0xff] }
 0x24d   : > { %754 = vmatmul.bf16.vlgmr.msra.gmra.mxu0 %v7535_v1  ;;  %767 = vmatmul.bf16.vlgmr.msra.gmra.mxu1 %v7539_v6 }
 0x24e   : > { %798 = vmatpush.bf16.msrb.mxu0 %v3071_v15  ;;  %811 = vmatpush.bf16.msrb.mxu1 %v3199_v25  ;;  %v8978_v15 = vld [vmem:[#allocation65_spill] sm:$0xff]  ;;  %v3167_v25 = vor.u32 %v8980_v34, %v8979_v0  ;;  %v8994_v34 = vld [vmem:[#allocation55_spill] sm:$0xff] }
 0x24f   : > { %824 = vmatpush.bf16.msrb.mxu2 %v3075_v2  ;;  %793 = vmatmul.bf16.vlgmr.msra.gmra.mxu3 %v7539_v6  ;;  %v3039_v11 = vor.u32 %v8978_v15, %v8977_v10  ;;  %v8982_v2 = vld [vmem:[#allocation60_spill] sm:$0xff]  ;;  %v8992_v10 = vld [vmem:[#allocation109_spill] sm:$0xff] }
 0x250   : > { %837 = vmatpush.bf16.msrb.mxu3 %v3203_v4  ;;  %780 = vmatmul.bf16.vlgmr.msra.gmra.mxu2 %v7535_v1  ;;  %v3043_v3 = vor.u32 %v8982_v2, %v8981_v24  ;;  %v8983_v4 = vld [vmem:[#allocation117_spill] sm:$0xff]  ;;  %v8996_v24 = vld [vmem:[#allocation108_spill] sm:$0xff] }
 0x251   : > { %v3171_v9 = vor.u32 %v8984_v7, %v8983_v4  ;;  %v8993_v0 = vld [vmem:[#allocation53_spill] sm:$0xff]  ;;  %v8997_v4 = vld [vmem:[#allocation54_spill] sm:$0xff]  ;;  %v8998_v7 = vld [vmem:[#allocation52_spill] sm:$0xff] }
 0x252   : > { %799 = vmatpush.bf16.msrb.mxu0 %v3055_v13  ;;  %812 = vmatpush.bf16.msrb.mxu1 %v3183_v17  ;;  %v3023_v13 = vor.u32 %v8986_v16, %v8985_v14  ;;  %v8987_v17 = vld [vmem:[#allocation110_spill] sm:$0xff]  ;;  %v9000_v14 = vld [vmem:[#allocation105_spill] sm:$0xff] }
 0x253   : > { %825 = vmatpush.bf16.msrb.mxu2 %v3059_v23  ;;  %v3151_v26 = vor.u32 %v8988_v5, %v8987_v17  ;;  %v3027_v23 = vor.u32 %v8990_v22, %v8989_v20  ;;  %v9001_v17 = vld [vmem:[#allocation47_spill] sm:$0xff]  ;;  %v9004_v20 = vld [vmem:[#allocation104_spill] sm:$0xff] }
 0x254   : > { %838 = vmatpush.bf16.msrb.mxu3 %v3187_v12  ;;  %v8991_v12 = vld [vmem:[#allocation112_spill] sm:$0xff]  ;;  %v9002_v5 = vld [vmem:[#allocation51_spill] sm:$0xff] }
 0x255   : > { %v3155_v15 = vor.u32 %v8992_v10, %v8991_v12  ;;  %v9005_v12 = vld [vmem:[#allocation50_spill] sm:$0xff] }
 0x256   : > { %800 = vmatpush.bf16.msrb.mxu0 %v3039_v11  ;;  %813 = vmatpush.bf16.msrb.mxu1 %v3167_v25  ;;  %v3007_v11 = vor.u32 %v8994_v34, %v8993_v0  ;;  %v8995_v25 = vld [vmem:[#allocation106_spill] sm:$0xff]  ;;  %v9008_v0 = vld [vmem:[#allocation100_spill] sm:$0xff] }
 0x257   : > { %826 = vmatpush.bf16.msrb.mxu2 %v3043_v3  ;;  %v3135_v2 = vor.u32 %v8996_v24, %v8995_v25  ;;  %v3011_v3 = vor.u32 %v8998_v7, %v8997_v4  ;;  %v9006_v10 = vld [vmem:[#allocation46_spill] sm:$0xff]  ;;  %v9009_v25 = vld [vmem:[#allocation39_spill] sm:$0xff]  ;;  %v9012_v4 = vld [vmem:[#allocation97_spill] sm:$0xff] }
 0x258   : > { %839 = vmatpush.bf16.msrb.mxu3 %v3171_v9  ;;  %v8999_v9 = vld [vmem:[#allocation107_spill] sm:$0xff] }
 0x259   : > { %v3139_v16 = vor.u32 %v9000_v14, %v8999_v9  ;;  %v9010_v24 = vld [vmem:[#allocation43_spill] sm:$0xff]  ;;  %v9013_v9 = vld [vmem:[#allocation42_spill] sm:$0xff] }
 0x25a   : > { %801 = vmatpush.bf16.msrb.mxu0 %v3023_v13  ;;  %814 = vmatpush.bf16.msrb.mxu1 %v3151_v26  ;;  %v2991_v13 = vor.u32 %v9002_v5, %v9001_v17  ;;  %v9003_v26 = vld [vmem:[#allocation101_spill] sm:$0xff]  ;;  %v9014_v14 = vld [vmem:[#allocation38_spill] sm:$0xff]  ;;  %v9016_v17 = vld [vmem:[#allocation92_spill] sm:$0xff] }
 0x25b   : > { %827 = vmatpush.bf16.msrb.mxu2 %v3027_v23  ;;  %v3119_v22 = vor.u32 %v9004_v20, %v9003_v26  ;;  %v2995_v23 = vor.u32 %v9006_v10, %v9005_v12  ;;  %v9017_v26 = vld [vmem:[#allocation31_spill] sm:$0xff]  ;;  %v9020_v12 = vld [vmem:[#allocation89_spill] sm:$0xff] }
 0x25c   : > { %840 = vmatpush.bf16.msrb.mxu3 %v3155_v15  ;;  %v9007_v15 = vld [vmem:[#allocation103_spill] sm:$0xff] }
 0x25d   : > { %v3123_v34 = vor.u32 %v9008_v0, %v9007_v15  ;;  %v9021_v15 = vld [vmem:[#allocation34_spill] sm:$0xff] }
 0x25e   : > { %802 = vmatpush.bf16.msrb.mxu0 %v3007_v11  ;;  %815 = vmatpush.bf16.msrb.mxu1 %v3135_v2  ;;  %v2975_v11 = vor.u32 %v9010_v24, %v9009_v25  ;;  %v9011_v2 = vld [vmem:[#allocation93_spill] sm:$0xff]  ;;  %v9024_v25 = vld [vmem:[#allocation84_spill] sm:$0xff] }
 0x25f   : > { %828 = vmatpush.bf16.msrb.mxu2 %v3011_v3  ;;  %v3103_v7 = vor.u32 %v9012_v4, %v9011_v2  ;;  %v2979_v3 = vor.u32 %v9014_v14, %v9013_v9  ;;  %v9026_v2 = vld [vmem:[#allocation226_spill] sm:$0xff]  ;;  %v9028_v9 = vld [vmem:[#allocation219_spill] sm:$0xff] }
 0x260   : > { %841 = vmatpush.bf16.msrb.mxu3 %v3139_v16  ;;  %v9015_v16 = vld [vmem:[#allocation96_spill] sm:$0xff] }
 0x261   : > { %v3107_v5 = vor.u32 %v9016_v17, %v9015_v16  ;;  %v9030_v16 = vld [vmem:[#allocation208_spill] sm:$0xff]  ;;  %v9031_v17 = vld [vmem:[#allocation214_spill] sm:$0xff] }
 0x262   : > { %803 = vmatpush.bf16.msrb.mxu0 %v2991_v13  ;;  %816 = vmatpush.bf16.msrb.mxu1 %v3119_v22  ;;  %v9018_v13 = vld [vmem:[#allocation35_spill] sm:$0xff]  ;;  %v9019_v22 = vld [vmem:[#allocation85_spill] sm:$0xff] }
 0x263   : > { %829 = vmatpush.bf16.msrb.mxu2 %v2995_v23  ;;  %v2959_v20 = vor.u32 %v9018_v13, %v9017_v26  ;;  %v3087_v10 = vor.u32 %v9020_v12, %v9019_v22  ;;  %v9022_v23 = vld [vmem:[#allocation30_spill] sm:$0xff]  ;;  %v9033_v26 = vld [vmem:[#allocation207_spill] sm:$0xff] }
 0x264   : > { %842 = vmatpush.bf16.msrb.mxu3 %v3123_v34  ;;  %v2963_v0 = vor.u32 %v9022_v23, %v9021_v15  ;;  %v9023_v34 = vld [vmem:[#allocation88_spill] sm:$0xff] }
 0x265   : > { %v3091_v24 = vor.u32 %v9024_v25, %v9023_v34  ;;  %v417_v15 = vld [vmem:[%s7613_s1 + $0x8] sm:$0xff]  ;;  %v9036_v34 = vld [vmem:[#allocation202_spill] sm:$0xff] }
 0x266   : > { %804 = vmatpush.bf16.msrb.mxu0 %v2975_v11  ;;  %817 = vmatpush.bf16.msrb.mxu1 %v3103_v7  ;;  %v9025_v11 = vld [vmem:[#allocation220_spill] sm:$0xff]  ;;  %v9027_v7 = vld [vmem:[#allocation225_spill] sm:$0xff] }
 0x267   : > { %830 = vmatpush.bf16.msrb.mxu2 %v2979_v3  ;;  %v3378_v4 = vor.u32 %v9026_v2, %v9025_v11  ;;  %v3382_v14 = vor.u32 %v9028_v9, %v9027_v7  ;;  %v416_v3 = vld [vmem:[%s7613_s1] sm:$0xff]  ;;  %v9039_v7 = vld [vmem:[#allocation17_spill] sm:$0xff] }
 0x268   : > { %843 = vmatpush.bf16.msrb.mxu3 %v3107_v5  ;;  %v9032_v5 = vld [vmem:[#allocation213_spill] sm:$0xff]  ;;  %v9038_v11 = vld [vmem:[#allocation195_spill] sm:$0xff]  ;;  %v421_v9 = vadd.f32 %v417_v15, %v9039_v7 }
 0x269   : > { %v3358_v13 = vor.u32 %v9033_v26, %v9032_v5  ;;  %v9040_v5 = vld [vmem:[#allocation184_spill] sm:$0xff] }
 0x26a   : > { %805 = vmatpush.bf16.msrb.mxu0 %v2959_v20  ;;  %818 = vmatpush.bf16.msrb.mxu1 %v3087_v10  ;;  %v9034_v20 = vld [vmem:[#allocation16_spill] sm:$0xff] }
 0x26b   : > { %831 = vmatpush.bf16.msrb.mxu2 %v2963_v0  ;;  %v420_v22 = vadd.f32 %v416_v3, %v9034_v20  ;;  %v9035_v0 = vld [vmem:[#allocation196_spill] sm:$0xff]  ;;  %v9043_v20 = vld [vmem:[#allocation183_spill] sm:$0xff] }
 0x26c   : > { %844 = vmatpush.bf16.msrb.mxu3 %v3091_v24  ;;  %v3330_v25 = vor.u32 %v9036_v34, %v9035_v0  ;;  %v9037_v24 = vld [vmem:[#allocation201_spill] sm:$0xff]  ;;  %v9045_v0 = vld [vmem:[#allocation228_spill] sm:$0xff] }
 0x26d   : > { %806 = vmatmul.bf16.vlgmr.msrb.gmra.mxu0 %v7535_v1  ;;  %819 = vmatmul.bf16.vlgmr.msrb.gmra.mxu1 %v7539_v6  ;;  %v3334_v2 = vor.u32 %v9038_v11, %v9037_v24  ;;  %v9047_v24 = vld [vmem:[#allocation221_spill] sm:$0xff] }
 0x26e   : > { %832 = vmatmul.bf16.vlgmr.msrb.gmra.mxu2 %v7535_v1  ;;  %1158 = vmatpush.bf16.msra.mxu0 %v3378_v4 }
 0x26f   : > { %845 = vmatmul.bf16.vlgmr.msrb.gmra.mxu3 %v7539_v6  ;;  %1171 = vmatpush.bf16.msra.mxu1 %v3382_v14  ;;  %v3354_v6 = vor.u32 %v9031_v17, %v9030_v16 }
 0x272   : > { %1159 = vmatpush.bf16.msra.mxu0 %v3354_v6  ;;  %v9041_v6 = vld [vmem:[#allocation190_spill] sm:$0xff] }
 0x273   : > { %1172 = vmatpush.bf16.msra.mxu1 %v3358_v13  ;;  %v3306_v26 = vor.u32 %v9041_v6, %v9040_v5  ;;  %v9042_v13 = vld [vmem:[#allocation189_spill] sm:$0xff]  ;;  %v9052_v6 = vld [vmem:[#allocation210_spill] sm:$0xff] }
 0x276   : > { %1160 = vmatpush.bf16.msra.mxu0 %v3330_v25 }
 0x277   : > { %1173 = vmatpush.bf16.msra.mxu1 %v3334_v2  ;;  %v9048_v2 = vld [vmem:[#allocation172_spill] sm:$0xff] }
 0x27a   : > { %1161 = vmatpush.bf16.msra.mxu0 %v3306_v26  ;;  %v9056_v26 = vld [vmem:[#allocation160_spill] sm:$0xff] }
 0x2ca   : > { %v755_v12 = vpop.f32.mrf.mxu0  ;;  %v768_v10 = vpop.f32.mrf.mxu1 }
 0x2cb   : > { %v769_v23 = vadd.f32 %v768_v10, %v755_v12  ;;  %v3310_v12 = vor.u32 %v9043_v20, %v9042_v13  ;;  %v9044_v10 = vld [vmem:[#allocation222_spill] sm:$0xff]  ;;  %v9053_v13 = vld [vmem:[#allocation216_spill] sm:$0xff] }
 0x2cc   : > { %v3386_v34 = vor.u32 %v9045_v0, %v9044_v10  ;;  %v3362_v20 = vor.u32 %v9053_v13, %v9052_v6  ;;  %v9054_v10 = vld [vmem:[#allocation215_spill] sm:$0xff]  ;;  %v9065_v6 = vld [vmem:[#allocation154_spill] sm:$0xff] }
 0x2cd   : > { %v850_v4 = vadd.f32 %v769_v23, %v420_v22  ;;  %v3390_v22 = vor.u32 %v9047_v24, %v9046_v18  ;;  %1174 = vmatpush.bf16.msra.mxu1 %v3310_v12  ;;  %v9055_v18 = vld [vmem:[#allocation209_spill] sm:$0xff]  ;;  %v9057_v12 = vld [vmem:[#allocation166_spill] sm:$0xff]  ;;  %v9059_v24 = vld [vmem:[#allocation159_spill] sm:$0xff] }
 0x2ce   : > { %1184 = vmatpush.bf16.msra.mxu2 %v3386_v34  ;;  %v3258_v0 = vor.u32 %v9057_v12, %v9056_v26  ;;  %v9058_v34 = vld [vmem:[#allocation165_spill] sm:$0xff]  ;;  %v9070_v26 = vld [vmem:[#allocation191_spill] sm:$0xff] }
 0x2cf   : > { %v3204_v3 = vmul.f32 -1.442695, %v850_v4  ;;  %1197 = vmatpush.bf16.msra.mxu3 %v3390_v22  ;;  %v9049_v4 = vld [vmem:[#allocation178_spill] sm:$0xff]  ;;  %v3262_v22 = vor.u32 %v9059_v24, %v9058_v34  ;;  %v9071_v12 = vld [vmem:[#allocation185_spill] sm:$0xff] }
 0x2d0   : > { %v3282_v7 = vor.u32 %v9049_v4, %v9048_v2  ;;  %v9062_v4 = vld [vmem:[#allocation203_spill] sm:$0xff]  ;;  %v3318_v34 = vor.u32 %v9071_v12, %v9070_v26  ;;  %v9085_v26 = vld [vmem:[#allocation168_spill] sm:$0xff] }
 0x2d1   : > { %4353 = vpow2.f32 %v3204_v3 }
 0x2d2   : > { %v794_v16 = vpop.f32.mrf.mxu3  ;;  %v757_v15 = vpop.f32.mrf.mxu0  ;;  %1162 = vmatpush.bf16.msra.mxu0 %v3282_v7  ;;  %1185 = vmatpush.bf16.msra.mxu2 %v3362_v20  ;;  %v9066_v20 = vld [vmem:[#allocation153_spill] sm:$0xff] }
 0x2d3   : > { %v781_v14 = vpop.f32.mrf.mxu2  ;;  %v770_v25 = vpop.f32.mrf.mxu1  ;;  %v9060_v15 = vld [vmem:[#allocation198_spill] sm:$0xff] }
 0x2d4   : > { %v795_v17 = vadd.f32 %v794_v16, %v781_v14  ;;  %v9050_v14 = vld [vmem:[#allocation177_spill] sm:$0xff]  ;;  %v9051_v16 = vld [vmem:[#allocation171_spill] sm:$0xff]  ;;  %v9061_v25 = vld [vmem:[#allocation204_spill] sm:$0xff] }
 0x2d5   : > { %v3286_v5 = vor.u32 %v9051_v16, %v9050_v14  ;;  %v3338_v2 = vor.u32 %v9061_v25, %v9060_v15  ;;  %v9063_v14 = vld [vmem:[#allocation197_spill] sm:$0xff]  ;;  %v9075_v25 = vld [vmem:[#allocation135_spill] sm:$0xff] }
 0x2d6   : > { %v851_v23 = vadd.f32 %v795_v17, %v421_v9  ;;  %v3366_v9 = vor.u32 %v9055_v18, %v9054_v10  ;;  %v3342_v16 = vor.u32 %v9063_v14, %v9062_v4  ;;  %1163 = vmatpush.bf16.msra.mxu0 %v3258_v0  ;;  %v9067_v10 = vld [vmem:[#allocation147_spill] sm:$0xff]  ;;  %v9072_v0 = vld [vmem:[#allocation136_spill] sm:$0xff]  ;;  %v9074_v15 = vld [vmem:[#allocation141_spill] sm:$0xff] }
 0x2d7   : > { %1175 = vmatpush.bf16.msra.mxu1 %v3286_v5  ;;  %1186 = vmatpush.bf16.msra.mxu2 %v3338_v2  ;;  %v9064_v5 = vld [vmem:[#allocation148_spill] sm:$0xff]  ;;  %v3238_v18 = vor.u32 %v9067_v10, %v9066_v20  ;;  %v3214_v2 = vor.u32 %v9075_v25, %v9074_v15  ;;  %v9076_v4 = vld [vmem:[#allocation174_spill] sm:$0xff] }
 0x2d8   : > { %v3205_v11 = vmul.f32 -1.442695, %v851_v23  ;;  %1198 = vmatpush.bf16.msra.mxu3 %v3366_v9  ;;  %v4354_v23 = vpop.eup %4353  ;;  %v3234_v13 = vor.u32 %v9065_v6, %v9064_v5  ;;  %v9068_v9 = vld [vmem:[#allocation186_spill] sm:$0xff]  ;;  %v9077_v14 = vld [vmem:[#allocation180_spill] sm:$0xff]  ;;  %v9079_v5 = vld [vmem:[#allocation173_spill] sm:$0xff] }
 0x2d9   : > { %v7651_v7 = vadd.f32 1.0, %v4354_v23  ;;  %v9081_v20 = vld [vmem:[#allocation230_spill] sm:$0xff] }
 0x2da   : > { %4355 = vpow2.f32 %v3205_v11  ;;  %v796_v3 = vpop.f32.mrf.mxu3  ;;  %1164 = vmatpush.bf16.msra.mxu0 %v3234_v13  ;;  %v9080_v13 = vld [vmem:[#allocation224_spill] sm:$0xff] }
 0x2db   : > { %v783_v17 = vpop.f32.mrf.mxu2  ;;  %1176 = vmatpush.bf16.msra.mxu1 %v3262_v22  ;;  %4357 = vrcp.f32 %v7651_v7  ;;  %v9073_v22 = vld [vmem:[#allocation142_spill] sm:$0xff]  ;;  %v3394_v10 = vor.u32 %v9081_v20, %v9080_v13  ;;  %vm863_vm0 = vweird.f32 %v7651_v7 }
 0x2dc   : > { %1199 = vmatpush.bf16.msra.mxu3 %v3342_v16  ;;  %v9069_v17 = vld [vmem:[#allocation192_spill] sm:$0xff]  ;;  %v3210_v23 = vor.u32 %v9073_v22, %v9072_v0  ;;  %v3290_v16 = vor.u32 %v9077_v14, %v9076_v4  ;;  %v9087_v0 = vld [vmem:[#allocation161_spill] sm:$0xff]  ;;  %v9089_v4 = vld [vmem:[#allocation218_spill] sm:$0xff] }
 0x2dd   : > { %v3314_v3 = vor.u32 %v9069_v17, %v9068_v9  ;;  %v9083_v9 = vld [vmem:[#allocation223_spill] sm:$0xff] }
 0x2de   : > { %1165 = vmatpush.bf16.msra.mxu0 %v3210_v23  ;;  %v419_v20 = vld [vmem:[%s7613_s1 + $0x18] sm:$0xff] }
 0x2df   : > { %1177 = vmatpush.bf16.msra.mxu1 %v3238_v18  ;;  %1187 = vmatpush.bf16.msra.mxu2 %v3314_v3  ;;  %v9082_v18 = vld [vmem:[#allocation229_spill] sm:$0xff]  ;;  %v9084_v3 = vld [vmem:[#allocation162_spill] sm:$0xff]  ;;  %v423_v28 = vadd.f32 %v419_v20, %v9100_v19 }
 0x2e0   : > { %v4356_v11 = vpop.eup %4355  ;;  %1200 = vmatpush.bf16.msra.mxu3 %v3318_v34  ;;  %v3398_v17 = vor.u32 %v9083_v9, %v9082_v18  ;;  %v3266_v12 = vor.u32 %v9085_v26, %v9084_v3  ;;  %v9086_v34 = vld [vmem:[#allocation167_spill] sm:$0xff]  ;;  %v9093_v18 = vld [vmem:[#allocation156_spill] sm:$0xff]  ;;  %v9095_v3 = vld [vmem:[#allocation149_spill] sm:$0xff] }
 0x2e1   : > { %v7661_v24 = vadd.f32 1.0, %v4356_v11  ;;  %v9078_v11 = vld [vmem:[#allocation179_spill] sm:$0xff]  ;;  %v3270_v22 = vor.u32 %v9087_v0, %v9086_v34  ;;  %v7681_v23 = vpop.eup %4357  ;;  %v9096_v34 = vld [vmem:[#allocation200_spill] sm:$0xff]  ;;  %v9097_v0 = vld [vmem:[#allocation206_spill] sm:$0xff] }
 0x2e2   : > { %v3294_v6 = vor.u32 %v9079_v5, %v9078_v11  ;;  %1210 = vmatpush.bf16.msrb.mxu0 %v3394_v10  ;;  %v9090_v11 = vld [vmem:[#allocation217_spill] sm:$0xff]  ;;  %v9091_v5 = vld [vmem:[#allocation211_spill] sm:$0xff]  ;;  %v859_v13 = vmul.f32 %v7681_v23, %v7651_v7  ;;  %v9092_v10 = vld [vmem:[#allocation150_spill] sm:$0xff]  ;;  %vm864_vm1 = vweird.f32 %v7681_v23 }
 0x2e3   : > { %4359 = vrcp.f32 %v7661_v24  ;;  %1178 = vmatpush.bf16.msra.mxu1 %v3214_v2  ;;  %1188 = vmatpush.bf16.msra.mxu2 %v3290_v16  ;;  %v9088_v2 = vld [vmem:[#allocation212_spill] sm:$0xff]  ;;  %v3374_v16 = vor.u32 %v9091_v5, %v9090_v11  ;;  %v3242_v9 = vor.u32 %v9093_v18, %v9092_v10  ;;  %v9099_v11 = vld [vmem:[#allocation199_spill] sm:$0xff]  ;;  %v9101_v18 = vld [vmem:[#allocation138_spill] sm:$0xff]  ;;  %vm882_vm2 = vweird.f32 %v7661_v24 }
 0x2e4   : > { %1201 = vmatpush.bf16.msra.mxu3 %v3294_v6  ;;  %v3370_v14 = vor.u32 %v9089_v4, %v9088_v2  ;;  %v3346_v2 = vor.u32 %v9097_v0, %v9096_v34  ;;  %v9103_v34 = vld [vmem:[#allocation143_spill] sm:$0xff]  ;;  %v9104_v0 = vld [vmem:[#allocation137_spill] sm:$0xff]  ;;  %vm7733_vm4 = vmor %vm863_vm0, %vm864_vm1  ;;  %vm1415_vm0 = vcmask 1041409   ;;  %vm1417_vm1 = vcmask 1042434  }
 0x2e5   : > { %v3222_v29 = vor.u32 %v9104_v0, %v9103_v34  ;;  %v9116_v0 = vld [vmem:[#allocation169_spill] sm:$0xff] }
 0x2e6   : > { %1211 = vmatpush.bf16.msrb.mxu0 %v3370_v14  ;;  %v860_v14 = vsub.f32 1.0, %v859_v13  ;;  %v9108_v13 = vld [vmem:[#allocation193_spill] sm:$0xff] }
 0x2e7   : > { %1223 = vmatpush.bf16.msrb.mxu1 %v3398_v17  ;;  %1189 = vmatpush.bf16.msra.mxu2 %v3266_v12  ;;  %v9094_v17 = vld [vmem:[#allocation155_spill] sm:$0xff]  ;;  %v418_v12 = vld [vmem:[%s7613_s1 + $0x10] sm:$0xff] }
 0x2e8   : > { %1202 = vmatpush.bf16.msra.mxu3 %v3270_v22  ;;  %v3246_v26 = vor.u32 %v9095_v3, %v9094_v17  ;;  %v9098_v22 = vld [vmem:[#allocation205_spill] sm:$0xff]  ;;  %v9102_v17 = vld [vmem:[#allocation144_spill] sm:$0xff] }
 0x2e9   : > { %v7687_v6 = vpop.eup %4359  ;;  %v3350_v5 = vor.u32 %v9099_v11, %v9098_v22  ;;  %v3218_v3 = vor.u32 %v9102_v17, %v9101_v18  ;;  %v422_v22 = vadd.f32 %v418_v12, %v9107_v33  ;;  %v861_v18 = vmul.f32 %v7681_v23, %v860_v14  ;;  %v9114_v14 = vld [vmem:[#allocation164_spill] sm:$0xff] }
 0x2ea   : > { %v807_v15 = vpop.f32.mrf.mxu0  ;;  %v820_v25 = vpop.f32.mrf.mxu1  ;;  %v878_v4 = vmul.f32 %v7687_v6, %v7661_v24  ;;  %1212 = vmatpush.bf16.msrb.mxu0 %v3346_v2  ;;  %v3298_v33 = vor.u32 %v9111_v31, %v9110_v30  ;;  %vm883_vm3 = vweird.f32 %v7687_v6  ;;  %v9125_v30 = vld [vmem:[#allocation151_spill] sm:$0xff] }
 0x2eb   : > { %1224 = vmatpush.bf16.msrb.mxu1 %v3374_v16  ;;  %1190 = vmatpush.bf16.msra.mxu2 %v3242_v9  ;;  %v821_v11 = vadd.f32 %v820_v25, %v807_v15  ;;  %v9112_v15 = vld [vmem:[#allocation181_spill] sm:$0xff]  ;;  %v9113_v25 = vld [vmem:[#allocation175_spill] sm:$0xff]  ;;  %vm7741_vm5 = vmor %vm882_vm2, %vm883_vm3  ;;  %vm1419_vm2 = vcmask 1043459   ;;  %vm1421_vm3 = vcmask 1044484  }
 0x2ec   : > { %1203 = vmatpush.bf16.msra.mxu3 %v3246_v26  ;;  %v9109_v26 = vld [vmem:[#allocation187_spill] sm:$0xff]  ;;  %v879_v2 = vsub.f32 1.0, %v878_v4  ;;  %v3302_v12 = vor.u32 %v9113_v25, %v9112_v15 }
 0x2ed   : > { %v3326_v35 = vor.u32 %v9109_v26, %v9108_v13  ;;  %v852_v17 = vadd.f32 %v821_v11, %v422_v22  ;;  %v9117_v22 = vld [vmem:[#allocation163_spill] sm:$0xff]  ;;  %v886_v13 = vand.u32 2147483647, %v7661_v24 }
 0x2ee   : > { %1213 = vmatpush.bf16.msrb.mxu0 %v3322_v32  ;;  %v862_v32 = vadd.f32 %v7681_v23, %v861_v18  ;;  %v3278_v11 = vor.u32 %v9117_v22, %v9116_v0  ;;  %v9123_v18 = vld [vmem:[#allocation158_spill] sm:$0xff] }
 0x2ef   : > { %1225 = vmatpush.bf16.msrb.mxu1 %v3350_v5  ;;  %1191 = vmatpush.bf16.msra.mxu2 %v3218_v3  ;;  %vm887_vm7 = vcmp.eq.f32.partialorder %v886_v13, 8.507059e+37 }
 0x2f0   : > { %1204 = vmatpush.bf16.msra.mxu3 %v3222_v29  ;;  %v869_v29 = vand.u32 2147483648, %v7651_v7 }
 0x2f1   : > { %v833_v16 = vpop.f32.mrf.mxu2 }
 0x2f2   : > { %v846_v10 = vpop.f32.mrf.mxu3  ;;  %v809_v20 = vpop.f32.mrf.mxu0  ;;  %1214 = vmatpush.bf16.msrb.mxu0 %v3298_v33 }
 0x2f3   : > { %v847_v19 = vadd.f32 %v846_v10, %v833_v16  ;;  %v822_v9 = vpop.f32.mrf.mxu1  ;;  %1226 = vmatpush.bf16.msrb.mxu1 %v3326_v35  ;;  %v880_v16 = vmul.f32 %v7687_v6, %v879_v2  ;;  %v9115_v10 = vld [vmem:[#allocation170_spill] sm:$0xff]  ;;  %v870_v2 = vor.u32 1.1754944e-38, %v869_v29 }
 0x2f4   : > { %v3274_v3 = vor.u32 %v9115_v10, %v9114_v14 }
 0x2f5   : > { %v853_v5 = vadd.f32 %v847_v19, %v423_v28  ;;  %v867_v28 = vand.u32 2147483647, %v7651_v7  ;;  %v888_v19 = vand.u32 2147483648, %v7661_v24  ;;  %v881_v9 = vadd.f32 %v7687_v6, %v880_v16 }
 0x2f6   : > { %v866_v7 = vsel %vm7733_vm4, %v7681_v23, %v862_v32  ;;  %1215 = vmatpush.bf16.msrb.mxu0 %v3274_v3  ;;  %v9126_v23 = vld [vmem:[#allocation140_spill] sm:$0xff]  ;;  %v9128_v32 = vld [vmem:[#allocation145_spill] sm:$0xff]  ;;  %vm1423_vm4 = vcmask 1045509  }
 0x2f7   : > { %v3206_v34 = vmul.f32 -1.442695, %v853_v5  ;;  %1227 = vmatpush.bf16.msrb.mxu1 %v3302_v12  ;;  %vm868_vm6 = vcmp.eq.f32.partialorder %v867_v28, 8.507059e+37  ;;  %v9122_v5 = vld [vmem:[#allocation152_spill] sm:$0xff]  ;;  %v889_v24 = vor.u32 1.1754944e-38, %v888_v19  ;;  %v885_v15 = vsel %vm7741_vm5, %v7687_v6, %v881_v9  ;;  %v9127_v28 = vld [vmem:[#allocation146_spill] sm:$0xff] }
 0x2f8   : > { %v871_v16 = vsel %vm868_vm6, %v870_v2, %v866_v7  ;;  %v3226_v29 = vor.u32 %v9127_v28, %v9126_v23  ;;  %v9137_v23 = vld [vmem:[#allocation240_spill] sm:$0xff]  ;;  %vm1425_vm5 = vcmask 1046534   ;;  %vm1427_vm6 = vcmask 1047559  }
 0x2f9   : > { %4361 = vpow2.f32 %v3206_v34  ;;  %v835_v35 = vpop.f32.mrf.mxu2  ;;  %v9124_v34 = vld [vmem:[#allocation157_spill] sm:$0xff]  ;;  %v890_v14 = vsel %vm887_vm7, %v889_v24, %v885_v15  ;;  %vm1430_vm7 = vcmask 64512  }
 0x2fa   : > { %v848_v4 = vpop.f32.mrf.mxu3  ;;  %4363 = vtanh.f32 %v852_v17  ;;  %v3250_v17 = vor.u32 %v9123_v18, %v9122_v5  ;;  %v3254_v31 = vor.u32 %v9125_v30, %v9124_v34  ;;  %v9129_v35 = vld [vmem:[#allocation139_spill] sm:$0xff]  ;;  %v912_v3 = vmul.f32 %v4521_v27, %v890_v14  ;;  %v9131_v34 = vld [vmem:[#allocation246_spill] sm:$0xff]  ;;  %v9134_v15 = vld [vmem:[#allocation241_spill] sm:$0xff] }
 0x2fb   : > { %1228 = vmatpush.bf16.msrb.mxu1 %v3278_v11  ;;  %v3230_v4 = vor.u32 %v9129_v35, %v9128_v32  ;;  %v9139_v32 = vld [vmem:[#allocation238_spill] sm:$0xff]  ;;  %v9141_v14 = vld [vmem:[#allocation236_spill] sm:$0xff] }
 0x2fc   : > { %1216 = vmatpush.bf16.msrb.mxu0 %v3250_v17  ;;  %v9130_v17 = vld [vmem:[#allocation245_spill] sm:$0xff] }
 0x2fd   : > { %v3432_v30 = vor.u32 %v9131_v34, %v9130_v17 }
 0x2ff   : > { %v4362_v33 = vpop.eup %4361  ;;  %1229 = vmatpush.bf16.msrb.mxu1 %v3254_v31  ;;  %1312 = vmatpush.bf16.msrb.mxu2 %v3432_v30  ;;  %v9132_v31 = vld [vmem:[#allocation243_spill] sm:$0xff]  ;;  %v9147_v30 = vld [vmem:[#allocation248_spill] sm:$0xff] }
 0x300   : > { %v896_v25 = vadd.f32 1.0, %v4362_v33  ;;  %v4364_v12 = vpop.eup %4363  ;;  %1217 = vmatpush.bf16.msrb.mxu0 %v3226_v29  ;;  %v9133_v33 = vld [vmem:[#allocation244_spill] sm:$0xff]  ;;  %v9138_v29 = vld [vmem:[#allocation237_spill] sm:$0xff] }
 0x301   : > { %v913_v10 = vmul.f32 %v4364_v12, %v871_v16  ;;  %v3428_v24 = vor.u32 %v9133_v33, %v9132_v31  ;;  %v9136_v16 = vld [vmem:[#allocation239_spill] sm:$0xff]  ;;  %v3416_v35 = vor.u32 %v9139_v32, %v9138_v29  ;;  %v7807_v31 = vperm.slane %v9147_v30, 0  ;;  %v9152_v30 = vld [vmem:[#allocation25_spill] sm:$0xff] }
 0x302   : > { %4365 = vrcp.f32 %v896_v25  ;;  %v908_v11 = vand.u32 2147483648, %v896_v25  ;;  %v906_v20 = vand.u32 2147483647, %v896_v25  ;;  %vm902_vm9 = vweird.f32 %v896_v25 }
 0x303   : > { %1230 = vmatpush.bf16.msrb.mxu1 %v3230_v4  ;;  %v7760_v27 = vadd.f32 %v913_v10, %v912_v3   ;;  %1313 = vmatpush.bf16.msrb.mxu2 %v3428_v24  ;;  %v3420_v28 = vor.u32 %v9137_v23, %v9136_v16  ;;  %v9140_v4 = vld [vmem:[#allocation235_spill] sm:$0xff]  ;;  %v9143_v3 = vld [vmem:[#allocation233_spill] sm:$0xff] }
 0x304   : > { %v909_v13 = vor.u32 1.1754944e-38, %v908_v11  ;;  %vm907_vm11 = vcmp.eq.f32.partialorder %v906_v20, 8.507059e+37  ;;  %v3412_v10 = vor.u32 %v9141_v14, %v9140_v4  ;;  %v9146_v11 = vld [vmem:[#allocation232_spill] sm:$0xff] }
 0x305   : > { %4367 = vtanh.f32 %v7760_v27  ;;  %v1238_v20 = vld [vmem:[%s1237_s14] sm:$0xff] }
 0x306   : > { %v9149_v14 = vld [vmem:[#allocation24_spill] sm:$0xff] }
 0x308   : > { %v4366_v6 = vpop.eup %4365 }
 0x309   : > { %v898_v0 = vmul.f32 %v4366_v6, %v896_v25  ;;  %vm903_vm8 = vweird.f32 %v4366_v6  ;;  %v9135_v25 = vld [vmem:[#allocation242_spill] sm:$0xff] }
 0x30a   : > { %vm904_vm10 = vmor %vm902_vm9, %vm903_vm8  ;;  %v3424_v12 = vor.u32 %v9135_v25, %v9134_v15 }
 0x30b   : > { %v899_v22 = vsub.f32 1.0, %v898_v0  ;;  %v7763_v2 = vpop.eup %4367 }
 0x30c   : > { %1314 = vmatpush.bf16.msrb.mxu2 %v3424_v12  ;;  %v9148_v12 = vld [vmem:[#allocation20_spill] sm:$0xff] }
 0x30d   : > { %v900_v19 = vmul.f32 %v4366_v6, %v899_v22  ;;  %v9145_v22 = vld [vmem:[#allocation231_spill] sm:$0xff] }
 0x30f   : > { %v901_v9 = vadd.f32 %v4366_v6, %v900_v19  ;;  %v3404_v19 = vor.u32 %v9146_v11, %v9145_v22 }
 0x310   : > { %1315 = vmatpush.bf16.msrb.mxu2 %v3420_v28 }
 0x311   : > { %v905_v26 = vsel %vm904_vm10, %v4366_v6, %v901_v9  ;;  %v9144_v6 = vld [vmem:[#allocation234_spill] sm:$0xff] }
 0x312   : > { %v910_v7 = vsel %vm907_vm11, %v909_v13, %v905_v26  ;;  %v3408_v0 = vor.u32 %v9144_v6, %v9143_v3  ;;  %v9150_v3 = vld [vmem:[#allocation22_spill] sm:$0xff] }
 0x313   : > { %v7766_v5 = vmul.f32 %v7763_v2, %v910_v7  }
 0x314   : > { %1316 = vmatpush.bf16.msrb.mxu2 %v3416_v35 }
 0x315   : > { %v7770_v18 = vpack.c.bf16 %v7766_v5, %v7766_v5 }
 0x317   : > { %1166 = vmatmul.bf16.vlgmr.msra.gmra.mxu0 %v7770_v18  ;;  %1179 = vmatmul.bf16.vlgmr.msra.gmra.mxu1 %v7770_v18 }
 0x318   : > { %1192 = vmatmul.bf16.vlgmr.msra.gmra.mxu2 %v7770_v18  ;;  %1205 = vmatmul.bf16.vlgmr.msra.gmra.mxu3 %v7770_v18 }
 0x319   : > { %1317 = vmatpush.bf16.msrb.mxu2 %v3412_v10 }
 0x31d   : > { %1318 = vmatpush.bf16.msrb.mxu2 %v3408_v0 }
 0x321   : > { %1319 = vmatpush.bf16.msrb.mxu2 %v3404_v19 }
 0x327   : > { %1218 = vmatmul.bf16.vlgmr.msrb.gmra.mxu0 %v7770_v18  ;;  %1231 = vmatmul.bf16.vlgmr.msrb.gmra.mxu1 %v7770_v18 }
 0x394   : > { %v1167_v9 = vpop.f32.mrf.mxu0  ;;  %v7801_v13 = vpop.f32.mrf.mxu1 }
 0x395   : > { %v1239_v26 = vadd.f32 %v1238_v20, %v1167_v9  ;;  %v1333_v7 = vperm.slane %v7801_v13, 0  ;;  %v1329_v17 = vrot.slane %v7801_v13, 4  ;;  %v1327_v34 = vrot.slane %v7801_v13, 2 }
 0x396   : > { %v1326_v33 = vrot.slane %v7801_v13, 1  ;;  %v1330_v24 = vrot.slane %v7801_v13, 5  ;;  %v1328_v15 = vrot.slane %v7801_v13, 3  ;;  %v1331_v0 = vrot.slane %v7801_v13, 6 }
 0x397   : > { %v3400_v25 = vmul.f32 -1.442695, %v1239_v26  ;;  %v1349_v16 = vadd.f32 %v1333_v7, %v9148_v12  ;;  %v1337_v23 = vperm.slane %v1329_v17, 0  ;;  %v1335_v28 = vperm.slane %v1327_v34, 0  ;;  %v9151_v26 = vld [vmem:[#allocation21_spill] sm:$0xff] }
 0x398   : > { %v1334_v29 = vperm.slane %v1326_v33, 0  ;;  %v1338_v32 = vperm.slane %v1330_v24, 0  ;;  %v1336_v35 = vperm.slane %v1328_v15, 0 }
 0x399   : > { %4369 = vpow2.f32 %v3400_v25  ;;  %v1357_v4 = vmax.f32 %v1349_v16, 0.0  ;;  %v1353_v10 = vadd.f32 %v1337_v23, %v9149_v14  ;;  %v1351_v6 = vadd.f32 %v1335_v28, %v9150_v3  ;;  %v9153_v25 = vld [vmem:[#allocation23_spill] sm:$0xff] }
 0x39a   : > { %v1350_v7 = vadd.f32 %v1334_v29, %v9151_v26  ;;  %v1354_v33 = vadd.f32 %v1338_v32, %v9152_v30  ;;  %v1352_v12 = vadd.f32 %v1336_v35, %v9153_v25  ;;  %v1332_v16 = vrot.slane %v7801_v13, 7 }
 0x39b   : > { %v7816_v22 = vpop.f32.mrf.mxu2  ;;  %v7818_v11 = vpop.f32.mrf.mxu3  ;;  %v1368_v19 = vmul.f32 %v7807_v31, %v1357_v4  ;;  %v1361_v20 = vmax.f32 %v1353_v10, 0.0  ;;  %v1359_v9 = vmax.f32 %v1351_v6, 0.0  ;;  %v1339_v4 = vperm.slane %v1331_v0, 0 }
 0x39c   : > { %v1169_v17 = vpop.f32.mrf.mxu0  ;;  %v1182_v34 = vpop.f32.mrf.mxu1  ;;  %v1358_v28 = vmax.f32 %v1350_v7, 0.0  ;;  %v1362_v29 = vmax.f32 %v1354_v33, 0.0  ;;  %v1360_v10 = vmax.f32 %v1352_v12, 0.0  ;;  %v1340_v3 = vperm.slane %v1332_v16, 0  ;;  %v9155_v7 = vld [vmem:[#allocation27_spill] sm:$0xff] }
 0x39d   : > { %1376 = vadd.xlane.f32.xlu0 %v1368_v19  ;;  %v1372_v24 = vmul.f32 %v7807_v31, %v1361_v20  ;;  %v1370_v15 = vmul.f32 %v7807_v31, %v1359_v9  ;;  %v9154_v20 = vld [vmem:[#allocation26_spill] sm:$0xff] }
 0x39e   : > { %v1369_v19 = vmul.f32 %v7807_v31, %v1358_v28  ;;  %v1355_v9 = vadd.f32 %v1339_v4, %v9154_v20  ;;  %v1373_v17 = vmul.f32 %v7807_v31, %v1362_v29  ;;  %v1371_v0 = vmul.f32 %v7807_v31, %v1360_v10 }
 0x39f   : > { %v4370_v23 = vpop.eup %4369  ;;  %1384 = vadd.xlane.f32.xlu2 %v1372_v24  ;;  %1380 = vadd.xlane.f32.xlu1 %v1370_v15  ;;  %v1356_v34 = vadd.f32 %v1340_v3, %v9155_v7 }
 0x3a0   : > { %v1243_v14 = vadd.f32 1.0, %v4370_v23  ;;  %v1363_v30 = vmax.f32 %v1355_v9, 0.0 }
 0x3a1   : > { %v1364_v15 = vmax.f32 %v1356_v34, 0.0  ;;  %v9156_v34 = vlaneseq }
 0x3a2   : > { %4371 = vrcp.f32 %v1243_v14  ;;  %v1374_v12 = vmul.f32 %v7807_v31, %v1363_v30  ;;  %v1255_v28 = vand.u32 2147483648, %v1243_v14  ;;  %v1253_v10 = vand.u32 2147483647, %v1243_v14 }
 0x3a3   : > { %v1195_v32 = vpop.f32.mrf.mxu2  ;;  %v1208_v6 = vpop.f32.mrf.mxu3  ;;  %v1375_v29 = vmul.f32 %v7807_v31, %v1364_v15  ;;  %vm1249_vm13 = vweird.f32 %v1243_v14  ;;  %v7844_v30 = vand.u32 127, %v9156_v34 }
 0x3a4   : > { %v7829_v26 = vpop.f32.mrf.mxu0  ;;  %v7831_v35 = vpop.f32.mrf.mxu1  ;;  %v1256_v32 = vor.u32 1.1754944e-38, %v1255_v28  ;;  %vm1254_vm15 = vcmp.eq.f32.partialorder %v1253_v10, 8.507059e+37 }
 0x3a5   : > { %1378 = vadd.xlane.f32.xlu0 %v1369_v19 }
 0x3a7   : > { %1386 = vadd.xlane.f32.xlu2 %v1373_v17  ;;  %1382 = vadd.xlane.f32.xlu1 %v1371_v0 }
 0x3a8   : > { %v4372_v33 = vpop.eup %4371 }
 0x3a9   : > { %v1245_v24 = vmul.f32 %v4372_v33, %v1243_v14  ;;  %vm1250_vm12 = vweird.f32 %v4372_v33 }
 0x3aa   : > { %vm1251_vm14 = vmor %vm1249_vm13, %vm1250_vm12 }
 0x3ab   : > { %v1246_v25 = vsub.f32 1.0, %v1245_v24 }
 0x3ac   : > { %v1221_v16 = vpop.f32.mrf.mxu0  ;;  %v1234_v23 = vpop.f32.mrf.mxu1 }
 0x3ad   : > { %v1247_v4 = vmul.f32 %v4372_v33, %v1246_v25  ;;  %1388 = vadd.xlane.f32.xlu0 %v1374_v12 }
 0x3af   : > { %1390 = vadd.xlane.f32.xlu1 %v1375_v29  ;;  %v1248_v3 = vadd.f32 %v4372_v33, %v1247_v4 }
 0x3b1   : > { %v1252_v6 = vsel %vm1251_vm14, %v4372_v33, %v1248_v3 }
 0x3b2   : > { %v1257_v19 = vsel %vm1254_vm15, %v1256_v32, %v1252_v6 }
 0x3b3   : > { %v7839_v20 = vmul.f32 %v7763_v2, %v1257_v19 }
 0x3b5   : > { %v1260_v9 = vpack.c.bf16 %v7839_v20, %v7839_v20 }
 0x3b7   : > { %1320 = vmatmul.bf16.vlgmr.msrb.gmra.mxu2 %v1260_v9 }
 0x410   : > { %v1377_v17 = vpop.xlane.xlu0 %1376 }
 0x411   : > { %v1407_v24 = vperm.slane %v1377_v17, %v7844_v30 }
 0x412   : > { %v1381_v0 = vpop.xlane.xlu1 %1380  ;;  %v1385_v7 = vpop.xlane.xlu2 %1384 }
 0x413   : > { %v1409_v2 = vperm.slane %v1381_v0, %v7844_v30  ;;  %v1411_v23 = vperm.slane %v1385_v7, %v7844_v30 }
 0x418   : > { %v1379_v14 = vpop.xlane.xlu0 %1378 }
 0x419   : > { %v1408_v33 = vperm.slane %v1379_v14, %v7844_v30 }
 0x41a   : > { %v1383_v15 = vpop.xlane.xlu1 %1382  ;;  %v1387_v28 = vpop.xlane.xlu2 %1386 }
 0x41b   : > { %v1416_v25 = vsel %vm1415_vm0, %v1408_v33, %v1407_v24  ;;  %v1410_v12 = vperm.slane %v1383_v15, %v7844_v30  ;;  %v1412_v10 = vperm.slane %v1387_v28, %v7844_v30 }
 0x41c   : > { %v1418_v16 = vsel %vm1417_vm1, %v1409_v2, %v1416_v25  ;;  %v9157_v2 = vld [vmem:[#allocation247_spill] sm:$0xff] }
 0x41d   : > { %v1420_v4 = vsel %vm1419_vm2, %v1410_v12, %v1418_v16  ;;  %v1262_v25 = vperm.slane %v9157_v2, 0 }
 0x41e   : > { %v1422_v29 = vsel %vm1421_vm3, %v1411_v23, %v1420_v4 }
 0x41f   : > { %v1424_v19 = vsel %vm1423_vm4, %v1412_v10, %v1422_v29 }
 0x420   : > { %v1389_v3 = vpop.xlane.xlu0 %1388 }
 0x421   : > { %v1413_v32 = vperm.slane %v1389_v3, %v7844_v30 }
 0x422   : > { %v1391_v6 = vpop.xlane.xlu1 %1390 }
 0x423   : > { %v1414_v9 = vperm.slane %v1391_v6, %v7844_v30  ;;  %v1426_v34 = vsel %vm1425_vm5, %v1413_v32, %v1424_v19 }
 0x425   : > { %v1428_v24 = vsel %vm1427_vm6, %v1414_v9, %v1426_v34 }
 0x426   : > { %v1431_v33 = vsel %vm1430_vm7, %v1428_v24, -inf }
 0x427   : > { %1432 = vmax.xlane.f32.xlu0 %v1431_v33 }
 0x43a   : > { %v1321_v12 = vpop.f32.mrf.mxu2 }
 0x43b   : > { %v1322_v16 = vadd.f32 %v1321_v12, %v1262_v25 }
 0x43d   : > { %v1392_v23 = vadd.f32 %v1322_v16, %v7801_v13 }
 0x43f   : > { %v1393_v4 = vmax.f32 %v1392_v23, 0.0 }
 0x441   : > { %v1394_v29 = vmul.f32 %v1393_v4, %v7807_v31 }
 0x442   : > { %v1323_v10 = vpop.f32.mrf.mxu2 }
 0x443   : > { %1395 = vadd.xlane.f32.xlu2 %v1394_v29 }
 0x49a   : > { %v1433_v32 = vpop.xlane.xlu0 %1432 }
 0x4b6   : > { %v7865_v19 = vpop.xlane.xlu2 %1395 }
 0x4b7   : > { %v7868_v9 = vmax.f32 %v1433_v32, %v7865_v19 }
 0x4b9   : > { %v1438_v34 = vperm.slane %v7868_v9, 2  ;;  %v1437_v24 = vperm.slane %v7868_v9, 1  ;;  %v1436_v13 = vperm.slane %v7868_v9, 0  ;;  %v1439_v25 = vperm.slane %v7868_v9, 3 }
 0x4ba   : > { %v1440_v12 = vperm.slane %v7868_v9, 4  ;;  %v1441_v32 = vperm.slane %v7868_v9, 5 }
 0x4bb   : > { %v1454_v33 = vsub.f32 %v1381_v0, %v1438_v34  ;;  %v1453_v31 = vsub.f32 %v1379_v14, %v1437_v24  ;;  %v1452_v2 = vsub.f32 %v1377_v17, %v1436_v13  ;;  %v1455_v4 = vsub.f32 %v1383_v15, %v1439_v25 }
 0x4bc   : > { %v1456_v29 = vsub.f32 %v1385_v7, %v1440_v12  ;;  %v1442_v17 = vperm.slane %v7868_v9, 6  ;;  %v1457_v7 = vsub.f32 %v1387_v28, %v1441_v32  ;;  %v1443_v13 = vperm.slane %v7868_v9, 7 }
 0x4bd   : > { %v1464_v36 = vmul.f32 1.442695, %v1454_v33  ;;  %v1462_v16 = vmul.f32 1.442695, %v1453_v31  ;;  %v1460_v23 = vmul.f32 1.442695, %v1452_v2 }
 0x4be   : > { %v1466_v10 = vmul.f32 1.442695, %v1455_v4  ;;  %v1468_v0 = vmul.f32 1.442695, %v1456_v29  ;;  %v1458_v15 = vsub.f32 %v1389_v3, %v1442_v17  ;;  %v1470_v24 = vmul.f32 1.442695, %v1457_v7 }
 0x4bf   : > { %4373 = vpow2.f32 %v1464_v36  ;;  %v1459_v25 = vsub.f32 %v1391_v6, %v1443_v13  ;;  %v9159_v4 = vld [vmem:[#allocation264_spill] sm:$0xff]  ;;  %v9160_v6 = vld [vmem:[#allocation261_spill] sm:$0xff] }
 0x4c0   : > { %4375 = vpow2.f32 %v1462_v16  ;;  %v1472_v33 = vmul.f32 1.442695, %v1458_v15 }
 0x4c1   : > { %4377 = vpow2.f32 %v1460_v23  ;;  %v1474_v12 = vmul.f32 1.442695, %v1459_v25  ;;  %v9158_v23 = vld [vmem:[#allocation263_spill] sm:$0xff] }
 0x4c2   : > { %4379 = vpow2.f32 %v1466_v10  ;;  %v3464_v29 = vor.u32 %v9159_v4, %v9158_v23  ;;  %v9161_v10 = vld [vmem:[#allocation262_spill] sm:$0xff] }
 0x4c3   : > { %4381 = vpow2.f32 %v1468_v0  ;;  %v3460_v32 = vor.u32 %v9161_v10, %v9160_v6 }
 0x4c4   : > { %4383 = vpow2.f32 %v1470_v24  ;;  %1625 = vmatpush.bf16.msrb.mxu3 %v3464_v29 }
 0x4c5   : > { %v7876_v37 = vpop.eup %4373  ;;  %4385 = vpow2.f32 %v1472_v33 }
 0x4c6   : > { %v7879_v14 = vpop.eup %4375  ;;  %1494 = vperm.xlu0 %4352, %v7876_v37   ;;  %4387 = vpow2.f32 %v1474_v12 }
 0x4c7   : > { %v7882_v34 = vpop.eup %4377  ;;  %1491 = vperm.xlu2 %4351, %v7879_v14  }
 0x4c8   : > { %1488 = vperm.xlu1 %4350, %v7882_v34   ;;  %v7887_v31 = vpop.eup %4379  ;;  %1626 = vmatpush.bf16.msrb.mxu3 %v3460_v32 }
 0x4c9   : > { %v7889_v2 = vpop.eup %4381 }
 0x4ca   : > { %v7893_v36 = vpop.eup %4383 }
 0x4cb   : > { %v7895_v28 = vpop.eup %4385 }
 0x4cc   : > { %v7899_v3 = vpop.eup %4387 }
 0x4cf   : > { %1497 = vperm.xlu2 %4351, %v7887_v31  }
 0x4d0   : > { %1500 = vperm.xlu1 %4350, %v7889_v2  }
 0x4d7   : > { %1503 = vperm.xlu2 %4351, %v7893_v36  }
 0x4d8   : > { %1506 = vperm.xlu1 %4350, %v7895_v28  }
 0x4df   : > { %1509 = vperm.xlu2 %4351, %v7899_v3  }
 0x521   : > { %v1492_v16 = vpop.permute.xlu2 %1491 }
 0x522   : > { %v1512_v13 = vperm.slane %v1492_v16, %v7844_v30 }
 0x529   : > { %v1498_v0 = vpop.permute.xlu2 %1497 }
 0x52a   : > { %v1514_v29 = vperm.slane %v1498_v0, %v7844_v30 }
 0x531   : > { %v1504_v24 = vpop.permute.xlu2 %1503 }
 0x538   : > { %v1495_v7 = vpop.permute.xlu0 %1494 }
 0x539   : > { %v1513_v33 = vperm.slane %v1495_v7, %v7844_v30  ;;  %v1510_v10 = vpop.permute.xlu2 %1509 }
 0x53a   : > { %v1489_v17 = vpop.permute.xlu1 %1488  ;;  %v1518_v7 = vperm.slane %v1510_v10, %v7844_v30  ;;  %v1476_v10 = vsub.f32 %v7865_v19, %v7868_v9 }
 0x53b   : > { %v1511_v15 = vperm.slane %v1489_v17, %v7844_v30  ;;  %v1516_v17 = vperm.slane %v1504_v24, %v7844_v30  ;;  %v9165_v24 = vld [vmem:[#allocation258_spill] sm:$0xff] }
 0x53d   : > { %v1519_v25 = vsel %vm1415_vm0, %v1512_v13, %v1511_v15 }
 0x53e   : > { %v1520_v23 = vsel %vm1417_vm1, %v1513_v33, %v1519_v25  ;;  %v9162_v25 = vld [vmem:[#allocation259_spill] sm:$0xff] }
 0x53f   : > { %v1521_v6 = vsel %vm1419_vm2, %v1514_v29, %v1520_v23 }
 0x542   : > { %v1501_v12 = vpop.permute.xlu1 %1500 }
 0x543   : > { %v1515_v4 = vperm.slane %v1501_v12, %v7844_v30  ;;  %v9163_v12 = vld [vmem:[#allocation260_spill] sm:$0xff] }
 0x544   : > { %v3456_v23 = vor.u32 %v9163_v12, %v9162_v25  ;;  %v9173_v25 = vld [vmem:[#allocation250_spill] sm:$0xff] }
 0x545   : > { %v1522_v32 = vsel %vm1421_vm3, %v1515_v4, %v1521_v6  ;;  %v9164_v4 = vld [vmem:[#allocation257_spill] sm:$0xff]  ;;  %v9167_v6 = vld [vmem:[#allocation256_spill] sm:$0xff] }
 0x546   : > { %v1523_v15 = vsel %vm1423_vm4, %v1516_v17, %v1522_v32  ;;  %1627 = vmatpush.bf16.msrb.mxu3 %v3456_v23  ;;  %v3452_v29 = vor.u32 %v9165_v24, %v9164_v4  ;;  %v9168_v32 = vld [vmem:[#allocation253_spill] sm:$0xff]  ;;  %v9169_v17 = vld [vmem:[#allocation254_spill] sm:$0xff] }
 0x54a   : > { %v1507_v38 = vpop.permute.xlu1 %1506  ;;  %1628 = vmatpush.bf16.msrb.mxu3 %v3452_v29 }
 0x54b   : > { %v1517_v16 = vperm.slane %v1507_v38, %v7844_v30  ;;  %v9166_v38 = vld [vmem:[#allocation255_spill] sm:$0xff] }
 0x54c   : > { %v3448_v30 = vor.u32 %v9167_v6, %v9166_v38 }
 0x54d   : > { %v1524_v13 = vsel %vm1425_vm5, %v1517_v16, %v1523_v15  ;;  %v3444_v16 = vor.u32 %v9169_v17, %v9168_v32  ;;  %v9171_v15 = vld [vmem:[#allocation252_spill] sm:$0xff] }
 0x54e   : > { %v1525_v33 = vsel %vm1427_vm6, %v1518_v7, %v1524_v13  ;;  %1629 = vmatpush.bf16.msrb.mxu3 %v3448_v30  ;;  %v9170_v7 = vld [vmem:[#allocation251_spill] sm:$0xff] }
 0x54f   : > { %v1527_v0 = vsel %vm1430_vm7, %v1525_v33, 0.0  ;;  %v3440_v13 = vor.u32 %v9171_v15, %v9170_v7  ;;  %v1477_v33 = vmul.f32 1.442695, %v1476_v10 }
 0x550   : > { %1528 = vadd.xlane.f32.xlu1 %v1527_v0  ;;  %v9172_v0 = vld [vmem:[#allocation249_spill] sm:$0xff] }
 0x551   : > { %v3436_v12 = vor.u32 %v9173_v25, %v9172_v0  ;;  %4389 = vpow2.f32 %v1477_v33 }
 0x552   : > { %1630 = vmatpush.bf16.msrb.mxu3 %v3444_v16 }
 0x556   : > { %1631 = vmatpush.bf16.msrb.mxu3 %v3440_v13 }
 0x557   : > { %v4390_v23 = vpop.eup %4389 }
 0x55a   : > { %1632 = vmatpush.bf16.msrb.mxu3 %v3436_v12 }
 0x5c3   : > { %v1529_v4 = vpop.xlane.xlu1 %1528 }
 0x5c4   : > { %v1530_v24 = vadd.f32 %v4390_v23, %v1529_v4 }
 0x5c6   : > { %4391 = vrcp.f32 %v1530_v24  ;;  %v1542_v38 = vand.u32 2147483648, %v1530_v24  ;;  %v1540_v30 = vand.u32 2147483647, %v1530_v24  ;;  %vm1536_vm9 = vweird.f32 %v1530_v24 }
 0x5c8   : > { %v1543_v10 = vor.u32 1.1754944e-38, %v1542_v38  ;;  %vm1541_vm11 = vcmp.eq.f32.partialorder %v1540_v30, 8.507059e+37 }
 0x5cc   : > { %v4392_v29 = vpop.eup %4391 }
 0x5cd   : > { %v1532_v19 = vmul.f32 %v4392_v29, %v1530_v24  ;;  %vm1537_vm8 = vweird.f32 %v4392_v29 }
 0x5ce   : > { %vm1538_vm10 = vmor %vm1536_vm9, %vm1537_vm8 }
 0x5cf   : > { %v1533_v9 = vsub.f32 1.0, %v1532_v19 }
 0x5d1   : > { %v1534_v6 = vmul.f32 %v4392_v29, %v1533_v9 }
 0x5d3   : > { %v1535_v32 = vadd.f32 %v4392_v29, %v1534_v6 }
 0x5d5   : > { %v1539_v17 = vsel %vm1538_vm10, %v4392_v29, %v1535_v32 }
 0x5d6   : > { %v1544_v16 = vsel %vm1541_vm11, %v1543_v10, %v1539_v17  ;;  %v9176_v10 = vld [vmem:[#allocation382_spill] sm:$0xff] }
 0x5d7   : > { %v1549_v7 = vperm.slane %v1544_v16, 2  ;;  %v1548_v15 = vperm.slane %v1544_v16, 1  ;;  %v1571_v13 = vmul.f32 %v4390_v23, %v1544_v16  ;;  %v1550_v4 = vperm.slane %v1544_v16, 3  ;;  %v9177_v17 = vld [vmem:[#allocation378_spill] sm:$0xff] }
 0x5d8   : > { %v1547_v24 = vperm.slane %v1544_v16, 0  ;;  %v1552_v9 = vperm.slane %v1544_v16, 5  ;;  %v1551_v23 = vperm.slane %v1544_v16, 4  ;;  %v1553_v38 = vperm.slane %v1544_v16, 6 }
 0x5d9   : > { %v1565_v33 = vmul.f32 %v7876_v37, %v1549_v7  ;;  %v1564_v0 = vmul.f32 %v7879_v14, %v1548_v15  ;;  %v1572_v25 = vmul.f32 %v1571_v13, %v7839_v20  ;;  %v1566_v19 = vmul.f32 %v7887_v31, %v1550_v4  ;;  %v9174_v31 = vld [vmem:[#allocation390_spill] sm:$0xff] }
 0x5da   : > { %v1563_v29 = vmul.f32 %v7882_v34, %v1547_v24  ;;  %v1568_v37 = vmul.f32 %v7893_v36, %v1552_v9  ;;  %v1567_v14 = vmul.f32 %v7889_v2, %v1551_v23  ;;  %v1554_v20 = vperm.slane %v1544_v16, 7  ;;  %v9175_v34 = vld [vmem:[#allocation386_spill] sm:$0xff]  ;;  %v9178_v36 = vld [vmem:[#allocation323_spill] sm:$0xff] }
 0x5db   : > { %1650 = vperm.xlu2 %4351, %v1565_v33   ;;  %1645 = vperm.xlu0 %4352, %v1564_v0   ;;  %v1573_v12 = vpack.c.bf16 %v1572_v25, %v1572_v25  ;;  %v1569_v30 = vmul.f32 %v7895_v28, %v1553_v38  ;;  %v3712_v32 = vor.u32 %v9175_v34, %v9174_v31  ;;  %v9179_v2 = vld [vmem:[#allocation327_spill] sm:$0xff]  ;;  %v9180_v13 = vld [vmem:[#allocation326_spill] sm:$0xff] }
 0x5dc   : > { %v1570_v6 = vmul.f32 %v7899_v3, %v1554_v20  ;;  %v3696_v7 = vor.u32 %v9177_v17, %v9176_v10  ;;  %v3580_v15 = vor.u32 %v9179_v2, %v9178_v36  ;;  %v9181_v33 = vld [vmem:[#allocation322_spill] sm:$0xff]  ;;  %v9182_v3 = vld [vmem:[#allocation387_spill] sm:$0xff] }
 0x5dd   : > { %1633 = vmatmul.bf16.vlgmr.msrb.gmra.mxu3 %v1573_v12  ;;  %v3584_v16 = vor.u32 %v9181_v33, %v9180_v13  ;;  %v9183_v28 = vld [vmem:[#allocation391_spill] sm:$0xff]  ;;  %v9184_v25 = vld [vmem:[#allocation374_spill] sm:$0xff] }
 0x5de   : > { %2141 = vmatpush.bf16.msra.mxu3 %v3712_v32  ;;  %2102 = vmatpush.bf16.msra.mxu0 %v3580_v15  ;;  %v3708_v0 = vor.u32 %v9183_v28, %v9182_v3  ;;  %v9185_v12 = vld [vmem:[#allocation370_spill] sm:$0xff]  ;;  %v9186_v24 = vld [vmem:[#allocation315_spill] sm:$0xff] }
 0x5df   : > { %2128 = vmatpush.bf16.msra.mxu2 %v3584_v16  ;;  %v3680_v4 = vor.u32 %v9185_v12, %v9184_v25  ;;  %v9188_v9 = vld [vmem:[#allocation318_spill] sm:$0xff]  ;;  %v9191_v20 = vld [vmem:[#allocation383_spill] sm:$0xff] }
 0x5e0   : > { %2115 = vmatpush.bf16.msra.mxu1 %v3708_v0  ;;  %v9189_v23 = vld [vmem:[#allocation314_spill] sm:$0xff]  ;;  %v9194_v34 = vld [vmem:[#allocation307_spill] sm:$0xff] }
 0x5e1   : > { %v9195_v32 = vld [vmem:[#allocation311_spill] sm:$0xff]  ;;  %v9196_v17 = vld [vmem:[#allocation310_spill] sm:$0xff] }
 0x5e2   : > { %2142 = vmatpush.bf16.msra.mxu3 %v3696_v7  ;;  %v3548_v10 = vor.u32 %v9195_v32, %v9194_v34  ;;  %v9197_v7 = vld [vmem:[#allocation306_spill] sm:$0xff]  ;;  %v9198_v2 = vld [vmem:[#allocation371_spill] sm:$0xff] }
 0x5e3   : > { %1655 = vperm.xlu2 %4351, %v1566_v19   ;;  %1640 = vperm.xlu0 %4352, %v1563_v29   ;;  %v9187_v19 = vld [vmem:[#allocation319_spill] sm:$0xff]  ;;  %v3552_v36 = vor.u32 %v9197_v7, %v9196_v17  ;;  %v9200_v33 = vld [vmem:[#allocation358_spill] sm:$0xff] }
 0x5e4   : > { %v3564_v29 = vor.u32 %v9187_v19, %v9186_v24  ;;  %v9199_v15 = vld [vmem:[#allocation375_spill] sm:$0xff]  ;;  %v9201_v16 = vld [vmem:[#allocation354_spill] sm:$0xff] }
 0x5e5   : > { %v3676_v13 = vor.u32 %v9199_v15, %v9198_v2  ;;  %v3648_v3 = vor.u32 %v9201_v16, %v9200_v33  ;;  %v9202_v28 = vld [vmem:[#allocation299_spill] sm:$0xff]  ;;  %v9204_v12 = vld [vmem:[#allocation302_spill] sm:$0xff] }
 0x5e6   : > { %2143 = vmatpush.bf16.msra.mxu3 %v3680_v4  ;;  %2103 = vmatpush.bf16.msra.mxu0 %v3564_v29  ;;  %v9203_v0 = vld [vmem:[#allocation303_spill] sm:$0xff]  ;;  %v9205_v4 = vld [vmem:[#allocation298_spill] sm:$0xff] }
 0x5e7   : > { %v3532_v25 = vor.u32 %v9203_v0, %v9202_v28  ;;  %v3536_v24 = vor.u32 %v9205_v4, %v9204_v12  ;;  %v9206_v19 = vld [vmem:[#allocation363_spill] sm:$0xff]  ;;  %v9217_v2 = vld [vmem:[#allocation338_spill] sm:$0xff] }
 0x5e8   : > { %v9207_v29 = vld [vmem:[#allocation367_spill] sm:$0xff]  ;;  %v9221_v28 = vld [vmem:[#allocation282_spill] sm:$0xff] }
 0x5e9   : > { %v9215_v17 = vld [vmem:[#allocation359_spill] sm:$0xff] }
 0x5ea   : > { %2104 = vmatpush.bf16.msra.mxu0 %v3548_v10  ;;  %v9214_v10 = vld [vmem:[#allocation355_spill] sm:$0xff] }
 0x5eb   : > { %1665 = vperm.xlu2 %4351, %v1568_v37   ;;  %1660 = vperm.xlu0 %4352, %v1567_v14   ;;  %v3568_v37 = vor.u32 %v9189_v23, %v9188_v9  ;;  %v9190_v14 = vld [vmem:[#allocation379_spill] sm:$0xff]  ;;  %v3660_v9 = vor.u32 %v9207_v29, %v9206_v19  ;;  %v9208_v23 = vld [vmem:[#allocation350_spill] sm:$0xff]  ;;  %v3644_v7 = vor.u32 %v9215_v17, %v9214_v10 }
 0x5ec   : > { %v3692_v38 = vor.u32 %v9191_v20, %v9190_v14  ;;  %v9210_v20 = vld [vmem:[#allocation291_spill] sm:$0xff]  ;;  %v9225_v19 = vld [vmem:[#allocation330_spill] sm:$0xff] }
 0x5ed   : > { %2129 = vmatpush.bf16.msra.mxu2 %v3568_v37  ;;  %v9209_v37 = vld [vmem:[#allocation346_spill] sm:$0xff]  ;;  %v9219_v33 = vld [vmem:[#allocation287_spill] sm:$0xff] }
 0x5ee   : > { %2116 = vmatpush.bf16.msra.mxu1 %v3692_v38  ;;  %2105 = vmatpush.bf16.msra.mxu0 %v3532_v25  ;;  %v3632_v14 = vor.u32 %v9209_v37, %v9208_v23  ;;  %v9211_v38 = vld [vmem:[#allocation295_spill] sm:$0xff]  ;;  %v9227_v23 = vld [vmem:[#allocation388_spill] sm:$0xff] }
 0x5ef   : > { %v9222_v25 = vld [vmem:[#allocation347_spill] sm:$0xff] }
 0x5f0   : > { %v9223_v12 = vld [vmem:[#allocation351_spill] sm:$0xff] }
 0x5f1   : > { %2130 = vmatpush.bf16.msra.mxu2 %v3552_v36  ;;  %v9216_v36 = vld [vmem:[#allocation342_spill] sm:$0xff]  ;;  %v3628_v4 = vor.u32 %v9223_v12, %v9222_v25  ;;  %v9233_v10 = vld [vmem:[#allocation343_spill] sm:$0xff]  ;;  %v9240_v25 = vld [vmem:[#allocation325_spill] sm:$0xff] }
 0x5f2   : > { %2117 = vmatpush.bf16.msra.mxu1 %v3676_v13  ;;  %v3616_v15 = vor.u32 %v9217_v2, %v9216_v36  ;;  %v9218_v13 = vld [vmem:[#allocation283_spill] sm:$0xff]  ;;  %v9235_v36 = vld [vmem:[#allocation380_spill] sm:$0xff]  ;;  %v9241_v12 = vld [vmem:[#allocation329_spill] sm:$0xff] }
 0x5f3   : > { %1675 = vperm.xlu2 %4351, %v1570_v6   ;;  %1670 = vperm.xlu0 %4352, %v1569_v30   ;;  %v9192_v6 = vld [vmem:[#allocation366_spill] sm:$0xff]  ;;  %v3500_v16 = vor.u32 %v9219_v33, %v9218_v13  ;;  %v9236_v13 = vld [vmem:[#allocation267_spill] sm:$0xff] }
 0x5f4   : > { %v9193_v30 = vld [vmem:[#allocation362_spill] sm:$0xff]  ;;  %v9237_v33 = vld [vmem:[#allocation271_spill] sm:$0xff] }
 0x5f5   : > { %v3664_v31 = vor.u32 %v9193_v30, %v9192_v6  ;;  %2131 = vmatpush.bf16.msra.mxu2 %v3536_v24  ;;  %v3516_v6 = vor.u32 %v9211_v38, %v9210_v20  ;;  %v9212_v30 = vld [vmem:[#allocation294_spill] sm:$0xff]  ;;  %v9229_v20 = vld [vmem:[#allocation279_spill] sm:$0xff] }
 0x5f6   : > { %2118 = vmatpush.bf16.msra.mxu1 %v3660_v9  ;;  %v9224_v24 = vld [vmem:[#allocation334_spill] sm:$0xff]  ;;  %v9226_v9 = vld [vmem:[#allocation392_spill] sm:$0xff] }
 0x5f7   : > { %2144 = vmatpush.bf16.msra.mxu3 %v3664_v31  ;;  %v9213_v31 = vld [vmem:[#allocation290_spill] sm:$0xff]  ;;  %2106 = vmatpush.bf16.msra.mxu0 %v3516_v6  ;;  %v3600_v29 = vor.u32 %v9225_v19, %v9224_v24  ;;  %v3720_v37 = vor.u32 %v9227_v23, %v9226_v9  ;;  %v9242_v24 = vld [vmem:[#allocation328_spill] sm:$0xff]  ;;  %v9244_v9 = vld [vmem:[#allocation331_spill] sm:$0xff] }
 0x5f8   : > { %v3520_v34 = vor.u32 %v9213_v31, %v9212_v30  ;;  %v9230_v6 = vld [vmem:[#allocation278_spill] sm:$0xff]  ;;  %v9243_v19 = vld [vmem:[#allocation324_spill] sm:$0xff]  ;;  %v9245_v23 = vld [vmem:[#allocation335_spill] sm:$0xff] }
 0x5f9   : > { %v9231_v30 = vld [vmem:[#allocation274_spill] sm:$0xff] }
 0x5fa   : > { %2132 = vmatpush.bf16.msra.mxu2 %v3520_v34  ;;  %2119 = vmatpush.bf16.msra.mxu1 %v3644_v7  ;;  %v3488_v31 = vor.u32 %v9231_v30, %v9230_v6  ;;  %v9232_v34 = vld [vmem:[#allocation339_spill] sm:$0xff]  ;;  %v9234_v7 = vld [vmem:[#allocation384_spill] sm:$0xff] }
 0x5fb   : > { %2145 = vmatpush.bf16.msra.mxu3 %v3648_v3  ;;  %v9220_v3 = vld [vmem:[#allocation286_spill] sm:$0xff]  ;;  %2107 = vmatpush.bf16.msra.mxu0 %v3500_v16  ;;  %v3612_v17 = vor.u32 %v9233_v10, %v9232_v34  ;;  %v3704_v2 = vor.u32 %v9235_v36, %v9234_v7  ;;  %v3468_v16 = vor.u32 %v9237_v33, %v9236_v13  ;;  %v9248_v6 = vld [vmem:[#allocation376_spill] sm:$0xff]  ;;  %v9250_v34 = vld [vmem:[#allocation317_spill] sm:$0xff] }
 0x5fc   : > { %v3504_v0 = vor.u32 %v9221_v28, %v9220_v3  ;;  %v9238_v3 = vld [vmem:[#allocation270_spill] sm:$0xff]  ;;  %v9249_v30 = vld [vmem:[#allocation372_spill] sm:$0xff]  ;;  %v9251_v10 = vld [vmem:[#allocation321_spill] sm:$0xff] }
 0x5fd   : > { %v9239_v28 = vld [vmem:[#allocation266_spill] sm:$0xff]  ;;  %v9252_v7 = vld [vmem:[#allocation320_spill] sm:$0xff]  ;;  %v9254_v13 = vld [vmem:[#allocation381_spill] sm:$0xff] }
 0x5fe   : > { %2133 = vmatpush.bf16.msra.mxu2 %v3504_v0  ;;  %2120 = vmatpush.bf16.msra.mxu1 %v3628_v4  ;;  %v3472_v0 = vor.u32 %v9239_v28, %v9238_v3  ;;  %v3588_v4 = vor.u32 %v9241_v12, %v9240_v25  ;;  %v9253_v36 = vld [vmem:[#allocation316_spill] sm:$0xff]  ;;  %v9255_v33 = vld [vmem:[#allocation385_spill] sm:$0xff] }
 0x5ff   : > { %2146 = vmatpush.bf16.msra.mxu3 %v3632_v14  ;;  %v9228_v14 = vld [vmem:[#allocation275_spill] sm:$0xff]  ;;  %v9256_v3 = vld [vmem:[#allocation368_spill] sm:$0xff]  ;;  %v9258_v25 = vld [vmem:[#allocation309_spill] sm:$0xff] }
 0x600   : > { %v3484_v38 = vor.u32 %v9229_v20, %v9228_v14  ;;  %v9246_v14 = vld [vmem:[#allocation389_spill] sm:$0xff]  ;;  %v9257_v28 = vld [vmem:[#allocation364_spill] sm:$0xff] }
 0x601   : > { %v9247_v20 = vld [vmem:[#allocation393_spill] sm:$0xff] }
 0x602   : > { %2108 = vmatpush.bf16.msra.mxu0 %v3484_v38  ;;  %2134 = vmatpush.bf16.msra.mxu2 %v3488_v31  ;;  %v3716_v38 = vor.u32 %v9247_v20, %v9246_v14  ;;  %v3688_v31 = vor.u32 %v9249_v30, %v9248_v6  ;;  %v9259_v12 = vld [vmem:[#allocation313_spill] sm:$0xff]  ;;  %v9264_v20 = vld [vmem:[#allocation360_spill] sm:$0xff]  ;;  %v9266_v30 = vld [vmem:[#allocation10_spill] sm:$0xff] }
 0x603   : > { %2147 = vmatpush.bf16.msra.mxu3 %v3616_v15  ;;  %2121 = vmatpush.bf16.msra.mxu1 %v3612_v17  ;;  %v3572_v17 = vor.u32 %v9251_v10, %v9250_v34  ;;  %v9267_v10 = vld [vmem:[#allocation9_spill] sm:$0xff] }
 0x606   : > { %2109 = vmatpush.bf16.msra.mxu0 %v3468_v16  ;;  %2135 = vmatpush.bf16.msra.mxu2 %v3472_v0  ;;  %v3700_v16 = vor.u32 %v9255_v33, %v9254_v13  ;;  %v3672_v0 = vor.u32 %v9257_v28, %v9256_v3  ;;  %v9270_v13 = vld [vmem:[#allocation304_spill] sm:$0xff]  ;;  %v9272_v28 = vld [vmem:[#allocation365_spill] sm:$0xff] }
 0x607   : > { %2148 = vmatpush.bf16.msra.mxu3 %v3600_v29  ;;  %v3592_v29 = vor.u32 %v9243_v19, %v9242_v24  ;;  %v9260_v19 = vld [vmem:[#allocation312_spill] sm:$0xff] }
 0x608   : > { %v9271_v33 = vld [vmem:[#allocation300_spill] sm:$0xff] }
 0x60a   : > { %2149 = vmatmul.bf16.vlgmr.msra.gmra.mxu3 %v7535_v1  ;;  %2154 = vmatpush.bf16.msrb.mxu0 %v3588_v4  ;;  %v3556_v4 = vor.u32 %v9259_v12, %v9258_v25 }
 0x60b   : > { %2193 = vmatpush.bf16.msrb.mxu3 %v3720_v37  ;;  %v3596_v37 = vor.u32 %v9245_v23, %v9244_v9  ;;  %2180 = vmatpush.bf16.msrb.mxu2 %v3592_v29  ;;  %v9261_v29 = vld [vmem:[#allocation308_spill] sm:$0xff]  ;;  %v9262_v23 = vld [vmem:[#allocation373_spill] sm:$0xff] }
 0x60c   : > { %v3560_v9 = vor.u32 %v9261_v29, %v9260_v19  ;;  %v9276_v29 = vld [vmem:[#allocation11_spill] sm:$0xff] }
 0x60d   : > { %2122 = vmatpush.bf16.msra.mxu1 %v3596_v37  ;;  %v9263_v37 = vld [vmem:[#allocation377_spill] sm:$0xff] }
 0x60e   : > { %2155 = vmatpush.bf16.msrb.mxu0 %v3572_v17  ;;  %v3684_v14 = vor.u32 %v9263_v37, %v9262_v23  ;;  %v9277_v23 = vld [vmem:[#allocation293_spill] sm:$0xff] }
 0x60f   : > { %2194 = vmatpush.bf16.msrb.mxu3 %v3704_v2  ;;  %v3576_v2 = vor.u32 %v9253_v36, %v9252_v7  ;;  %v9268_v7 = vld [vmem:[#allocation301_spill] sm:$0xff] }
 0x610   : > { %2123 = vmatmul.bf16.vlgmr.msra.gmra.mxu1 %v7535_v1  ;;  %v9269_v36 = vld [vmem:[#allocation305_spill] sm:$0xff] }
 0x611   : > { %2167 = vmatpush.bf16.msrb.mxu1 %v3716_v38  ;;  %2181 = vmatpush.bf16.msrb.mxu2 %v3576_v2  ;;  %v9265_v38 = vld [vmem:[#allocation356_spill] sm:$0xff]  ;;  %v3540_v2 = vor.u32 %v9269_v36, %v9268_v7  ;;  %v9278_v37 = vld [vmem:[#allocation297_spill] sm:$0xff] }
 0x612   : > { %2156 = vmatpush.bf16.msrb.mxu0 %v3556_v4  ;;  %v3656_v6 = vor.u32 %v9265_v38, %v9264_v20  ;;  %v9275_v4 = vld [vmem:[#allocation348_spill] sm:$0xff] }
 0x613   : > { %2195 = vmatpush.bf16.msrb.mxu3 %v3688_v31  ;;  %v9279_v38 = vld [vmem:[#allocation296_spill] sm:$0xff] }
 0x614   : > { %v9283_v36 = vld [vmem:[#allocation344_spill] sm:$0xff] }
 0x615   : > { %2168 = vmatpush.bf16.msrb.mxu1 %v3700_v16  ;;  %2182 = vmatpush.bf16.msrb.mxu2 %v3560_v9  ;;  %v3544_v16 = vor.u32 %v9271_v33, %v9270_v13 }
 0x616   : > { %2157 = vmatpush.bf16.msrb.mxu0 %v3540_v2  ;;  %v9284_v2 = vld [vmem:[#allocation340_spill] sm:$0xff] }
 0x617   : > { %2196 = vmatpush.bf16.msrb.mxu3 %v3672_v0  ;;  %v9273_v0 = vld [vmem:[#allocation369_spill] sm:$0xff]  ;;  %v3624_v13 = vor.u32 %v9284_v2, %v9283_v36  ;;  %v9296_v2 = vld [vmem:[#allocation519_spill] sm:$0xff] }
 0x618   : > { %v3668_v25 = vor.u32 %v9273_v0, %v9272_v28  ;;  %v9285_v0 = vld [vmem:[#allocation13_spill] sm:$0xff] }
 0x619   : > { %2169 = vmatpush.bf16.msrb.mxu1 %v3684_v14  ;;  %2183 = vmatpush.bf16.msrb.mxu2 %v3544_v16  ;;  %v3524_v14 = vor.u32 %v9278_v37, %v9277_v23  ;;  %v9289_v23 = vld [vmem:[#allocation288_spill] sm:$0xff] }
 0x61a   : > { %v9290_v37 = vld [vmem:[#allocation284_spill] sm:$0xff] }
 0x61b   : > { %2197 = vmatpush.bf16.msrb.mxu3 %v3656_v6  ;;  %v9280_v6 = vld [vmem:[#allocation292_spill] sm:$0xff]  ;;  %2158 = vmatpush.bf16.msrb.mxu0 %v3524_v14 }
 0x61c   : > { %v9294_v14 = vld [vmem:[#allocation332_spill] sm:$0xff] }
 0x61d   : > { %2170 = vmatpush.bf16.msrb.mxu1 %v3668_v25 }
 0x635   : > { %v1651_v32 = vpop.permute.xlu2 %1650 }
 0x636   : > { %v1680_v31 = vmul.f32 %v1651_v32, %v9266_v30  ;;  %v9274_v32 = vld [vmem:[#allocation352_spill] sm:$0xff]  ;;  %v3528_v30 = vor.u32 %v9280_v6, %v9279_v38  ;;  %v3512_v38 = vor.u32 %v9290_v37, %v9289_v23  ;;  %v9291_v6 = vld [vmem:[#allocation349_spill] sm:$0xff] }
 0x637   : > { %v3640_v19 = vor.u32 %v9275_v4, %v9274_v32  ;;  %v9286_v32 = vld [vmem:[#allocation8_spill] sm:$0xff]  ;;  %v9288_v4 = vld [vmem:[#allocation289_spill] sm:$0xff] }
 0x638   : > { %v1698_v12 = vrot.slane %v1680_v31, 4  ;;  %2184 = vmatpush.bf16.msrb.mxu2 %v3528_v30  ;;  %v9301_v23 = vld [vmem:[#allocation276_spill] sm:$0xff] }
 0x639   : > { %2198 = vmatpush.bf16.msrb.mxu3 %v3640_v19 }
 0x63a   : > { %v1699_v33 = vadd.f32 %v1698_v12, %v1680_v31  ;;  %v9292_v31 = vld [vmem:[#allocation353_spill] sm:$0xff] }
 0x63b   : > { %v3636_v12 = vor.u32 %v9292_v31, %v9291_v6 }
 0x63c   : > { %2185 = vmatpush.bf16.msrb.mxu2 %v3512_v38  ;;  %v9305_v38 = vld [vmem:[#allocation507_spill] sm:$0xff] }
 0x63d   : > { %v1656_v15 = vpop.permute.xlu2 %1655  ;;  %2199 = vmatpush.bf16.msrb.mxu3 %v3624_v13  ;;  %v9299_v13 = vld [vmem:[#allocation281_spill] sm:$0xff] }
 0x63e   : > { %v1681_v9 = vmul.f32 %v1656_v15, %v9276_v29 }
 0x640   : > { %v1704_v15 = vrot.slane %v1681_v9, 4 }
 0x642   : > { %v1705_v39 = vadd.f32 %v1704_v15, %v1681_v9  ;;  %v9307_v9 = vld [vmem:[#allocation269_spill] sm:$0xff] }
 0x643   : > { %v9308_v15 = vld [vmem:[#allocation273_spill] sm:$0xff] }
 0x645   : > { %v1666_v24 = vpop.permute.xlu2 %1665 }
 0x646   : > { %v1683_v25 = vmul.f32 %v1666_v24, %v9285_v0  ;;  %v1700_v0 = vrot.slane %v1699_v33, 2 }
 0x648   : > { %v1716_v6 = vrot.slane %v1683_v25, 4  ;;  %v1701_v41 = vadd.f32 %v1700_v0, %v1699_v33 }
 0x64d   : > { %v1646_v34 = vpop.permute.xlu0 %1645  ;;  %v1676_v16 = vpop.permute.xlu2 %1675 }
 0x64e   : > { %v1679_v17 = vmul.f32 %v1646_v34, %v9267_v10  ;;  %v9281_v34 = vld [vmem:[#allocation357_spill] sm:$0xff] }
 0x64f   : > { %v9282_v10 = vld [vmem:[#allocation361_spill] sm:$0xff] }
 0x650   : > { %v1692_v3 = vrot.slane %v1679_v17, 4  ;;  %v3652_v7 = vor.u32 %v9282_v10, %v9281_v34  ;;  %v9293_v34 = vld [vmem:[#allocation336_spill] sm:$0xff]  ;;  %v9295_v10 = vld [vmem:[#allocation15_spill] sm:$0xff] }
 0x651   : > { %v3608_v30 = vor.u32 %v9294_v14, %v9293_v34  ;;  %v1685_v36 = vmul.f32 %v1676_v16, %v9295_v10  ;;  %v9302_v34 = vld [vmem:[#allocation341_spill] sm:$0xff] }
 0x652   : > { %v1693_v20 = vadd.f32 %v1692_v3, %v1679_v17  ;;  %2171 = vmatpush.bf16.msrb.mxu1 %v3652_v7  ;;  %v9287_v3 = vld [vmem:[#allocation285_spill] sm:$0xff] }
 0x653   : > { %v3508_v19 = vor.u32 %v9288_v4, %v9287_v3  ;;  %v9300_v4 = vld [vmem:[#allocation280_spill] sm:$0xff]  ;;  %v9303_v14 = vld [vmem:[#allocation345_spill] sm:$0xff]  ;;  %2200 = vmatpush.bf16.msrb.mxu3 %v3608_v30  ;;  %v1728_v40 = vrot.slane %v1685_v36, 4 }
 0x654   : > { %v1694_v29 = vrot.slane %v1693_v20, 2  ;;  %v3496_v37 = vor.u32 %v9301_v23, %v9300_v4  ;;  %v3620_v16 = vor.u32 %v9303_v14, %v9302_v34  ;;  %v9311_v30 = vld [vmem:[#allocation12_spill] sm:$0xff]  ;;  %v9313_v34 = vld [vmem:[#allocation337_spill] sm:$0xff] }
 0x655   : > { %v1641_v28 = vpop.permute.xlu0 %1640  ;;  %2159 = vmatpush.bf16.msrb.mxu0 %v3508_v19  ;;  %v9304_v19 = vld [vmem:[#allocation511_spill] sm:$0xff] }
 0x656   : > { %v1678_v17 = vmul.f32 %v1641_v28, %v9286_v32  ;;  %v9297_v28 = vld [vmem:[#allocation515_spill] sm:$0xff]  ;;  %v9298_v32 = vld [vmem:[#allocation277_spill] sm:$0xff]  ;;  %2172 = vmatpush.bf16.msrb.mxu1 %v3636_v12  ;;  %v1695_v10 = vadd.f32 %v1694_v29, %v1693_v20  ;;  %2186 = vmatpush.bf16.msrb.mxu2 %v3496_v37  ;;  %v9309_v12 = vld [vmem:[#allocation272_spill] sm:$0xff]  ;;  %v1706_v20 = vrot.slane %v1705_v39, 2  ;;  %v1717_v29 = vadd.f32 %v1716_v6, %v1683_v25 }
 0x657   : > { %v3971_v7 = vor.u32 %v9297_v28, %v9296_v2  ;;  %v3492_v3 = vor.u32 %v9299_v13, %v9298_v32  ;;  %v3955_v28 = vor.u32 %v9305_v38, %v9304_v19  ;;  %v9306_v13 = vld [vmem:[#allocation265_spill] sm:$0xff]  ;;  %v9314_v19 = vld [vmem:[#allocation516_spill] sm:$0xff]  ;;  %2201 = vmatmul.bf16.vlgmr.msrb.gmra.mxu3 %v7535_v1  ;;  %v1729_v37 = vadd.f32 %v1728_v40, %v1685_v36 }
 0x658   : > { %v1686_v24 = vrot.slane %v1678_v17, 4  ;;  %v1575_v42 = vperm.slane %v9306_v13, 0  ;;  %v1696_v33 = vrot.slane %v1695_v10, 1  ;;  %v9315_v38 = vld [vmem:[#allocation520_spill] sm:$0xff] }
 0x659   : > { %2651 = vmatpush.bf16.msra.mxu3 %v3971_v7  ;;  %2160 = vmatpush.bf16.msrb.mxu0 %v3492_v3  ;;  %v9312_v7 = vld [vmem:[#allocation333_spill] sm:$0xff]  ;;  %v3967_v3 = vor.u32 %v9315_v38, %v9314_v19  ;;  %v9318_v40 = vld [vmem:[#allocation508_spill] sm:$0xff] }
 0x65a   : > { %v1687_v31 = vadd.f32 %v1686_v24, %v1678_v17  ;;  %v3476_v17 = vor.u32 %v9308_v15, %v9307_v9  ;;  %v9310_v24 = vld [vmem:[#allocation268_spill] sm:$0xff]  ;;  %2173 = vmatpush.bf16.msrb.mxu1 %v3620_v16  ;;  %v3604_v14 = vor.u32 %v9313_v34, %v9312_v7  ;;  %v9316_v15 = vld [vmem:[#allocation503_spill] sm:$0xff]  ;;  %v1702_v16 = vrot.slane %v1701_v41, 1 }
 0x65b   : > { %v3480_v4 = vor.u32 %v9310_v24, %v9309_v12  ;;  %v9317_v12 = vld [vmem:[#allocation499_spill] sm:$0xff]  ;;  %v1718_v24 = vrot.slane %v1717_v29, 2  ;;  %v9319_v36 = vld [vmem:[#allocation512_spill] sm:$0xff]  ;;  %v1730_v34 = vrot.slane %v1729_v37, 2 }
 0x65c   : > { %v1688_v2 = vrot.slane %v1687_v31, 2  ;;  %v3939_v25 = vor.u32 %v9317_v12, %v9316_v15 }
 0x65d   : > { %v1661_v32 = vpop.permute.xlu0 %1660  ;;  %2652 = vmatpush.bf16.msra.mxu3 %v3955_v28  ;;  %2161 = vmatpush.bf16.msrb.mxu0 %v3476_v17  ;;  %v3951_v28 = vor.u32 %v9319_v36, %v9318_v40  ;;  %v9320_v17 = vld [vmem:[#allocation495_spill] sm:$0xff]  ;;  %v1731_v15 = vadd.f32 %v1730_v34, %v1729_v37 }
 0x65e   : > { %v1682_v23 = vmul.f32 %v1661_v32, %v9311_v30  ;;  %v1689_v0 = vadd.f32 %v1688_v2, %v1687_v31  ;;  %2187 = vmatpush.bf16.msrb.mxu2 %v3480_v4  ;;  %v1707_v32 = vadd.f32 %v1706_v20, %v1705_v39  ;;  %2174 = vmatpush.bf16.msrb.mxu1 %v3604_v14  ;;  %v9321_v4 = vld [vmem:[#allocation491_spill] sm:$0xff]  ;;  %v9322_v14 = vld [vmem:[#allocation14_spill] sm:$0xff] }
 0x65f   : > { %v1697_v2 = vadd.f32 %v1696_v33, %v1695_v10  ;;  %v3923_v38 = vor.u32 %v9321_v4, %v9320_v17  ;;  %v1703_v10 = vadd.f32 %v1702_v16, %v1701_v41  ;;  %v9325_v41 = vld [vmem:[#allocation487_spill] sm:$0xff] }
 0x660   : > { %v1710_v13 = vrot.slane %v1682_v23, 4  ;;  %v1634_v9 = vpop.f32.mrf.mxu3  ;;  %v1690_v30 = vrot.slane %v1689_v0, 1  ;;  %v9326_v16 = vld [vmem:[#allocation483_spill] sm:$0xff] }
 0x661   : > { %v8092_v6 = vadd.f32 %v1634_v9, %v1575_v42  ;;  %2653 = vmatpush.bf16.msra.mxu3 %v3939_v25  ;;  %2175 = vmatmul.bf16.vlgmr.msrb.gmra.mxu1 %v7535_v1 }
 0x662   : > { %v1711_v31 = vadd.f32 %v1710_v13, %v1682_v23  ;;  %2625 = vmatpush.bf16.msra.mxu1 %v3967_v3  ;;  %v1708_v3 = vrot.slane %v1707_v32, 1  ;;  %v1719_v13 = vadd.f32 %v1718_v24, %v1717_v29  ;;  %v1691_v9 = vadd.f32 %v1690_v30, %v1689_v0  ;;  %v9327_v30 = vld [vmem:[#allocation492_spill] sm:$0xff] }
 0x663   : > { %v1735_v7 = vrot.slane %v8092_v6, 1  ;;  %v1736_v42 = vrot.slane %v8092_v6, 2  ;;  %v1737_v17 = vrot.slane %v8092_v6, 3  ;;  %v1738_v29 = vrot.slane %v8092_v6, 4 }
 0x664   : > { %v1712_v19 = vrot.slane %v1711_v31, 2  ;;  %v1709_v0 = vadd.f32 %v1708_v3, %v1707_v32  ;;  %v1720_v37 = vrot.slane %v1719_v13, 1  ;;  %v1750_v24 = vadd.f32 %v1691_v9, %v8092_v6 }
 0x665   : > { %v1671_v39 = vpop.permute.xlu0 %1670  ;;  %v1751_v20 = vadd.f32 %v1735_v7, %v1697_v2  ;;  %v1752_v25 = vadd.f32 %v1736_v42, %v1703_v10  ;;  %2654 = vmatpush.bf16.msra.mxu3 %v3923_v38  ;;  %v9323_v2 = vld [vmem:[#allocation500_spill] sm:$0xff]  ;;  %v9329_v10 = vld [vmem:[#allocation479_spill] sm:$0xff]  ;;  %v1741_v9 = vrot.slane %v8092_v6, 7 }
 0x666   : > { %v1713_v23 = vadd.f32 %v1712_v19, %v1711_v31  ;;  %v1684_v33 = vmul.f32 %v1671_v39, %v9322_v14  ;;  %2626 = vmatpush.bf16.msra.mxu1 %v3951_v28  ;;  %v9324_v7 = vld [vmem:[#allocation504_spill] sm:$0xff]  ;;  %v3907_v31 = vor.u32 %v9326_v16, %v9325_v41  ;;  %v9330_v14 = vld [vmem:[#allocation475_spill] sm:$0xff] }
 0x667   : > { %v1766_v4 = vrot.slane %v1751_v20, 7  ;;  %v3935_v1 = vor.u32 %v9324_v7, %v9323_v2  ;;  %v9328_v28 = vld [vmem:[#allocation496_spill] sm:$0xff]  ;;  %v1768_v20 = vrot.slane %v1752_v25, 6  ;;  %v1732_v2 = vrot.slane %v1731_v15, 1 }
 0x668   : > { %v1714_v12 = vrot.slane %v1713_v23, 1  ;;  %v1722_v40 = vrot.slane %v1684_v33, 4  ;;  %v1636_v36 = vpop.f32.mrf.mxu3  ;;  %v3919_v34 = vor.u32 %v9328_v28, %v9327_v30  ;;  %v9332_v7 = vld [vmem:[#allocation488_spill] sm:$0xff] }
 0x669   : > { %2655 = vmatpush.bf16.msra.mxu3 %v3907_v31  ;;  %v3891_v36 = vor.u32 %v9330_v14, %v9329_v10  ;;  %v1767_v32 = vsel %vm1415_vm0, %v1766_v4, %v1750_v24  ;;  %v9333_v31 = vld [vmem:[#allocation471_spill] sm:$0xff]  ;;  %v1733_v30 = vadd.f32 %v1732_v2, %v1731_v15  ;;  %v9335_v24 = vld [vmem:[#allocation476_spill] sm:$0xff]  ;;  %v9340_v2 = vld [vmem:[#allocation517_spill] sm:$0xff] }
 0x66a   : > { %v1715_v19 = vadd.f32 %v1714_v12, %v1713_v23  ;;  %v1723_v39 = vadd.f32 %v1722_v40, %v1684_v33  ;;  %2627 = vmatpush.bf16.msra.mxu1 %v3935_v1  ;;  %v1739_v23 = vrot.slane %v8092_v6, 5  ;;  %v1753_v33 = vadd.f32 %v1737_v17, %v1709_v0  ;;  %v9331_v40 = vld [vmem:[#allocation484_spill] sm:$0xff]  ;;  %v9338_v10 = vld [vmem:[#allocation459_spill] sm:$0xff] }
 0x66b   : > { %v1721_v12 = vadd.f32 %v1720_v37, %v1719_v13  ;;  %v3903_v1 = vor.u32 %v9332_v7, %v9331_v40  ;;  %v1769_v25 = vsel %vm1417_vm1, %v1768_v20, %v1767_v32  ;;  %v1740_v13 = vrot.slane %v8092_v6, 6  ;;  %v9336_v28 = vld [vmem:[#allocation480_spill] sm:$0xff]  ;;  %v9337_v20 = vld [vmem:[#allocation463_spill] sm:$0xff] }
 0x66c   : > { %v1724_v42 = vrot.slane %v1723_v39, 2  ;;  %v1754_v38 = vadd.f32 %v1738_v29, %v1715_v19  ;;  %v9334_v19 = vld [vmem:[#allocation467_spill] sm:$0xff]  ;;  %v1770_v4 = vrot.slane %v1753_v33, 5  ;;  %v1757_v0 = vadd.f32 %v1741_v9, %v1733_v30  ;;  %v9347_v30 = vld [vmem:[#allocation513_spill] sm:$0xff] }
 0x66d   : > { %2656 = vmatpush.bf16.msra.mxu3 %v3891_v36  ;;  %v3875_v29 = vor.u32 %v9334_v19, %v9333_v31  ;;  %v1755_v17 = vadd.f32 %v1739_v23, %v1721_v12  ;;  %v3859_v15 = vor.u32 %v9338_v10, %v9337_v20  ;;  %v9339_v36 = vld [vmem:[#allocation521_spill] sm:$0xff]  ;;  %v9342_v12 = vld [vmem:[#allocation472_spill] sm:$0xff]  ;;  %v9346_v31 = vld [vmem:[#allocation451_spill] sm:$0xff] }
 0x66e   : > { %v1725_v3 = vadd.f32 %v1724_v42, %v1723_v39  ;;  %2628 = vmatpush.bf16.msra.mxu1 %v3919_v34  ;;  %v1772_v16 = vrot.slane %v1754_v38, 4  ;;  %v1771_v37 = vsel %vm1419_vm2, %v1770_v4, %v1769_v25  ;;  %v3887_v34 = vor.u32 %v9336_v28, %v9335_v24  ;;  %v9352_v24 = vld [vmem:[#allocation522_spill] sm:$0xff]  ;;  %v9355_v20 = vld [vmem:[#allocation447_spill] sm:$0xff] }
 0x66f   : > { %v1774_v14 = vrot.slane %v1755_v17, 3  ;;  %v3979_v23 = vor.u32 %v9340_v2, %v9339_v36  ;;  %v1778_v32 = vrot.slane %v1757_v0, 1  ;;  %v9348_v17 = vld [vmem:[#allocation509_spill] sm:$0xff]  ;;  %v9356_v10 = vld [vmem:[#allocation443_spill] sm:$0xff] }
 0x670   : > { %v1726_v41 = vrot.slane %v1725_v3, 1  ;;  %v1773_v38 = vsel %vm1421_vm3, %v1772_v16, %v1771_v37  ;;  %v9345_v16 = vld [vmem:[#allocation455_spill] sm:$0xff]  ;;  %v3963_v4 = vor.u32 %v9348_v17, %v9347_v30  ;;  %v9351_v37 = vld [vmem:[#allocation518_spill] sm:$0xff]  ;;  %v9358_v36 = vld [vmem:[#allocation501_spill] sm:$0xff] }
 0x671   : > { %2657 = vmatpush.bf16.msra.mxu3 %v3875_v29  ;;  %v1775_v33 = vsel %vm1423_vm4, %v1774_v14, %v1773_v38  ;;  %v3843_v19 = vor.u32 %v9346_v31, %v9345_v16  ;;  %v3975_v28 = vor.u32 %v9352_v24, %v9351_v37  ;;  %v9357_v14 = vld [vmem:[#allocation505_spill] sm:$0xff]  ;;  %v9368_v31 = vld [vmem:[#allocation506_spill] sm:$0xff]  ;;  %v9369_v30 = vld [vmem:[#allocation428_spill] sm:$0xff] }
 0x672   : > { %v1727_v39 = vadd.f32 %v1726_v41, %v1725_v3  ;;  %2629 = vmatpush.bf16.msra.mxu1 %v3903_v1  ;;  %v9341_v3 = vld [vmem:[#allocation468_spill] sm:$0xff]  ;;  %v3947_v2 = vor.u32 %v9358_v36, %v9357_v14  ;;  %v9373_v37 = vld [vmem:[#allocation489_spill] sm:$0xff]  ;;  %v9379_v14 = vld [vmem:[#allocation494_spill] sm:$0xff] }
 0x673   : > { %v3871_v9 = vor.u32 %v9342_v12, %v9341_v3  ;;  %v9343_v1 = vld [vmem:[#allocation452_spill] sm:$0xff]  ;;  %v9374_v24 = vld [vmem:[#allocation485_spill] sm:$0xff]  ;;  %v9380_v36 = vld [vmem:[#allocation498_spill] sm:$0xff] }
 0x674   : > { %v1756_v42 = vadd.f32 %v1740_v13, %v1727_v39  ;;  %v9344_v41 = vld [vmem:[#allocation456_spill] sm:$0xff] }
 0x675   : > { %2658 = vmatpush.bf16.msra.mxu3 %v3859_v15  ;;  %v3839_v25 = vor.u32 %v9344_v41, %v9343_v1  ;;  %v9349_v13 = vld [vmem:[#allocation460_spill] sm:$0xff]  ;;  %v3827_v15 = vor.u32 %v9356_v10, %v9355_v20  ;;  %v9365_v41 = vld [vmem:[#allocation497_spill] sm:$0xff]  ;;  %v9377_v20 = vld [vmem:[#allocation423_spill] sm:$0xff] }
 0x676   : > { %v1776_v6 = vrot.slane %v1756_v42, 2  ;;  %2630 = vmatpush.bf16.msra.mxu1 %v3887_v34  ;;  %v9350_v39 = vld [vmem:[#allocation464_spill] sm:$0xff]  ;;  %v9378_v10 = vld [vmem:[#allocation419_spill] sm:$0xff] }
 0x677   : > { %v3855_v0 = vor.u32 %v9350_v39, %v9349_v13  ;;  %v9353_v34 = vld [vmem:[#allocation444_spill] sm:$0xff]  ;;  %v9371_v13 = vld [vmem:[#allocation431_spill] sm:$0xff] }
 0x678   : > { %v1777_v40 = vsel %vm1425_vm5, %v1776_v6, %v1775_v33  ;;  %v9354_v42 = vld [vmem:[#allocation448_spill] sm:$0xff]  ;;  %v9359_v6 = vld [vmem:[#allocation510_spill] sm:$0xff]  ;;  %v9372_v39 = vld [vmem:[#allocation427_spill] sm:$0xff] }
 0x679   : > { %v1779_v7 = vsel %vm1427_vm6, %v1778_v32, %v1777_v40  ;;  %2703 = vmatpush.bf16.msrb.mxu3 %v3979_v23  ;;  %v3823_v38 = vor.u32 %v9354_v42, %v9353_v34  ;;  %v8157_v23 = vpack.c.bf16 %v4509_v21, %v4509_v21  ;;  %v9360_v33 = vld [vmem:[#allocation514_spill] sm:$0xff]  ;;  %v9361_v3 = vld [vmem:[#allocation436_spill] sm:$0xff]  ;;  %v9363_v40 = vld [vmem:[#allocation439_spill] sm:$0xff] }
 0x67a   : > { %v1781_v29 = vpack.c.bf16 %v1779_v7, %v1779_v7  ;;  %2883 = vst [vmem:[%s2882_s3] sm:$0xff] %v1779_v7  ;;  %2631 = vmatpush.bf16.msra.mxu1 %v3871_v9  ;;  %v3959_v32 = vor.u32 %v9360_v33, %v9359_v6  ;;  %v9362_v12 = vld [vmem:[#allocation440_spill] sm:$0xff]  ;;  %v9364_v7 = vld [vmem:[#allocation435_spill] sm:$0xff]  ;;  %v9367_v21 = vld [vmem:[#allocation502_spill] sm:$0xff] }
 0x67b   : > { %v3807_v9 = vor.u32 %v9362_v12, %v9361_v3  ;;  %v3811_v1 = vor.u32 %v9364_v7, %v9363_v40  ;;  %2659 = vmatmul.bf16.vlgmr.msra.gmra.mxu3 %v8157_v23  ;;  %v9370_v17 = vld [vmem:[#allocation432_spill] sm:$0xff]  ;;  %v9381_v6 = vld [vmem:[#allocation481_spill] sm:$0xff]  ;;  %v9385_v40 = vld [vmem:[#allocation415_spill] sm:$0xff] }
 0x67c   : > { %2110 = vmatmul.bf16.vlgmr.msra.gmra.mxu0 %v1781_v29  ;;  %2136 = vmatmul.bf16.vlgmr.msra.gmra.mxu2 %v1781_v29  ;;  %v9375_v34 = vld [vmem:[#allocation420_spill] sm:$0xff]  ;;  %v9382_v33 = vld [vmem:[#allocation477_spill] sm:$0xff]  ;;  %v9386_v7 = vld [vmem:[#allocation411_spill] sm:$0xff] }
 0x67d   : > { %2612 = vmatpush.bf16.msra.mxu0 %v3839_v25  ;;  %2638 = vmatpush.bf16.msra.mxu2 %v3843_v19  ;;  %v9366_v25 = vld [vmem:[#allocation493_spill] sm:$0xff]  ;;  %v3943_v19 = vor.u32 %v9368_v31, %v9367_v21  ;;  %v9376_v42 = vld [vmem:[#allocation424_spill] sm:$0xff] }
 0x67e   : > { %2704 = vmatpush.bf16.msrb.mxu3 %v3963_v4  ;;  %2632 = vmatpush.bf16.msra.mxu1 %v3855_v0  ;;  %v3931_v16 = vor.u32 %v9366_v25, %v9365_v41  ;;  %v3791_v4 = vor.u32 %v9370_v17, %v9369_v30  ;;  %v3795_v0 = vor.u32 %v9372_v39, %v9371_v13  ;;  %v9383_v3 = vld [vmem:[#allocation412_spill] sm:$0xff]  ;;  %v9387_v41 = vld [vmem:[#allocation486_spill] sm:$0xff]  ;;  %v9389_v21 = vld [vmem:[#allocation473_spill] sm:$0xff] }
 0x67f   : > { %v9384_v12 = vld [vmem:[#allocation416_spill] sm:$0xff]  ;;  %v9388_v25 = vld [vmem:[#allocation490_spill] sm:$0xff]  ;;  %v9390_v31 = vld [vmem:[#allocation469_spill] sm:$0xff] }
 0x680   : > { %v9391_v30 = vld [vmem:[#allocation404_spill] sm:$0xff]  ;;  %v9394_v13 = vld [vmem:[#allocation403_spill] sm:$0xff] }
 0x681   : > { %2613 = vmatpush.bf16.msra.mxu0 %v3823_v38  ;;  %2639 = vmatpush.bf16.msra.mxu2 %v3827_v15  ;;  %v3775_v38 = vor.u32 %v9376_v42, %v9375_v34  ;;  %v3779_v15 = vor.u32 %v9378_v10, %v9377_v20  ;;  %v9398_v34 = vld [vmem:[#allocation461_spill] sm:$0xff]  ;;  %v9400_v20 = vld [vmem:[#allocation400_spill] sm:$0xff] }
 0x682   : > { %2677 = vmatpush.bf16.msrb.mxu1 %v3975_v28  ;;  %2705 = vmatpush.bf16.msrb.mxu3 %v3947_v2  ;;  %v3915_v28 = vor.u32 %v9374_v24, %v9373_v37  ;;  %v3927_v2 = vor.u32 %v9380_v36, %v9379_v14  ;;  %v9396_v37 = vld [vmem:[#allocation482_spill] sm:$0xff]  ;;  %v9402_v14 = vld [vmem:[#allocation395_spill] sm:$0xff] }
 0x683   : > { %2633 = vmatmul.bf16.vlgmr.msra.gmra.mxu1 %v8157_v23 }
 0x685   : > { %2614 = vmatpush.bf16.msra.mxu0 %v3807_v9  ;;  %2640 = vmatpush.bf16.msra.mxu2 %v3811_v1  ;;  %v3759_v9 = vor.u32 %v9384_v12, %v9383_v3  ;;  %v3763_v1 = vor.u32 %v9386_v7, %v9385_v40  ;;  %v9406_v3 = vld [vmem:[#allocation453_spill] sm:$0xff]  ;;  %v9408_v40 = vld [vmem:[#allocation474_spill] sm:$0xff] }
 0x686   : > { %2678 = vmatpush.bf16.msrb.mxu1 %v3959_v32  ;;  %2706 = vmatpush.bf16.msrb.mxu3 %v3931_v16  ;;  %v3899_v32 = vor.u32 %v9382_v33, %v9381_v6  ;;  %v3911_v16 = vor.u32 %v9388_v25, %v9387_v41  ;;  %v9404_v6 = vld [vmem:[#allocation458_spill] sm:$0xff] }
 0x687   : > { %v9410_v41 = vld [vmem:[#allocation450_spill] sm:$0xff] }
 0x689   : > { %2615 = vmatpush.bf16.msra.mxu0 %v3791_v4  ;;  %2641 = vmatpush.bf16.msra.mxu2 %v3795_v0  ;;  %v9393_v4 = vld [vmem:[#allocation407_spill] sm:$0xff]  ;;  %v9395_v0 = vld [vmem:[#allocation478_spill] sm:$0xff] }
 0x68a   : > { %2679 = vmatpush.bf16.msrb.mxu1 %v3943_v19  ;;  %2707 = vmatpush.bf16.msrb.mxu3 %v3915_v28  ;;  %v3883_v19 = vor.u32 %v9390_v31, %v9389_v21  ;;  %v3747_v39 = vor.u32 %v9394_v13, %v9393_v4  ;;  %v3895_v24 = vor.u32 %v9396_v37, %v9395_v0  ;;  %v9397_v28 = vld [vmem:[#allocation465_spill] sm:$0xff]  ;;  %v9416_v4 = vld [vmem:[#allocation442_spill] sm:$0xff] }
 0x68b   : > { %v3867_v42 = vor.u32 %v9398_v34, %v9397_v28  ;;  %v9412_v21 = vld [vmem:[#allocation445_spill] sm:$0xff]  ;;  %v9420_v28 = vld [vmem:[#allocation434_spill] sm:$0xff] }
 0x68c   : > { %2162 = vmatmul.bf16.vlgmr.msrb.gmra.mxu0 %v1781_v29  ;;  %2188 = vmatmul.bf16.vlgmr.msrb.gmra.mxu2 %v1781_v29  ;;  %v9392_v29 = vld [vmem:[#allocation408_spill] sm:$0xff]  ;;  %v9418_v0 = vld [vmem:[#allocation437_spill] sm:$0xff] }
 0x68d   : > { %2616 = vmatpush.bf16.msra.mxu0 %v3775_v38  ;;  %2642 = vmatpush.bf16.msra.mxu2 %v3779_v15  ;;  %v3743_v17 = vor.u32 %v9392_v29, %v9391_v30  ;;  %v9399_v38 = vld [vmem:[#allocation396_spill] sm:$0xff]  ;;  %v9401_v15 = vld [vmem:[#allocation399_spill] sm:$0xff]  ;;  %v9414_v30 = vld [vmem:[#allocation466_spill] sm:$0xff] }
 0x68e   : > { %2680 = vmatpush.bf16.msrb.mxu1 %v3927_v2  ;;  %2708 = vmatpush.bf16.msrb.mxu3 %v3899_v32  ;;  %v3727_v10 = vor.u32 %v9400_v20, %v9399_v38  ;;  %v3731_v36 = vor.u32 %v9402_v14, %v9401_v15  ;;  %v9403_v2 = vld [vmem:[#allocation454_spill] sm:$0xff]  ;;  %v9405_v32 = vld [vmem:[#allocation457_spill] sm:$0xff] }
 0x68f   : > { %v3847_v33 = vor.u32 %v9404_v6, %v9403_v2  ;;  %v3851_v12 = vor.u32 %v9406_v3, %v9405_v32  ;;  %v9422_v38 = vld [vmem:[#allocation429_spill] sm:$0xff]  ;;  %v9424_v15 = vld [vmem:[#allocation426_spill] sm:$0xff] }
 0x690   : > { %v9426_v2 = vld [vmem:[#allocation421_spill] sm:$0xff]  ;;  %v9428_v32 = vld [vmem:[#allocation418_spill] sm:$0xff] }
 0x691   : > { %2617 = vmatpush.bf16.msra.mxu0 %v3759_v9  ;;  %2643 = vmatpush.bf16.msra.mxu2 %v3763_v1  ;;  %v9407_v9 = vld [vmem:[#allocation470_spill] sm:$0xff] }
 0x692   : > { %2681 = vmatpush.bf16.msrb.mxu1 %v3911_v16  ;;  %2709 = vmatpush.bf16.msrb.mxu3 %v3883_v19  ;;  %v3879_v7 = vor.u32 %v9408_v40, %v9407_v9  ;;  %v9409_v1 = vld [vmem:[#allocation446_spill] sm:$0xff]  ;;  %v9411_v16 = vld [vmem:[#allocation449_spill] sm:$0xff] }
 0x693   : > { %v3831_v25 = vor.u32 %v9410_v41, %v9409_v1  ;;  %v3835_v31 = vor.u32 %v9412_v21, %v9411_v16  ;;  %v9413_v19 = vld [vmem:[#allocation462_spill] sm:$0xff]  ;;  %v9430_v9 = vld [vmem:[#allocation413_spill] sm:$0xff] }
 0x694   : > { %v3863_v29 = vor.u32 %v9414_v30, %v9413_v19  ;;  %v9433_v41 = vld [vmem:[#allocation409_spill] sm:$0xff]  ;;  %v9435_v21 = vld [vmem:[#allocation398_spill] sm:$0xff] }
 0x695   : > { %2618 = vmatpush.bf16.msra.mxu0 %v3743_v17  ;;  %2644 = vmatpush.bf16.msra.mxu2 %v3747_v39  ;;  %v9415_v17 = vld [vmem:[#allocation438_spill] sm:$0xff]  ;;  %v9417_v39 = vld [vmem:[#allocation441_spill] sm:$0xff] }
 0x696   : > { %2682 = vmatpush.bf16.msrb.mxu1 %v3895_v24  ;;  %2710 = vmatpush.bf16.msrb.mxu3 %v3867_v42  ;;  %v3815_v13 = vor.u32 %v9416_v4, %v9415_v17  ;;  %v3819_v37 = vor.u32 %v9418_v0, %v9417_v39  ;;  %v9419_v24 = vld [vmem:[#allocation430_spill] sm:$0xff]  ;;  %v9421_v42 = vld [vmem:[#allocation433_spill] sm:$0xff]  ;;  %v2150_v4 = vpop.f32.mrf.mxu3 }
 0x697   : > { %v3799_v34 = vor.u32 %v9420_v28, %v9419_v24  ;;  %v3803_v20 = vor.u32 %v9422_v38, %v9421_v42  ;;  %v9437_v30 = vld [vmem:[#allocation401_spill] sm:$0xff]  ;;  %v9439_v38 = vld [vmem:[#allocation394_spill] sm:$0xff] }
 0x699   : > { %2619 = vmatpush.bf16.msra.mxu0 %v3727_v10  ;;  %2645 = vmatpush.bf16.msra.mxu2 %v3731_v36  ;;  %v9423_v10 = vld [vmem:[#allocation422_spill] sm:$0xff]  ;;  %v9425_v36 = vld [vmem:[#allocation425_spill] sm:$0xff] }
 0x69a   : > { %2711 = vmatmul.bf16.vlgmr.msrb.gmra.mxu3 %v8157_v23  ;;  %2683 = vmatpush.bf16.msrb.mxu1 %v3879_v7  ;;  %v3783_v14 = vor.u32 %v9424_v15, %v9423_v10  ;;  %v3787_v6 = vor.u32 %v9426_v2, %v9425_v36  ;;  %v9431_v7 = vld [vmem:[#allocation406_spill] sm:$0xff] }
 0x69c   : > { %2620 = vmatmul.bf16.vlgmr.msra.gmra.mxu0 %v7770_v18  ;;  %2646 = vmatmul.bf16.vlgmr.msra.gmra.mxu2 %v7770_v18 }
 0x69d   : > { %2664 = vmatpush.bf16.msrb.mxu0 %v3847_v33  ;;  %2690 = vmatpush.bf16.msrb.mxu2 %v3851_v12  ;;  %v9427_v33 = vld [vmem:[#allocation414_spill] sm:$0xff]  ;;  %v9429_v12 = vld [vmem:[#allocation417_spill] sm:$0xff] }
 0x69e   : > { %2684 = vmatpush.bf16.msrb.mxu1 %v3863_v29  ;;  %v3767_v3 = vor.u32 %v9428_v32, %v9427_v33  ;;  %v3771_v40 = vor.u32 %v9430_v9, %v9429_v12  ;;  %v9438_v29 = vld [vmem:[#allocation397_spill] sm:$0xff]  ;;  %v2152_v39 = vpop.f32.mrf.mxu3 }
 0x69f   : > { %v3739_v17 = vor.u32 %v9438_v29, %v9437_v30 }
 0x6a1   : > { %2665 = vmatpush.bf16.msrb.mxu0 %v3831_v25  ;;  %2691 = vmatpush.bf16.msrb.mxu2 %v3835_v31  ;;  %v9434_v25 = vld [vmem:[#allocation405_spill] sm:$0xff]  ;;  %v9436_v31 = vld [vmem:[#allocation402_spill] sm:$0xff] }
 0x6a2   : > { %2685 = vmatmul.bf16.vlgmr.msrb.gmra.mxu1 %v8157_v23  ;;  %v9432_v23 = vld [vmem:[#allocation410_spill] sm:$0xff]  ;;  %v3755_v16 = vor.u32 %v9434_v25, %v9433_v41  ;;  %v3735_v19 = vor.u32 %v9436_v31, %v9435_v21 }
 0x6a3   : > { %v3751_v1 = vor.u32 %v9432_v23, %v9431_v7 }
 0x6a5   : > { %2666 = vmatpush.bf16.msrb.mxu0 %v3815_v13  ;;  %2692 = vmatpush.bf16.msrb.mxu2 %v3819_v37  ;;  %v2124_v13 = vpop.f32.mrf.mxu1 }
 0x6a9   : > { %2667 = vmatpush.bf16.msrb.mxu0 %v3799_v34  ;;  %2693 = vmatpush.bf16.msrb.mxu2 %v3803_v20  ;;  %v2207_v20 = vperm.slane %v9439_v38, 0 }
 0x6ad   : > { %2668 = vmatpush.bf16.msrb.mxu0 %v3783_v14  ;;  %2694 = vmatpush.bf16.msrb.mxu2 %v3787_v6  ;;  %v2126_v0 = vpop.f32.mrf.mxu1 }
 0x6b1   : > { %2669 = vmatpush.bf16.msrb.mxu0 %v3767_v3  ;;  %2695 = vmatpush.bf16.msrb.mxu2 %v3771_v40 }
 0x6b5   : > { %2670 = vmatpush.bf16.msrb.mxu0 %v3751_v1  ;;  %2696 = vmatpush.bf16.msrb.mxu2 %v3755_v16 }
 0x6b9   : > { %2671 = vmatpush.bf16.msrb.mxu0 %v3735_v19  ;;  %2697 = vmatpush.bf16.msrb.mxu2 %v3739_v17  ;;  %v2210_v19 = vperm.slane %v9439_v38, 3 }
 0x6bc   : > { %2672 = vmatmul.bf16.vlgmr.msrb.gmra.mxu0 %v7770_v18  ;;  %2698 = vmatmul.bf16.vlgmr.msrb.gmra.mxu2 %v7770_v18  ;;  %v2208_v18 = vperm.slane %v9439_v38, 1 }
 0x6da   : > { %v2202_v24 = vpop.f32.mrf.mxu3 }
 0x6de   : > { %v2176_v37 = vpop.f32.mrf.mxu1 }
 0x6e2   : > { %v2204_v14 = vpop.f32.mrf.mxu3 }
 0x6e6   : > { %v2178_v28 = vpop.f32.mrf.mxu1 }
 0x6f9   : > { %v2111_v34 = vpop.f32.mrf.mxu0 }
 0x6fa   : > { %v2112_v42 = vadd.f32 %v2111_v34, %v7816_v22  ;;  %v2209_v34 = vperm.slane %v9439_v38, 2 }
 0x6fc   : > { %v2125_v10 = vadd.f32 %v2124_v13, %v2112_v42 }
 0x6fe   : > { %v2215_v15 = vadd.f32 %v2207_v20, %v2125_v10  ;;  %v8251_v40 = vpop.f32.mrf.mxu3  ;;  %v9440_v20 = vld [vmem:[#allocation523_spill] sm:$0xff] }
 0x6ff   : > { %v2137_v36 = vpop.f32.mrf.mxu2  ;;  %v9441_v10 = vmov %v9440_v20 }
 0x700   : > { %v3721_v2 = vmul.f32 -1.442695, %v2215_v15  ;;  %v2138_v6 = vadd.f32 %v2137_v36, %v7818_v11  ;;  %v2634_v33 = vpop.f32.mrf.mxu1  ;;  %v2284_v15 = vperm.slane %v9440_v20, 0 }
 0x701   : > { %v2113_v32 = vpop.f32.mrf.mxu0 }
 0x702   : > { %4393 = vpow2.f32 %v3721_v2  ;;  %v2151_v3 = vadd.f32 %v2150_v4, %v2138_v6 }
 0x704   : > { %v2216_v12 = vadd.f32 %v2208_v18, %v2151_v3 }
 0x706   : > { %v3722_v9 = vmul.f32 -1.442695, %v2216_v12  ;;  %v2662_v16 = vpop.f32.mrf.mxu3 }
 0x707   : > { %v2139_v22 = vpop.f32.mrf.mxu2 }
 0x708   : > { %v4394_v7 = vpop.eup %4393  ;;  %4395 = vpow2.f32 %v3722_v9  ;;  %v2636_v23 = vpop.f32.mrf.mxu1 }
 0x709   : > { %v2222_v1 = vadd.f32 1.0, %v4394_v7  ;;  %v2163_v41 = vpop.f32.mrf.mxu0 }
 0x70a   : > { %v2164_v4 = vadd.f32 %v2163_v41, %v7829_v26  ;;  %v2285_v26 = vperm.slane %v9441_v10, 1 }
 0x70b   : > { %4397 = vrcp.f32 %v2222_v1  ;;  %vm2228_vm14 = vweird.f32 %v2222_v1  ;;  %v2232_v23 = vand.u32 2147483647, %v2222_v1 }
 0x70c   : > { %v2177_v28 = vadd.f32 %v2176_v37, %v2164_v4  ;;  %v2234_v37 = vand.u32 2147483648, %v2222_v1 }
 0x70d   : > { %vm2233_vm3 = vcmp.eq.f32.partialorder %v2232_v23, 8.507059e+37 }
 0x70e   : > { %v4396_v25 = vpop.eup %4395  ;;  %v2217_v32 = vadd.f32 %v2209_v34, %v2177_v28 }
 0x70f   : > { %v2241_v11 = vadd.f32 1.0, %v4396_v25  ;;  %v2189_v21 = vpop.f32.mrf.mxu2  ;;  %v9449_v25 = vld [vmem:[#allocation534_spill] sm:$0xff] }
 0x710   : > { %v2190_v31 = vadd.f32 %v2189_v21, %v7831_v35 }
 0x711   : > { %v4398_v30 = vpop.eup %4397  ;;  %4399 = vrcp.f32 %v2241_v11  ;;  %v2165_v29 = vpop.f32.mrf.mxu0  ;;  %v2251_v22 = vand.u32 2147483647, %v2241_v11  ;;  %vm2247_vm15 = vweird.f32 %v2241_v11 }
 0x712   : > { %v2224_v17 = vmul.f32 %v4398_v30, %v2222_v1  ;;  %v2203_v13 = vadd.f32 %v2202_v24, %v2190_v31  ;;  %v2253_v24 = vand.u32 2147483648, %v2241_v11  ;;  %vm2229_vm12 = vweird.f32 %v4398_v30 }
 0x713   : > { %vm8259_vm0 = vmor %vm2228_vm14, %vm2229_vm12  ;;  %vm2252_vm2 = vcmp.eq.f32.partialorder %v2251_v22, 8.507059e+37 }
 0x714   : > { %v2225_v39 = vsub.f32 1.0, %v2224_v17  ;;  %v2218_v0 = vadd.f32 %v2210_v19, %v2203_v13  ;;  %v2235_v19 = vor.u32 1.1754944e-38, %v2234_v37  ;;  %v2254_v29 = vor.u32 1.1754944e-38, %v2253_v24  ;;  %v9448_v24 = vld [vmem:[#allocation537_spill] sm:$0xff] }
 0x716   : > { %v3723_v42 = vmul.f32 -1.442695, %v2218_v0  ;;  %v2226_v36 = vmul.f32 %v4398_v30, %v2225_v39 }
 0x717   : > { %v4400_v14 = vpop.eup %4399  ;;  %v2191_v35 = vpop.f32.mrf.mxu2 }
 0x718   : > { %v2243_v2 = vmul.f32 %v4400_v14, %v2241_v11  ;;  %4401 = vpow2.f32 %v3723_v42  ;;  %v2227_v12 = vadd.f32 %v4398_v30, %v2226_v36  ;;  %vm2248_vm13 = vweird.f32 %v4400_v14  ;;  %v9444_v42 = vld [vmem:[#allocation544_spill] sm:$0xff]  ;;  %v9445_v36 = vld [vmem:[#allocation538_spill] sm:$0xff]  ;;  %v9446_v35 = vld [vmem:[#allocation539_spill] sm:$0xff] }
 0x719   : > { %v2621_v6 = vpop.f32.mrf.mxu0  ;;  %4403 = vtanh.f32 %v2217_v32  ;;  %vm2249_vm1 = vmor %vm2247_vm15, %vm2248_vm13 }
 0x71a   : > { %v2244_v18 = vsub.f32 1.0, %v2243_v2  ;;  %v2622_v3 = vadd.f32 %v2621_v6, %v2284_v15  ;;  %v2231_v31 = vsel %vm8259_vm0, %v4398_v30, %v2227_v12 }
 0x71b   : > { %v2236_v28 = vsel %vm2233_vm3, %v2235_v19, %v2231_v31 }
 0x71c   : > { %v2245_v9 = vmul.f32 %v4400_v14, %v2244_v18  ;;  %v2635_v7 = vadd.f32 %v2634_v33, %v2622_v3 }
 0x71d   : > { %v8263_v21 = vpop.f32.mrf.mxu3 }
 0x71e   : > { %v4402_v41 = vpop.eup %4401  ;;  %v2246_v16 = vadd.f32 %v4400_v14, %v2245_v9  ;;  %v3980_v1 = vmul.f32 -1.442695, %v2635_v7 }
 0x71f   : > { %v2261_v17 = vadd.f32 1.0, %v4402_v41  ;;  %v2647_v33 = vpop.f32.mrf.mxu2  ;;  %v8267_v13 = vpop.f32.mrf.mxu1 }
 0x720   : > { %v2250_v4 = vsel %vm2249_vm1, %v4400_v14, %v2246_v16  ;;  %v2648_v11 = vadd.f32 %v2647_v33, %v2285_v26  ;;  %v4404_v20 = vpop.eup %4403  ;;  %v4014_v14 = vor.u32 %v9446_v35, %v9445_v36  ;;  %v9447_v26 = vld [vmem:[#allocation536_spill] sm:$0xff]  ;;  %v9450_v16 = vld [vmem:[#allocation535_spill] sm:$0xff] }
 0x721   : > { %v2255_v39 = vsel %vm2252_vm2, %v2254_v29, %v2250_v4  ;;  %4405 = vrcp.f32 %v2261_v17  ;;  %v2623_v0 = vpop.f32.mrf.mxu0  ;;  %v2278_v2 = vmul.f32 %v4404_v20, %v2236_v28  ;;  %v2273_v7 = vand.u32 2147483648, %v2261_v17  ;;  %v9451_v28 = vld [vmem:[#allocation532_spill] sm:$0xff] }
 0x722   : > { %v2661_v34 = vadd.f32 %v8251_v40, %v2648_v11  ;;  %v2277_v30 = vmul.f32 %v9444_v42, %v2255_v39  ;;  %4407 = vpow2.f32 %v3980_v1  ;;  %2831 = vmatpush.bf16.msra.mxu0 %v4014_v14  ;;  %v4010_v40 = vor.u32 %v9448_v24, %v9447_v26  ;;  %v9453_v42 = vld [vmem:[#allocation530_spill] sm:$0xff] }
 0x723   : > { %v2271_v41 = vand.u32 2147483647, %v2261_v17  ;;  %v4006_v31 = vor.u32 %v9450_v16, %v9449_v25  ;;  %vm2267_vm5 = vweird.f32 %v2261_v17  ;;  %v2274_v1 = vor.u32 1.1754944e-38, %v2273_v7 }
 0x724   : > { %v3981_v15 = vmul.f32 -1.442695, %v2661_v34  ;;  %v8273_v22 = vadd.f32 %v2278_v2, %v2277_v30   ;;  %v9452_v34 = vld [vmem:[#allocation533_spill] sm:$0xff]  ;;  %v9454_v30 = vld [vmem:[#allocation531_spill] sm:$0xff]  ;;  %v9455_v2 = vld [vmem:[#allocation528_spill] sm:$0xff] }
 0x725   : > { %v2714_v6 = vpop.f32.mrf.mxu3  ;;  %vm2272_vm7 = vcmp.eq.f32.partialorder %v2271_v41, 8.507059e+37  ;;  %v3998_v20 = vor.u32 %v9454_v30, %v9453_v42 }
 0x726   : > { %4409 = vpow2.f32 %v3981_v15  ;;  %2832 = vmatpush.bf16.msra.mxu0 %v4010_v40  ;;  %v9456_v6 = vld [vmem:[#allocation529_spill] sm:$0xff] }
 0x727   : > { %v4406_v18 = vpop.eup %4405  ;;  %v2649_v32 = vpop.f32.mrf.mxu2  ;;  %4411 = vtanh.f32 %v8273_v22 }
 0x728   : > { %v2263_v3 = vmul.f32 %v4406_v18, %v2261_v17  ;;  %v2688_v12 = vpop.f32.mrf.mxu1  ;;  %v4408_v37 = vpop.eup %4407  ;;  %vm2268_vm4 = vweird.f32 %v4406_v18  ;;  %v4002_v17 = vor.u32 %v9452_v34, %v9451_v28  ;;  %v2286_v32 = vperm.slane %v9441_v10, 2 }
 0x729   : > { %v8280_v29 = vadd.f32 1.0, %v4408_v37  ;;  %vm2269_vm6 = vmor %vm2267_vm5, %vm2268_vm4  ;;  %v9457_v12 = vld [vmem:[#allocation526_spill] sm:$0xff]  ;;  %v9458_v37 = vld [vmem:[#allocation527_spill] sm:$0xff] }
 0x72a   : > { %v2264_v9 = vsub.f32 1.0, %v2263_v3  ;;  %2833 = vmatpush.bf16.msra.mxu0 %v4006_v31  ;;  %v2287_v3 = vperm.slane %v9441_v10, 3 }
 0x72b   : > { %vm2725_vm12 = vweird.f32 %v8280_v29 }
 0x72c   : > { %v2265_v23 = vmul.f32 %v4406_v18, %v2264_v9  ;;  %v4410_v19 = vpop.eup %4409  ;;  %v3990_v9 = vor.u32 %v9458_v37, %v9457_v12 }
 0x72d   : > { %v2738_v4 = vadd.f32 1.0, %v4410_v19  ;;  %v4412_v39 = vpop.eup %4411 }
 0x72e   : > { %v2266_v33 = vadd.f32 %v4406_v18, %v2265_v23  ;;  %2834 = vmatpush.bf16.msra.mxu0 %v4002_v17 }
 0x72f   : > { %4413 = vrcp.f32 %v2738_v4  ;;  %v2750_v42 = vand.u32 2147483648, %v2738_v4  ;;  %vm2744_vm9 = vweird.f32 %v2738_v4 }
 0x730   : > { %v2270_v11 = vsel %vm2269_vm6, %v4406_v18, %v2266_v33  ;;  %4415 = vrcp.f32 %v8280_v29  ;;  %v3994_v18 = vor.u32 %v9456_v6, %v9455_v2  ;;  %v9459_v33 = vld [vmem:[#allocation524_spill] sm:$0xff] }
 0x731   : > { %v2275_v0 = vsel %vm2272_vm7, %v2274_v1, %v2270_v11  ;;  %v9460_v1 = vld [vmem:[#allocation525_spill] sm:$0xff]  ;;  %v2751_v2 = vor.u32 1.1754944e-38, %v2750_v42 }
 0x732   : > { %v8287_v23 = vmul.f32 %v4412_v39, %v2275_v0   ;;  %2835 = vmatpush.bf16.msra.mxu0 %v3998_v20  ;;  %v3986_v11 = vor.u32 %v9460_v1, %v9459_v33  ;;  %v2731_v20 = vand.u32 2147483648, %v8280_v29  ;;  %v2859_v1 = vstv %s2858_s12 }
 0x733   : > { %vm2865_vm4 = vweird.f32 %v2859_v1 }
 0x734   : > { %2881 = vst [vmem:[%s2880_s11] sm:$0xff] %v8287_v23 }
 0x735   : > { %v4414_v15 = vpop.eup %4413 }
 0x736   : > { %v4416_v35 = vpop.eup %4415  ;;  %v2740_v14 = vmul.f32 %v4414_v15, %v2738_v4  ;;  %2836 = vmatpush.bf16.msra.mxu0 %v3994_v18  ;;  %vm2745_vm8 = vweird.f32 %v4414_v15 }
 0x737   : > { %v2721_v26 = vmul.f32 %v4416_v35, %v8280_v29  ;;  %vm2726_vm10 = vweird.f32 %v4416_v35  ;;  %vm2746_vm11 = vmor %vm2744_vm9, %vm2745_vm8  ;;  %vm2884_vm9 = vcmask (%p397_p1), 0  }
 0x738   : > { %v2741_v24 = vsub.f32 1.0, %v2740_v14  ;;  %vm2727_vm13 = vmor %vm2725_vm12, %vm2726_vm10 }
 0x739   : > { %v2673_v36 = vpop.f32.mrf.mxu0  ;;  %v2722_v25 = vsub.f32 1.0, %v2721_v26 }
 0x73a   : > { %v2674_v7 = vadd.f32 %v2673_v36, %v2286_v32  ;;  %v2742_v19 = vmul.f32 %v4414_v15, %v2741_v24  ;;  %2837 = vmatpush.bf16.msra.mxu0 %v3990_v9  ;;  %v9461_v24 = vld [vmem:[#allocation543_spill] sm:$0xff] }
 0x73b   : > { %v2723_v28 = vmul.f32 %v4416_v35, %v2722_v25 }
 0x73c   : > { %v2687_v39 = vadd.f32 %v8267_v13, %v2674_v7  ;;  %v2743_v34 = vadd.f32 %v4414_v15, %v2742_v19  ;;  %v2729_v13 = vand.u32 2147483647, %v8280_v29 }
 0x73d   : > { %v2724_v30 = vadd.f32 %v4416_v35, %v2723_v28 }
 0x73e   : > { %2838 = vmatpush.bf16.msra.mxu0 %v3986_v11  ;;  %v2747_v36 = vsel %vm2746_vm11, %v4414_v15, %v2743_v34  ;;  %vm2730_vm15 = vcmp.eq.f32.partialorder %v2729_v13, 8.507059e+37  ;;  %v2869_v34 = vand.u32 2147483647, %v2859_v1 }
 0x73f   : > { %v2699_v40 = vpop.f32.mrf.mxu2  ;;  %v2728_v6 = vsel %vm2727_vm13, %v4416_v35, %v2724_v30 }
 0x740   : > { %v2700_v41 = vadd.f32 %v2699_v40, %v2287_v3  ;;  %v2732_v3 = vor.u32 1.1754944e-38, %v2731_v20  ;;  %vm2870_vm7 = vcmp.eq.f32.partialorder %v2869_v34, 8.507059e+37 }
 0x741   : > { %v2675_v16 = vpop.f32.mrf.mxu0 }
 0x742   : > { %v2713_v31 = vadd.f32 %v8263_v21, %v2700_v41  ;;  %v2748_v21 = vand.u32 2147483647, %v2738_v4  ;;  %v2733_v4 = vsel %vm2730_vm15, %v2732_v3, %v2728_v6 }
 0x744   : > { %v3982_v0 = vmul.f32 -1.442695, %v2713_v31  ;;  %vm2749_vm14 = vcmp.eq.f32.partialorder %v2748_v21, 8.507059e+37 }
 0x745   : > { %v2752_v26 = vsel %vm2749_vm14, %v2751_v2, %v2747_v36  ;;  %v9462_v2 = vld [vmem:[#allocation540_spill] sm:$0xff] }
 0x746   : > { %4417 = vpow2.f32 %v3982_v0  ;;  %v2774_v40 = vmul.f32 %v9461_v24, %v2752_v26  ;;  %v2871_v0 = vand.u32 2147483648, %v2859_v1  ;;  %v2781_v6 = vperm.slane %v9462_v2, 0 }
 0x747   : > { %v2701_v17 = vpop.f32.mrf.mxu2  ;;  %4419 = vtanh.f32 %v2687_v39  ;;  %v4533_v26 = vmov 0.0  }
 0x748   : > { %v2872_v42 = vor.u32 1.1754944e-38, %v2871_v0 }
 0x74c   : > { %v4418_v14 = vpop.eup %4417 }
 0x74d   : > { %v2758_v18 = vadd.f32 1.0, %v4418_v14  ;;  %v4420_v32 = vpop.eup %4419  ;;  %v409_v14 = vstv %s408_s4 }
 0x74e   : > { %v2775_v12 = vmul.f32 %v4420_v32, %v2733_v4 }
 0x74f   : > { %4421 = vrcp.f32 %v2758_v18  ;;  %v2770_v35 = vand.u32 2147483648, %v2758_v18  ;;  %v2768_v7 = vand.u32 2147483647, %v2758_v18  ;;  %vm2764_vm1 = vweird.f32 %v2758_v18 }
 0x750   : > { %v8309_v20 = vadd.f32 %v2775_v12, %v2774_v40  }
 0x751   : > { %v2771_v25 = vor.u32 1.1754944e-38, %v2770_v35  ;;  %vm2769_vm3 = vcmp.eq.f32.partialorder %v2768_v7, 8.507059e+37 }
 0x752   : > { %4423 = vtanh.f32 %v8309_v20 }
 0x753   : > { %4425 = vrcp.f32 %v2859_v1 }
 0x755   : > { %v4422_v37 = vpop.eup %4421 }
 0x756   : > { %v2760_v29 = vmul.f32 %v4422_v37, %v2758_v18  ;;  %vm2765_vm0 = vweird.f32 %v4422_v37  ;;  %v9463_v18 = vld [vmem:[#allocation541_spill] sm:$0xff] }
 0x757   : > { %vm2766_vm2 = vmor %vm2764_vm1, %vm2765_vm0  ;;  %vm410_vm8 = vcmp.lt.s32.totalorder %v9463_v18, %v409_v14 }
 0x758   : > { %v2761_v15 = vsub.f32 1.0, %v2760_v29  ;;  %v4424_v31 = vpop.eup %4423  ;;  %v2945_v4 = vsel %vm410_vm8, 1.0, %v4533_v26 }
 0x759   : > { %v4426_v11 = vpop.eup %4425 }
 0x75a   : > { %v2762_v9 = vmul.f32 %v4422_v37, %v2761_v15  ;;  %v2861_v39 = vmul.f32 %v4426_v11, %v2859_v1  ;;  %vm2866_vm5 = vweird.f32 %v4426_v11 }
 0x75b   : > { %vm2867_vm6 = vmor %vm2865_vm4, %vm2866_vm5 }
 0x75c   : > { %v2763_v41 = vadd.f32 %v4422_v37, %v2762_v9  ;;  %v2862_v28 = vsub.f32 1.0, %v2861_v39 }
 0x75e   : > { %v2767_v16 = vsel %vm2766_vm2, %v4422_v37, %v2763_v41  ;;  %v2863_v17 = vmul.f32 %v4426_v11, %v2862_v28 }
 0x75f   : > { %v2772_v19 = vsel %vm2769_vm3, %v2771_v25, %v2767_v16 }
 0x760   : > { %v2778_v21 = vmul.f32 %v4424_v31, %v2772_v19   ;;  %v2864_v30 = vadd.f32 %v4426_v11, %v2863_v17 }
 0x762   : > { %v2779_v33 = vpack.c.bf16 %v2778_v21, %v2778_v21  ;;  %v2868_v13 = vsel %vm2867_vm6, %v4426_v11, %v2864_v30 }
 0x763   : > { %v2873_v36 = vsel %vm2870_vm7, %v2872_v42, %v2868_v13 }
 0x764   : > { %2839 = vmatmul.bf16.vlgmr.msra.gmra.mxu0 %v2779_v33  ;;  %4280 = vpush %v2873_v36 }
 0x795   : > { %s4281_s22 = spop %4280 }
 0x796   : > { %s2875_s8 = smul.f32 0.005, %s4281_s22 }
 0x798   : > { %s2876_s23 = smul.f32 %s2875_s8, %s2857_s5 }
 0x79a   : > { %v2877_v25 = vstv %s2876_s23 }
 0x7e1   : > { %v2840_v32 = vpop.f32.mrf.mxu0 }
 0x7e2   : > { %v2841_v3 = vadd.f32 %v2840_v32, %v2781_v6 }
 0x7e4   : > { %v2844_v24 = vsub.f32 %v2841_v3, %v4525_v8  ;;  %v9464_v8 = vld [vmem:[#allocation542_spill] sm:$0xff] }
 0x7e6   : > { %v2845_v40 = vmul.f32 %v2945_v4, %v2844_v24 }
 0x7e8   : > { %v2846_v12 = vmul.f32 %v2845_v40, %v2845_v40 }
 0x7e9   : > { %v2842_v37 = vpop.f32.mrf.mxu0 }
 0x7ea   : > { %2847 = vadd.xlane.f32.xlu0 %v2846_v12 }
 0x85d   : > { %v2848_v29 = vpop.xlane.xlu0 %2847 }
 0x85e   : > { %v2849_v15 = vrot.slane %v2848_v29, 4 }
 0x860   : > { %v2850_v35 = vadd.f32 %v2849_v15, %v2848_v29 }
 0x862   : > { %v2851_v9 = vrot.slane %v2850_v35, 2 }
 0x864   : > { %v2852_v7 = vadd.f32 %v2851_v9, %v2850_v35 }
 0x866   : > { %v2853_v41 = vrot.slane %v2852_v7, 1 }
 0x868   : > { %v2854_v16 = vadd.f32 %v2853_v41, %v2852_v7 }
 0x86a   : > { %v2878_v31 = vmul.f32 %v2877_v25, %v2854_v16  ;;  %399 = sbr.rel (!%p397_p1) target bundleno = 554 (0x22a), region = 127 }
 0x86c   : > { %v2879_v19 = vadd.f32 %v9464_v8, %v2878_v31   ;;  %v9466_v8 = vmov %v7766_v5 }
 0x86e   : > { %v9465_v25 = vmov %v2879_v19  ;;  %2885 = vst.msk [vmem:[#allocation5] sm:$0x1] (%p397_p1), %vm2884_vm9, %v2879_v19 }
 0x86f   :  { %2900 = dma.vmem_to_hbm [thread:$0]  %s2896_s18, 16, %s2898_s15, [#allocation3]  }
 0x870   :  { %4497 = dma.done.wait [#allocation3], 16  }
 0x871   :  { %4498 = vsyncadd [#allocation3], 4294967280 }
 0x872   :  { %2909 = vsyncpa [#allocation3], 1 }
 0x873   :  { %2910 = vsyncpa [#allocation4], 1 }

</bundles_post_ra>
